<compile_context>
chip_gen: v7x
topology: tpu7x:2x2x1
jax: 0.10.0
libtpu: 0.0.40
codegen_flags: <defaults>
</compile_context>

<pallas_src>
import math

import jax
import jax.numpy as jnp
from jax.experimental import pallas as pl
from jax.experimental.pallas import tpu as pltpu

ALPHA = 0.2              # LeakyReLU negative slope
MASK_FILL = -1e15        # value used by masked_fill_


def _chip_kind():
    try:
        return jax.devices()[0].device_kind.lower()
    except Exception:
        return ""


_KIND = _chip_kind()
_IS_V7 = "v7" in _KIND
# bf16 VPU/EUP only on v6e / v7x; fall back to exact-f32 softmax math elsewhere.
_BF16_SOFTMAX = ("v6" in _KIND) or _IS_V7
_TQ_CAP = 256 if _IS_V7 else 512
_TILE_BUDGET = (24 if _IS_V7 else 40) * 1024 * 1024
_VMEM_LIMIT = (32 if _IS_V7 else 64) * 1024 * 1024


def _pick_tile(n_pad):
    """Largest query tile (<= generation cap) whose live temporaries fit VMEM."""
    bytes_per_row = n_pad * 22   # ~20 B f32 temps + 2 B int8 mask double-buffer
    for cand in (512, 256, 128):
        if cand > _TQ_CAP:
            continue
        if n_pad % cand == 0 and cand * bytes_per_row <= _TILE_BUDGET:
            return cand
    return 128


def _compiler_params():
    return pltpu.CompilerParams(
        dimension_semantics=("parallel",),
        vmem_limit_bytes=_VMEM_LIMIT)


# ---------------------------------------------------------------------------
# Shared in-kernel masked softmax for one [TQ, N] score slab -> bf16 probs
# ---------------------------------------------------------------------------
def _masked_softmax_bf16(e1, e2_row, mask_i8):
    scores = e1 + e2_row                                  # [TQ, N] f32, VPU bcast add
    scores = jnp.maximum(scores, ALPHA * scores)          # LeakyReLU (mul+max)
    masked = jnp.where(mask_i8 != 0, scores, jnp.float32(MASK_FILL))
    m = jnp.max(masked, axis=1, keepdims=True)            # f32, exact
    if _BF16_SOFTMAX:
        e = jnp.exp((masked - m).astype(jnp.bfloat16))    # bf16 EUP
        s = jnp.sum(e, axis=1, keepdims=True, dtype=jnp.float32)   # f32 accumulation
        probs = e * pl.reciprocal(s, approx=True).astype(jnp.bfloat16)
    else:
        e = jnp.exp(masked - m)
        s = jnp.sum(e, axis=1, keepdims=True)
        probs = (e * pl.reciprocal(s, approx=True)).astype(jnp.bfloat16)
    return probs                                          # bf16 [TQ, N]


# ---------------------------------------------------------------------------
# Kernel 1: projection + attention logits for one query-row tile
#   h  = x_tile @ W         [TQ, F_pad]  (bf16 MXU, f32 acc; stored bf16)
#   e1 = h . a1, e2 = h . a2             [TQ, 1]  (f32)
# ---------------------------------------------------------------------------
def _proj_logits_kernel(x_ref, w_ref, a1_ref, a2_ref, h_ref, e1_ref, e2_ref):
    h = jnp.dot(x_ref[...], w_ref[...], preferred_element_type=jnp.float32)
    h_ref[...] = h.astype(h_ref.dtype)
    e1_ref[...] = jnp.sum(h * a1_ref[...], axis=-1, keepdims=True)
    e2_ref[...] = jnp.sum(h * a2_ref[...], axis=-1, keepdims=True)


def _project_and_logits(x_bf16, w_bf16, a1_row, a2_row, tq):
    n_pad, f_in = x_bf16.shape
    f_out_pad = w_bf16.shape[1]
    return pl.pallas_call(
        _proj_logits_kernel,
        grid=(n_pad // tq,),
        in_specs=[
            pl.BlockSpec((tq, f_in), lambda i: (i, 0)),       # x tile (streamed, bf16)
            pl.BlockSpec((f_in, f_out_pad), lambda i: (0, 0)),  # W (resident, bf16)
            pl.BlockSpec((1, f_out_pad), lambda i: (0, 0)),   # a1 (resident)
            pl.BlockSpec((1, f_out_pad), lambda i: (0, 0)),   # a2 (resident)
        ],
        out_specs=[
            pl.BlockSpec((tq, f_out_pad), lambda i: (i, 0)),  # lane-dense h
            pl.BlockSpec((tq, 1), lambda i: (i, 0)),
            pl.BlockSpec((tq, 1), lambda i: (i, 0)),
        ],
        out_shape=[
            jax.ShapeDtypeStruct((n_pad, f_out_pad), jnp.bfloat16),
            jax.ShapeDtypeStruct((n_pad, 1), jnp.float32),
            jax.ShapeDtypeStruct((n_pad, 1), jnp.float32),
        ],
        compiler_params=_compiler_params(),
    )(x_bf16, w_bf16, a1_row, a2_row)


# ---------------------------------------------------------------------------
# Kernel 2: round-1 attention fused with round-2 projection + logits
#   probs = softmax(mask ? leaky(e1+e2') : -1e15)   [TQ, N]
#   z     = probs @ h1                              [TQ, F_pad] (f32 acc, in vregs)
#   h2    = z @ W2                                  [TQ, F_pad] (stored bf16)
#   e3 = h2.a1, e4 = h2.a2                          [TQ, 1]
# ---------------------------------------------------------------------------
def _attn_proj_kernel(e1_ref, e2row_ref, mask_ref, h_ref, w2_ref, a1_ref, a2_ref,
                      h2_ref, e3_ref, e4_ref):
    probs = _masked_softmax_bf16(e1_ref[...], e2row_ref[...], mask_ref[...])
    z = jnp.dot(probs, h_ref[...], preferred_element_type=jnp.float32)
    h2 = jnp.dot(z.astype(jnp.bfloat16), w2_ref[...],
                 preferred_element_type=jnp.float32)
    h2_ref[...] = h2.astype(h2_ref.dtype)
    e3_ref[...] = jnp.sum(h2 * a1_ref[...], axis=-1, keepdims=True)
    e4_ref[...] = jnp.sum(h2 * a2_ref[...], axis=-1, keepdims=True)


def _attention_round_fused(e1, e2_row, mask_i8, h1_bf16, w2_bf16, a1_row, a2_row, tq):
    n_pad, f_out_pad = h1_bf16.shape
    return pl.pallas_call(
        _attn_proj_kernel,
        grid=(n_pad // tq,),
        in_specs=[
            pl.BlockSpec((tq, 1), lambda i: (i, 0)),            # query logits
            pl.BlockSpec((1, n_pad), lambda i: (0, 0)),         # key logits (resident)
            pl.BlockSpec((tq, n_pad), lambda i: (i, 0)),        # int8 mask slab (streamed)
            pl.BlockSpec((n_pad, f_out_pad), lambda i: (0, 0)), # h1 bf16 (resident)
            pl.BlockSpec((f_out_pad, f_out_pad), lambda i: (0, 0)),  # W2 bf16 (resident)
            pl.BlockSpec((1, f_out_pad), lambda i: (0, 0)),     # a1
            pl.BlockSpec((1, f_out_pad), lambda i: (0, 0)),     # a2
        ],
        out_specs=[
            pl.BlockSpec((tq, f_out_pad), lambda i: (i, 0)),    # lane-dense h2
            pl.BlockSpec((tq, 1), lambda i: (i, 0)),
            pl.BlockSpec((tq, 1), lambda i: (i, 0)),
        ],
        out_shape=[
            jax.ShapeDtypeStruct((n_pad, f_out_pad), jnp.bfloat16),
            jax.ShapeDtypeStruct((n_pad, 1), jnp.float32),
            jax.ShapeDtypeStruct((n_pad, 1), jnp.float32),
        ],
        compiler_params=_compiler_params(),
    )(e1, e2_row, mask_i8, h1_bf16, w2_bf16, a1_row, a2_row)


# ---------------------------------------------------------------------------
# Kernel 3: final attention round
#   out = softmax(mask ? leaky(e3+e4') : -1e15) @ h2     [TQ, F_pad] f32
# ---------------------------------------------------------------------------
def _attn_final_kernel(e1_ref, e2row_ref, mask_ref, h_ref, out_ref):
    probs = _masked_softmax_bf16(e1_ref[...], e2row_ref[...], mask_ref[...])
    out_ref[...] = jnp.dot(probs, h_ref[...], preferred_element_type=jnp.float32)


def _attention_round_final(e1, e2_row, mask_i8, h_bf16, tq):
    n_pad, f_out_pad = h_bf16.shape
    return pl.pallas_call(
        _attn_final_kernel,
        grid=(n_pad // tq,),
        in_specs=[
            pl.BlockSpec((tq, 1), lambda i: (i, 0)),
            pl.BlockSpec((1, n_pad), lambda i: (0, 0)),
            pl.BlockSpec((tq, n_pad), lambda i: (i, 0)),
            pl.BlockSpec((n_pad, f_out_pad), lambda i: (0, 0)),
        ],
        out_specs=pl.BlockSpec((tq, f_out_pad), lambda i: (i, 0)),
        out_shape=jax.ShapeDtypeStruct((n_pad, f_out_pad), jnp.float32),
        compiler_params=_compiler_params(),
    )(e1, e2_row, mask_i8, h_bf16)


# ---------------------------------------------------------------------------
# Wrapper mirroring NodeAttentionPerMetaPath.forward (inference mode)
# ---------------------------------------------------------------------------
def node_attention_per_metapath(x, mask, trans1, trans2, trans3, attention):
    n, _ = x.shape
    f_out = trans1.shape[1]
    # PyTorch branches on Z.shape[0] == 3025 -> static shape check in JAX.
    t_sel = trans2 if n == 3025 else trans3

    n_pad = ((n + 127) // 128) * 128
    f_out_pad = ((f_out + 127) // 128) * 128
    pad_n = n_pad - n
    pad_f = f_out_pad - f_out
    tq = _pick_tile(n_pad)

    # Lane-dense attention-vector halves, zero-padded along F_out.
    a1_row = jnp.pad(attention[:f_out, :].reshape(1, f_out).astype(jnp.float32),
                     ((0, 0), (0, pad_f)))
    a2_row = jnp.pad(attention[f_out:, :].reshape(1, f_out).astype(jnp.float32),
                     ((0, 0), (0, pad_f)))

    # Weights zero-padded along F_out (padded h/z/out columns are exactly 0)
    # and cast to bf16 for the MXU.
    w1 = jnp.pad(trans1.astype(jnp.float32), ((0, 0), (0, pad_f))).astype(jnp.bfloat16)
    w2 = jnp.pad(t_sel.astype(jnp.float32),
                 ((0, f_out_pad - t_sel.shape[0]), (0, pad_f))).astype(jnp.bfloat16)

    # Pad N to a multiple of 128 (lane-dense [TQ, N] slabs).  Padded mask
    # rows/cols are zero, so padded keys never contribute to real queries and
    # padded query rows are sliced off at the end.
    x_p = jnp.pad(x.astype(jnp.float32), ((0, pad_n), (0, 0))).astype(jnp.bfloat16)
    mask_i8 = jnp.pad((mask != 0).astype(jnp.int8), ((0, pad_n), (0, pad_n)))

    # ---- pass 1: h1 = x @ trans1, per-node logits e1/e2 --------------------
    h1, e1, e2 = _project_and_logits(x_p, w1, a1_row, a2_row, tq)

    # ---- pass 2: round-1 attention fused with round-2 projection/logits ----
    h2, e3, e4 = _attention_round_fused(e1, e2.reshape(1, n_pad), mask_i8,
                                        h1, w2, a1_row, a2_row, tq)

    # ---- pass 3: round-2 attention -----------------------------------------
    out = _attention_round_final(e3, e4.reshape(1, n_pad), mask_i8, h2, tq)

    return out[:n, :f_out]


node_attention_per_metapath_jit = jax.jit(node_attention_per_metapath)


# ---------------------------------------------------------------------------
# Deterministic parameter init (xavier_uniform_ with gain=1.414)
# ---------------------------------------------------------------------------
def xavier_uniform(key, shape, gain=1.414):
    fan_in, fan_out = shape[0], shape[1]
    bound = gain * math.sqrt(6.0 / (fan_in + fan_out))
    return jax.random.uniform(key, shape, jnp.float32, -bound, bound)


if __name__ == "__main__":
    # Small synthetic problem: N nodes (padded to 384 -> 3 query tiles of 128).
    N, F_IN, F_OUT = 300, 32, 32
    ADITION_TAG = F_OUT  # must equal F_OUT for the trans3 branch to typecheck

    key = jax.random.PRNGKey(0)
    k_x, k_m, k_t1, k_t2, k_t3, k_a = jax.random.split(key, 6)

    x = jax.random.normal(k_x, (N, F_IN), jnp.float32)
    # Binary adjacency-style mask; diagonal ones guarantee non-empty rows.
    mask = (jax.random.uniform(k_m, (N, N)) > 0.5).astype(jnp.float32)
    mask = jnp.maximum(mask, jnp.eye(N, dtype=jnp.float32))

    trans1 = xavier_uniform(k_t1, (F_IN, F_OUT))
    trans2 = xavier_uniform(k_t2, (F_OUT, F_OUT))
    trans3 = xavier_uniform(k_t3, (ADITION_TAG, F_OUT))
    attention = xavier_uniform(k_a, (2 * F_OUT, 1))

    out = node_attention_per_metapath_jit(x, mask, trans1, trans2, trans3,
                                          attention)
    out = jax.block_until_ready(out)
    assert out.shape == (N, F_OUT) and out.dtype == jnp.float32

    # Pure-JAX f32 reference (inference-mode forward) for a sanity check.
    # Loose tolerance: kernel uses bf16 matmuls / probs + approx reciprocal.
    def reference(x, mask):
        def rnd(h):
            e1 = h @ attention[:F_OUT, :]
            e2 = h @ attention[F_OUT:, :]
            s = e1 + e2.T
            s = jnp.where(s > 0, s, ALPHA * s)
            s = jnp.where(mask == 0, jnp.float32(MASK_FILL), s)
            p = jax.nn.softmax(s, axis=1)
            return p @ h
        z = rnd(x @ trans1)
        return rnd(z @ trans3)   # N != 3025 -> trans3 branch

    ref = reference(x, mask)
    assert bool(jnp.allclose(out, ref, rtol=0.1, atol=0.1)), (
        f"max abs err {float(jnp.max(jnp.abs(out - ref)))}")
    print("KERNEL_OK")
</pallas_src>

<mosaic_0001>
module attributes {stable_mosaic.version = 11 : i64} {
  func.func @_proj_logits_kernel(%arg0: i32, %arg1: memref<128x32xbf16, #tpu.memory_space<vmem>>, %arg2: memref<32x128xbf16, #tpu.memory_space<vmem>>, %arg3: memref<1x128xf32, #tpu.memory_space<vmem>>, %arg4: memref<1x128xf32, #tpu.memory_space<vmem>>, %arg5: memref<128x128xbf16, #tpu.memory_space<vmem>>, %arg6: memref<128x1xf32, #tpu.memory_space<vmem>>, %arg7: memref<128x1xf32, #tpu.memory_space<vmem>>) attributes {dimension_semantics = [#tpu.dimension_semantics<parallel>], iteration_bounds = array<i64: 3>, scalar_prefetch = 0 : i64, scratch_operands = 0 : i64, tpu.core_type = #tpu.core_type<tc>, window_params = [{transform_indices = @transform_0, window_bounds = array<i64: 128, 32>}, {pipeline_mode = #tpu.pipeline_mode<synchronous>, transform_indices = @transform_1, window_bounds = array<i64: 32, 128>}, {pipeline_mode = #tpu.pipeline_mode<synchronous>, transform_indices = @transform_2, window_bounds = array<i64: 1, 128>}, {pipeline_mode = #tpu.pipeline_mode<synchronous>, transform_indices = @transform_3, window_bounds = array<i64: 1, 128>}, {transform_indices = @transform_4, window_bounds = array<i64: 128, 128>}, {transform_indices = @transform_5, window_bounds = array<i64: 128, 1>}, {transform_indices = @transform_6, window_bounds = array<i64: 128, 1>}]} {
    %c0 = arith.constant 0 : index
    %c0_0 = arith.constant 0 : index
    %0 = vector.load %arg1[%c0, %c0_0] : memref<128x32xbf16, #tpu.memory_space<vmem>>, vector<128x32xbf16>
    %c0_1 = arith.constant 0 : index
    %c0_2 = arith.constant 0 : index
    %1 = vector.load %arg2[%c0_1, %c0_2] : memref<32x128xbf16, #tpu.memory_space<vmem>>, vector<32x128xbf16>
    %cst = arith.constant dense<0.000000e+00> : vector<128x128xf32>
    %2 = tpu.matmul %0, %1, %cst {dimension_numbers = #tpu.dot_dimension_numbers<[1], [0], [0], [1], [0, 0, 1, 1], [], []>} : vector<128x32xbf16>, vector<32x128xbf16>, vector<128x128xf32> -> vector<128x128xf32>
    %3 = arith.truncf %2 : vector<128x128xf32> to vector<128x128xbf16>
    %c0_3 = arith.constant 0 : index
    %c0_4 = arith.constant 0 : index
    %4 = vector.load %arg5[%c0_3, %c0_4] : memref<128x128xbf16, #tpu.memory_space<vmem>>, vector<128x128xbf16>
    tpu.vector_store %arg5[%c0_3, %c0_4], %3 {strides = array<i32>} : memref<128x128xbf16, #tpu.memory_space<vmem>>, vector<128x128xbf16>,
    %c0_5 = arith.constant 0 : index
    %c0_6 = arith.constant 0 : index
    %5 = vector.load %arg3[%c0_5, %c0_6] : memref<1x128xf32, #tpu.memory_space<vmem>>, vector<1x128xf32>
    %6 = vector.broadcast %5 : vector<1x128xf32> to vector<128x128xf32>
    %7 = arith.mulf %2, %6 : vector<128x128xf32>
    %cst_7 = arith.constant dense<0.000000e+00> : vector<128xf32>
    %8 = vector.multi_reduction <add>, %7, %cst_7 [1] : vector<128x128xf32> to vector<128xf32>
    %9 = vector.shape_cast %8 : vector<128xf32> to vector<128x1xf32>
    %c0_8 = arith.constant 0 : index
    %c0_9 = arith.constant 0 : index
    %10 = vector.load %arg6[%c0_8, %c0_9] : memref<128x1xf32, #tpu.memory_space<vmem>>, vector<128x1xf32>
    tpu.vector_store %arg6[%c0_8, %c0_9], %9 {strides = array<i32>} : memref<128x1xf32, #tpu.memory_space<vmem>>, vector<128x1xf32>,
    %c0_10 = arith.constant 0 : index
    %c0_11 = arith.constant 0 : index
    %11 = vector.load %arg4[%c0_10, %c0_11] : memref<1x128xf32, #tpu.memory_space<vmem>>, vector<1x128xf32>
    %12 = vector.broadcast %11 : vector<1x128xf32> to vector<128x128xf32>
    %13 = arith.mulf %2, %12 : vector<128x128xf32>
    %cst_12 = arith.constant dense<0.000000e+00> : vector<128xf32>
    %14 = vector.multi_reduction <add>, %13, %cst_12 [1] : vector<128x128xf32> to vector<128xf32>
    %15 = vector.shape_cast %14 : vector<128xf32> to vector<128x1xf32>
    %c0_13 = arith.constant 0 : index
    %c0_14 = arith.constant 0 : index
    %16 = vector.load %arg7[%c0_13, %c0_14] : memref<128x1xf32, #tpu.memory_space<vmem>>, vector<128x1xf32>
    tpu.vector_store %arg7[%c0_13, %c0_14], %15 {strides = array<i32>} : memref<128x1xf32, #tpu.memory_space<vmem>>, vector<128x1xf32>,
    return
  }
  func.func @transform_0(%arg0: i32) -> (i32, i32) {
    %c0_i32 = arith.constant 0 : i32
    %c0_i32_0 = arith.constant 0 : i32
    return %arg0, %c0_i32 : i32, i32
  }
  func.func @transform_1(%arg0: i32) -> (i32, i32) {
    %c0_i32 = arith.constant 0 : i32
    %c0_i32_0 = arith.constant 0 : i32
    %c0_i32_1 = arith.constant 0 : i32
    return %c0_i32, %c0_i32_0 : i32, i32
  }
  func.func @transform_2(%arg0: i32) -> (i32, i32) {
    %c0_i32 = arith.constant 0 : i32
    %c0_i32_0 = arith.constant 0 : i32
    %c0_i32_1 = arith.constant 0 : i32
    return %c0_i32, %c0_i32_0 : i32, i32
  }
  func.func @transform_3(%arg0: i32) -> (i32, i32) {
    %c0_i32 = arith.constant 0 : i32
    %c0_i32_0 = arith.constant 0 : i32
    %c0_i32_1 = arith.constant 0 : i32
    return %c0_i32, %c0_i32_0 : i32, i32
  }
  func.func @transform_4(%arg0: i32) -> (i32, i32) {
    %c0_i32 = arith.constant 0 : i32
    %c0_i32_0 = arith.constant 0 : i32
    return %arg0, %c0_i32 : i32, i32
  }
  func.func @transform_5(%arg0: i32) -> (i32, i32) {
    %c0_i32 = arith.constant 0 : i32
    %c0_i32_0 = arith.constant 0 : i32
    return %arg0, %c0_i32 : i32, i32
  }
  func.func @transform_6(%arg0: i32) -> (i32, i32) {
    %c0_i32 = arith.constant 0 : i32
    %c0_i32_0 = arith.constant 0 : i32
    return %arg0, %c0_i32 : i32, i32
  }
}

module attributes {stable_mosaic.version = 11 : i64} {
  func.func @_attn_final_kernel(%arg0: i32, %arg1: memref<128x1xf32, #tpu.memory_space<vmem>>, %arg2: memref<1x384xf32, #tpu.memory_space<vmem>>, %arg3: memref<128x384xi8, #tpu.memory_space<vmem>>, %arg4: memref<384x128xbf16, #tpu.memory_space<vmem>>, %arg5: memref<128x128xf32, #tpu.memory_space<vmem>>) attributes {dimension_semantics = [#tpu.dimension_semantics<parallel>], iteration_bounds = array<i64: 3>, scalar_prefetch = 0 : i64, scratch_operands = 0 : i64, tpu.core_type = #tpu.core_type<tc>, window_params = [{transform_indices = @transform_0, window_bounds = array<i64: 128, 1>}, {pipeline_mode = #tpu.pipeline_mode<synchronous>, transform_indices = @transform_1, window_bounds = array<i64: 1, 384>}, {transform_indices = @transform_2, window_bounds = array<i64: 128, 384>}, {pipeline_mode = #tpu.pipeline_mode<synchronous>, transform_indices = @transform_3, window_bounds = array<i64: 384, 128>}, {transform_indices = @transform_4, window_bounds = array<i64: 128, 128>}]} {
    %c0 = arith.constant 0 : index
    %c0_0 = arith.constant 0 : index
    %0 = vector.load %arg1[%c0, %c0_0] : memref<128x1xf32, #tpu.memory_space<vmem>>, vector<128x1xf32>
    %c0_1 = arith.constant 0 : index
    %c0_2 = arith.constant 0 : index
    %1 = vector.load %arg2[%c0_1, %c0_2] : memref<1x384xf32, #tpu.memory_space<vmem>>, vector<1x384xf32>
    %c0_3 = arith.constant 0 : index
    %c0_4 = arith.constant 0 : index
    %2 = vector.load %arg3[%c0_3, %c0_4] : memref<128x384xi8, #tpu.memory_space<vmem>>, vector<128x384xi8>
    %3 = vector.broadcast %0 : vector<128x1xf32> to vector<128x384xf32>
    %4 = vector.broadcast %1 : vector<1x384xf32> to vector<128x384xf32>
    %5 = arith.addf %3, %4 : vector<128x384xf32>
    %cst = arith.constant 2.000000e-01 : f32
    %6 = vector.broadcast %cst : f32 to vector<128x384xf32>
    %7 = arith.mulf %6, %5 : vector<128x384xf32>
    %8 = arith.maximumf %5, %7 : vector<128x384xf32>
    %c0_i8 = arith.constant 0 : i8
    %9 = vector.broadcast %c0_i8 : i8 to vector<128x384xi8>
    %10 = arith.cmpi ne, %2, %9 : vector<128x384xi8>
    %cst_5 = arith.constant -9.99999986E+14 : f32
    %11 = vector.broadcast %cst_5 : f32 to vector<128x384xf32>
    %12 = arith.select %10, %8, %11 : vector<128x384xi1>, vector<128x384xf32>
    %cst_6 = arith.constant dense<0xFF800000> : vector<128xf32>
    %13 = vector.multi_reduction <maximumf>, %12, %cst_6 [1] : vector<128x384xf32> to vector<128xf32>
    %14 = vector.shape_cast %13 : vector<128xf32> to vector<128x1xf32>
    %15 = vector.broadcast %14 : vector<128x1xf32> to vector<128x384xf32>
    %16 = arith.subf %12, %15 : vector<128x384xf32>
    %17 = math.exp %16 : vector<128x384xf32>
    %cst_7 = arith.constant dense<0.000000e+00> : vector<128xf32>
    %18 = vector.multi_reduction <add>, %17, %cst_7 [1] : vector<128x384xf32> to vector<128xf32>
    %19 = vector.shape_cast %18 : vector<128xf32> to vector<128x1xf32>
    %20 = tpu.reciprocal %19 {approx = true} : vector<128x1xf32> -> vector<128x1xf32>
    %21 = vector.broadcast %20 : vector<128x1xf32> to vector<128x384xf32>
    %22 = arith.mulf %17, %21 : vector<128x384xf32>
    %23 = arith.truncf %22 : vector<128x384xf32> to vector<128x384xbf16>
    %c0_8 = arith.constant 0 : index
    %c0_9 = arith.constant 0 : index
    %24 = vector.load %arg4[%c0_8, %c0_9] : memref<384x128xbf16, #tpu.memory_space<vmem>>, vector<384x128xbf16>
    %cst_10 = arith.constant dense<0.000000e+00> : vector<128x128xf32>
    %25 = tpu.matmul %23, %24, %cst_10 {dimension_numbers = #tpu.dot_dimension_numbers<[1], [0], [0], [1], [0, 0, 1, 1], [], []>} : vector<128x384xbf16>, vector<384x128xbf16>, vector<128x128xf32> -> vector<128x128xf32>
    %c0_11 = arith.constant 0 : index
    %c0_12 = arith.constant 0 : index
    %26 = vector.load %arg5[%c0_11, %c0_12] : memref<128x128xf32, #tpu.memory_space<vmem>>, vector<128x128xf32>
    tpu.vector_store %arg5[%c0_11, %c0_12], %25 {strides = array<i32>} : memref<128x128xf32, #tpu.memory_space<vmem>>, vector<128x128xf32>,
    return
  }
  func.func @transform_0(%arg0: i32) -> (i32, i32) {
    %c0_i32 = arith.constant 0 : i32
    %c0_i32_0 = arith.constant 0 : i32
    return %arg0, %c0_i32 : i32, i32
  }
  func.func @transform_1(%arg0: i32) -> (i32, i32) {
    %c0_i32 = arith.constant 0 : i32
    %c0_i32_0 = arith.constant 0 : i32
    %c0_i32_1 = arith.constant 0 : i32
    return %c0_i32, %c0_i32_0 : i32, i32
  }
  func.func @transform_2(%arg0: i32) -> (i32, i32) {
    %c0_i32 = arith.constant 0 : i32
    %c0_i32_0 = arith.constant 0 : i32
    return %arg0, %c0_i32 : i32, i32
  }
  func.func @transform_3(%arg0: i32) -> (i32, i32) {
    %c0_i32 = arith.constant 0 : i32
    %c0_i32_0 = arith.constant 0 : i32
    %c0_i32_1 = arith.constant 0 : i32
    return %c0_i32, %c0_i32_0 : i32, i32
  }
  func.func @transform_4(%arg0: i32) -> (i32, i32) {
    %c0_i32 = arith.constant 0 : i32
    %c0_i32_0 = arith.constant 0 : i32
    return %arg0, %c0_i32 : i32, i32
  }
}

module attributes {stable_mosaic.version = 11 : i64} {
  func.func @_attn_proj_kernel(%arg0: i32, %arg1: memref<128x1xf32, #tpu.memory_space<vmem>>, %arg2: memref<1x384xf32, #tpu.memory_space<vmem>>, %arg3: memref<128x384xi8, #tpu.memory_space<vmem>>, %arg4: memref<384x128xbf16, #tpu.memory_space<vmem>>, %arg5: memref<128x128xbf16, #tpu.memory_space<vmem>>, %arg6: memref<1x128xf32, #tpu.memory_space<vmem>>, %arg7: memref<1x128xf32, #tpu.memory_space<vmem>>, %arg8: memref<128x128xbf16, #tpu.memory_space<vmem>>, %arg9: memref<128x1xf32, #tpu.memory_space<vmem>>, %arg10: memref<128x1xf32, #tpu.memory_space<vmem>>) attributes {dimension_semantics = [#tpu.dimension_semantics<parallel>], iteration_bounds = array<i64: 3>, scalar_prefetch = 0 : i64, scratch_operands = 0 : i64, tpu.core_type = #tpu.core_type<tc>, window_params = [{transform_indices = @transform_0, window_bounds = array<i64: 128, 1>}, {pipeline_mode = #tpu.pipeline_mode<synchronous>, transform_indices = @transform_1, window_bounds = array<i64: 1, 384>}, {transform_indices = @transform_2, window_bounds = array<i64: 128, 384>}, {pipeline_mode = #tpu.pipeline_mode<synchronous>, transform_indices = @transform_3, window_bounds = array<i64: 384, 128>}, {pipeline_mode = #tpu.pipeline_mode<synchronous>, transform_indices = @transform_4, window_bounds = array<i64: 128, 128>}, {pipeline_mode = #tpu.pipeline_mode<synchronous>, transform_indices = @transform_5, window_bounds = array<i64: 1, 128>}, {pipeline_mode = #tpu.pipeline_mode<synchronous>, transform_indices = @transform_6, window_bounds = array<i64: 1, 128>}, {transform_indices = @transform_7, window_bounds = array<i64: 128, 128>}, {transform_indices = @transform_8, window_bounds = array<i64: 128, 1>}, {transform_indices = @transform_9, window_bounds = array<i64: 128, 1>}]} {
    %c0 = arith.constant 0 : index
    %c0_0 = arith.constant 0 : index
    %0 = vector.load %arg1[%c0, %c0_0] : memref<128x1xf32, #tpu.memory_space<vmem>>, vector<128x1xf32>
    %c0_1 = arith.constant 0 : index
    %c0_2 = arith.constant 0 : index
    %1 = vector.load %arg2[%c0_1, %c0_2] : memref<1x384xf32, #tpu.memory_space<vmem>>, vector<1x384xf32>
    %c0_3 = arith.constant 0 : index
    %c0_4 = arith.constant 0 : index
    %2 = vector.load %arg3[%c0_3, %c0_4] : memref<128x384xi8, #tpu.memory_space<vmem>>, vector<128x384xi8>
    %3 = vector.broadcast %0 : vector<128x1xf32> to vector<128x384xf32>
    %4 = vector.broadcast %1 : vector<1x384xf32> to vector<128x384xf32>
    %5 = arith.addf %3, %4 : vector<128x384xf32>
    %cst = arith.constant 2.000000e-01 : f32
    %6 = vector.broadcast %cst : f32 to vector<128x384xf32>
    %7 = arith.mulf %6, %5 : vector<128x384xf32>
    %8 = arith.maximumf %5, %7 : vector<128x384xf32>
    %c0_i8 = arith.constant 0 : i8
    %9 = vector.broadcast %c0_i8 : i8 to vector<128x384xi8>
    %10 = arith.cmpi ne, %2, %9 : vector<128x384xi8>
    %cst_5 = arith.constant -9.99999986E+14 : f32
    %11 = vector.broadcast %cst_5 : f32 to vector<128x384xf32>
    %12 = arith.select %10, %8, %11 : vector<128x384xi1>, vector<128x384xf32>
    %cst_6 = arith.constant dense<0xFF800000> : vector<128xf32>
    %13 = vector.multi_reduction <maximumf>, %12, %cst_6 [1] : vector<128x384xf32> to vector<128xf32>
    %14 = vector.shape_cast %13 : vector<128xf32> to vector<128x1xf32>
    %15 = vector.broadcast %14 : vector<128x1xf32> to vector<128x384xf32>
    %16 = arith.subf %12, %15 : vector<128x384xf32>
    %17 = math.exp %16 : vector<128x384xf32>
    %cst_7 = arith.constant dense<0.000000e+00> : vector<128xf32>
    %18 = vector.multi_reduction <add>, %17, %cst_7 [1] : vector<128x384xf32> to vector<128xf32>
    %19 = vector.shape_cast %18 : vector<128xf32> to vector<128x1xf32>
    %20 = tpu.reciprocal %19 {approx = true} : vector<128x1xf32> -> vector<128x1xf32>
    %21 = vector.broadcast %20 : vector<128x1xf32> to vector<128x384xf32>
    %22 = arith.mulf %17, %21 : vector<128x384xf32>
    %23 = arith.truncf %22 : vector<128x384xf32> to vector<128x384xbf16>
    %c0_8 = arith.constant 0 : index
    %c0_9 = arith.constant 0 : index
    %24 = vector.load %arg4[%c0_8, %c0_9] : memref<384x128xbf16, #tpu.memory_space<vmem>>, vector<384x128xbf16>
    %cst_10 = arith.constant dense<0.000000e+00> : vector<128x128xf32>
    %25 = tpu.matmul %23, %24, %cst_10 {dimension_numbers = #tpu.dot_dimension_numbers<[1], [0], [0], [1], [0, 0, 1, 1], [], []>} : vector<128x384xbf16>, vector<384x128xbf16>, vector<128x128xf32> -> vector<128x128xf32>
    %26 = arith.truncf %25 : vector<128x128xf32> to vector<128x128xbf16>
    %c0_11 = arith.constant 0 : index
    %c0_12 = arith.constant 0 : index
    %27 = vector.load %arg5[%c0_11, %c0_12] : memref<128x128xbf16, #tpu.memory_space<vmem>>, vector<128x128xbf16>
    %cst_13 = arith.constant dense<0.000000e+00> : vector<128x128xf32>
    %28 = tpu.matmul %26, %27, %cst_13 {dimension_numbers = #tpu.dot_dimension_numbers<[1], [0], [0], [1], [0, 0, 1, 1], [], []>} : vector<128x128xbf16>, vector<128x128xbf16>, vector<128x128xf32> -> vector<128x128xf32>
    %29 = arith.truncf %28 : vector<128x128xf32> to vector<128x128xbf16>
    %c0_14 = arith.constant 0 : index
    %c0_15 = arith.constant 0 : index
    %30 = vector.load %arg8[%c0_14, %c0_15] : memref<128x128xbf16, #tpu.memory_space<vmem>>, vector<128x128xbf16>
    tpu.vector_store %arg8[%c0_14, %c0_15], %29 {strides = array<i32>} : memref<128x128xbf16, #tpu.memory_space<vmem>>, vector<128x128xbf16>,
    %c0_16 = arith.constant 0 : index
    %c0_17 = arith.constant 0 : index
    %31 = vector.load %arg6[%c0_16, %c0_17] : memref<1x128xf32, #tpu.memory_space<vmem>>, vector<1x128xf32>
    %32 = vector.broadcast %31 : vector<1x128xf32> to vector<128x128xf32>
    %33 = arith.mulf %28, %32 : vector<128x128xf32>
    %cst_18 = arith.constant dense<0.000000e+00> : vector<128xf32>
    %34 = vector.multi_reduction <add>, %33, %cst_18 [1] : vector<128x128xf32> to vector<128xf32>
    %35 = vector.shape_cast %34 : vector<128xf32> to vector<128x1xf32>
    %c0_19 = arith.constant 0 : index
    %c0_20 = arith.constant 0 : index
    %36 = vector.load %arg9[%c0_19, %c0_20] : memref<128x1xf32, #tpu.memory_space<vmem>>, vector<128x1xf32>
    tpu.vector_store %arg9[%c0_19, %c0_20], %35 {strides = array<i32>} : memref<128x1xf32, #tpu.memory_space<vmem>>, vector<128x1xf32>,
    %c0_21 = arith.constant 0 : index
    %c0_22 = arith.constant 0 : index
    %37 = vector.load %arg7[%c0_21, %c0_22] : memref<1x128xf32, #tpu.memory_space<vmem>>, vector<1x128xf32>
    %38 = vector.broadcast %37 : vector<1x128xf32> to vector<128x128xf32>
    %39 = arith.mulf %28, %38 : vector<128x128xf32>
    %cst_23 = arith.constant dense<0.000000e+00> : vector<128xf32>
    %40 = vector.multi_reduction <add>, %39, %cst_23 [1] : vector<128x128xf32> to vector<128xf32>
    %41 = vector.shape_cast %40 : vector<128xf32> to vector<128x1xf32>
    %c0_24 = arith.constant 0 : index
    %c0_25 = arith.constant 0 : index
    %42 = vector.load %arg10[%c0_24, %c0_25] : memref<128x1xf32, #tpu.memory_space<vmem>>, vector<128x1xf32>
    tpu.vector_store %arg10[%c0_24, %c0_25], %41 {strides = array<i32>} : memref<128x1xf32, #tpu.memory_space<vmem>>, vector<128x1xf32>,
    return
  }
  func.func @transform_0(%arg0: i32) -> (i32, i32) {
    %c0_i32 = arith.constant 0 : i32
    %c0_i32_0 = arith.constant 0 : i32
    return %arg0, %c0_i32 : i32, i32
  }
  func.func @transform_1(%arg0: i32) -> (i32, i32) {
    %c0_i32 = arith.constant 0 : i32
    %c0_i32_0 = arith.constant 0 : i32
    %c0_i32_1 = arith.constant 0 : i32
    return %c0_i32, %c0_i32_0 : i32, i32
  }
  func.func @transform_2(%arg0: i32) -> (i32, i32) {
    %c0_i32 = arith.constant 0 : i32
    %c0_i32_0 = arith.constant 0 : i32
    return %arg0, %c0_i32 : i32, i32
  }
  func.func @transform_3(%arg0: i32) -> (i32, i32) {
    %c0_i32 = arith.constant 0 : i32
    %c0_i32_0 = arith.constant 0 : i32
    %c0_i32_1 = arith.constant 0 : i32
    return %c0_i32, %c0_i32_0 : i32, i32
  }
  func.func @transform_4(%arg0: i32) -> (i32, i32) {
    %c0_i32 = arith.constant 0 : i32
    %c0_i32_0 = arith.constant 0 : i32
    %c0_i32_1 = arith.constant 0 : i32
    return %c0_i32, %c0_i32_0 : i32, i32
  }
  func.func @transform_5(%arg0: i32) -> (i32, i32) {
    %c0_i32 = arith.constant 0 : i32
    %c0_i32_0 = arith.constant 0 : i32
    %c0_i32_1 = arith.constant 0 : i32
    return %c0_i32, %c0_i32_0 : i32, i32
  }
  func.func @transform_6(%arg0: i32) -> (i32, i32) {
    %c0_i32 = arith.constant 0 : i32
    %c0_i32_0 = arith.constant 0 : i32
    %c0_i32_1 = arith.constant 0 : i32
    return %c0_i32, %c0_i32_0 : i32, i32
  }
  func.func @transform_7(%arg0: i32) -> (i32, i32) {
    %c0_i32 = arith.constant 0 : i32
    %c0_i32_0 = arith.constant 0 : i32
    return %arg0, %c0_i32 : i32, i32
  }
  func.func @transform_8(%arg0: i32) -> (i32, i32) {
    %c0_i32 = arith.constant 0 : i32
    %c0_i32_0 = arith.constant 0 : i32
    return %arg0, %c0_i32 : i32, i32
  }
  func.func @transform_9(%arg0: i32) -> (i32, i32) {
    %c0_i32 = arith.constant 0 : i32
    %c0_i32_0 = arith.constant 0 : i32
    return %arg0, %c0_i32 : i32, i32
  }
}

</mosaic_0001>

<bundles_post_ra>
// kernel: node_attention_per_metapath.3
= control target key start
LH: loop header
LB: loop body
LE: loop exit
PB: predicated region body
PF: predicated region fallthrough
CT: control target
= control target key end

     0   :  { %12 = vsyncpa [#allocation3], 0  ;;  %s2020_s0 = inlined_call_operand.hbm [shape: bf16[384,32], index: 0, kind: input, shape index: {}]   ;;  %s2021_s1 = inlined_call_operand.hbm [shape: bf16[32,128], index: 1, kind: input, shape index: {}]   ;;  %s2022_s2 = inlined_call_operand.hbm [shape: f32[1,128], index: 2, kind: input, shape index: {}]   ;;  %s2023_s3 = inlined_call_operand.hbm [shape: f32[1,128], index: 3, kind: input, shape index: {}]   ;;  %s2024_s4 = inlined_call_operand.hbm [shape: bf16[384,128], index: 4, kind: output, shape index: {0}]   ;;  %s2025_s5 = inlined_call_operand.hbm [shape: f32[384,1], index: 5, kind: output, shape index: {1}]   ;;  %s2026_s6 = inlined_call_operand.hbm [shape: f32[384,1], index: 6, kind: output, shape index: {2}]  }
   0x1   :  { %14 = vsyncpa [#allocation3 + $0x1], 0 }
   0x2   :  { %15 = vsyncpa [#allocation6], 0 }
   0x3   :  { %16 = vsyncpa [#allocation9], 0 }
   0x4   :  { %17 = vsyncpa [#allocation4], 0 }
   0x5   :  { %19 = vsyncpa [#allocation4 + $0x1], 0 }
   0x6   :  { %20 = vsyncpa [#allocation12], 0 }
   0x7   :  { %22 = vsyncpa [#allocation12 + $0x1], 0  ;;  %s1535_s21 = smov 0   ;;  %s1537_s22 = smov 0  }
   0x8   :  { %s1539_s23 = smov 0   ;;  %s1541_s24 = smov 0  }
   0x9 LB: > { %s1556_s25 = sadd.s32 4294967295, %s1485_s24   ;;  %s2028_s26 = sadd.s32 4294967294, %s1485_s24   ;;  %s1485_s24 = sphi %s1541_s24, %s2050_s24   ;;  %s1481_s23 = sphi %s1539_s23, %s2049_s23   ;;  %s1477_s22 = sphi %s1537_s22, %s2048_s22   ;;  %s1473_s21 = sphi %s1535_s21, %s2047_s21  }
   0xa   : > { %p48_p0 = scmp.ne.s32.totalorder %s1477_s22, %s1473_s21  ;;  %p2027_p1 = scmp.eq.s32.totalorder %s1556_s25, 0 }
   0xb   : > { %p141_p3 = scmp.eq.s32.totalorder %s2028_s26, 2  ;;  %p970_p5 = scmp.ge.s32.totalorder %s1485_s24, 1 }
   0xc   : > { %p1567_p4 = por %p2027_p1, %p48_p0  ;;  %p200_p7 = scmp.lt.s32.totalorder %s1485_s24, 4 }
   0xd   : > { %p1572_p6 = por %p141_p3, %p48_p0  ;;  %s1487_s30 = smov [#allocation5]  }
   0xe   : > { %s2031_s27 = scalar_select %p1567_p4, 1, 0 }
   0xf   : > { %s2032_s28 = scalar_select %p1572_p6, 1, 0 }
  0x10   : > { %p1577_p8 = pnand %p970_p5, %p200_p7  ;;  %s212_s7 = sshll.u32 %s1487_s30, 4  ;;  %s1581_s7 = int_to_ptr.vmem [resolvable:$true] %s212_s7 }
  0x11   : > { %s1488_s9 = smov [#allocation7]   ;;  %s1489_s11 = smov [#allocation8]  }
  0x12   : > { %s2033_s29 = scalar_select %p1577_p8, 1, 0 }
  0x13   : > { %p1154_p9 = pneg %p1577_p8  ;;  %s226_s10 = sshll.u32 %s1488_s9, 4  ;;  %s1591_s10 = int_to_ptr.vmem [resolvable:$true] %s226_s10 }
  0x14   : > { %s1593_s12 = sshll.u32 %s1489_s11, 4  ;;  %s1237_s15 = scalar_lea.hbm %s2021_s1, 256  ;;  %s238_s12 = int_to_ptr.vmem [resolvable:$true] %s1593_s12 }
  0x15   : > { %p1587_p10 = pnand %p1154_p9, %p2027_p1  ;;  %p1238_p11 = scmp.ne.s32.totalorder %s2021_s1, %s1237_s15 }
  0x16   : > { %p1244_p3 = scmp.lt.u32.totalorder %s1237_s15, %s2021_s1 }
  0x17   : > { %p1603_p12 = pneg %p1587_p10 }
  0x19   : > { %p1240_p13 = pnand %p1603_p12, %p1238_p11 }
  0x1b   : > { %p1241_p0 = pneg %p1240_p13 }
  0x1d   : > { %p1246_p5 = pnand %p1244_p3, %p1241_p0 }
  0x1f   : > { %1249 = shalt.err (!%p1246_p5)
}
  0x20   : > { %s1250_s30 = scalar_lea.vmem %s1581_s7, 256  ;;  %p1258_p2 = scmp.lt.s32.totalorder %s1581_s7, %s1581_s7 }
  0x21   : > { %p1251_p7 = scmp.ne.s32.totalorder %s1581_s7, %s1250_s30  ;;  %p1259_p6 = scmp.lt.s32.totalorder %s1250_s30, %s1250_s30 }
  0x23   : > { %p1253_p9 = pnand %p1251_p7, %p1603_p12  ;;  %p1260_p11 = por %p1259_p6, %p1258_p2 }
  0x25   : > { %p1254_p1 = pneg %p1253_p9 }
  0x27   : > { %p1261_p13 = pnand %p1260_p11, %p1254_p1 }
  0x29   : > { %1264 = shalt.err (!%p1261_p13)
}
  0x2a   : > { %s1490_s9 = smov 64   ;;  %s1491_s11 = smov 4  }
  0x2b   : > { %1157 = dma.hbm_to_vmem [thread:$0]  (!%p1587_p10), %s2021_s1, 256, %s1581_s7, [#allocation6], %s1490_s9, %s1490_s9, %s1491_s11  }
  0x2c   : > { %s1265_s17 = scalar_lea.hbm %s2022_s2, 16 }
  0x2d   : > { %p1266_p1 = scmp.ne.s32.totalorder %s2022_s2, %s1265_s17  ;;  %p1272_p0 = scmp.lt.u32.totalorder %s1265_s17, %s2022_s2 }
  0x2f   : > { %p1268_p2 = pnand %p1266_p1, %p1603_p12 }
  0x31   : > { %p1269_p6 = pneg %p1268_p2 }
  0x33   : > { %p1274_p3 = pnand %p1272_p0, %p1269_p6 }
  0x35   : > { %1277 = shalt.err (!%p1274_p3)
}
  0x36   : > { %s1278_s7 = scalar_lea.vmem %s1591_s10, 16  ;;  %s1285_s13 = scalar_lea.vmem %s1591_s10, 32 }
  0x37   : > { %p1279_p5 = scmp.ne.s32.totalorder %s1591_s10, %s1278_s7  ;;  %p1286_p11 = scmp.lt.s32.totalorder %s1591_s10, %s1591_s10 }
  0x38   : > { %p1287_p13 = scmp.lt.s32.totalorder %s1285_s13, %s1278_s7 }
  0x39   : > { %p1281_p7 = pnand %p1279_p5, %p1603_p12 }
  0x3a   : > { %p1288_p1 = por %p1287_p13, %p1286_p11 }
  0x3b   : > { %p1282_p9 = pneg %p1281_p7 }
  0x3d   : > { %p1289_p2 = pnand %p1288_p1, %p1282_p9 }
  0x3f   : > { %1292 = shalt.err (!%p1289_p2)
}
  0x40   : > { %1160 = dma.hbm_to_vmem [thread:$0]  (!%p1587_p10), %s2022_s2, 16, %s1591_s10, [#allocation6]  }
  0x41   : > { %s1293_s17 = scalar_lea.hbm %s2023_s3, 16 }
  0x42   : > { %p1294_p6 = scmp.ne.s32.totalorder %s2023_s3, %s1293_s17  ;;  %p1300_p5 = scmp.lt.u32.totalorder %s1293_s17, %s2023_s3 }
  0x44   : > { %p1296_p0 = pnand %p1294_p6, %p1603_p12 }
  0x46   : > { %p1297_p3 = pneg %p1296_p0 }
  0x48   : > { %p1302_p7 = pnand %p1300_p5, %p1297_p3 }
  0x4a   : > { %1305 = shalt.err (!%p1302_p7)
}
  0x4b   : > { %s1306_s13 = scalar_lea.vmem %s238_s12, 16  ;;  %s1313_s10 = scalar_lea.vmem %s238_s12, 32 }
  0x4c   : > { %p1307_p9 = scmp.ne.s32.totalorder %s238_s12, %s1306_s13  ;;  %p1314_p1 = scmp.lt.s32.totalorder %s238_s12, %s238_s12 }
  0x4d   : > { %p1315_p2 = scmp.lt.s32.totalorder %s1313_s10, %s1306_s13 }
  0x4e   : > { %p1309_p11 = pnand %p1307_p9, %p1603_p12 }
  0x4f   : > { %p1316_p4 = por %p1315_p2, %p1314_p1 }
  0x50   : > { %p1310_p13 = pneg %p1309_p11 }
  0x52   : > { %p1317_p8 = pnand %p1316_p4, %p1310_p13 }
  0x54   : > { %1320 = shalt.err (!%p1317_p8)
}
  0x55   : > { %1163 = dma.hbm_to_vmem [thread:$0]  (!%p1587_p10), %s2023_s3, 16, %s238_s12, [#allocation9]  }
  0x56   : > { %s1671_s18 = sadd.s32 1, %s1485_s24   ;;  %s35_s8 = sadd.s32 1, %s1481_s23 }
  0x57   : > { %s32_s15 = ssub.s32 %s1485_s24, %s1671_s18  ;;  %p42_p8 = scmp.ne.s32.totalorder %s1481_s23, %s1477_s22 }
  0x58   : > { %p33_p4 = scmp.eq.s32.totalorder %s32_s15, 0  ;;  %p43_p12 = scmp.eq.s32.totalorder %s1485_s24, 0 }
  0x59   : > { %p1181_p6 = scmp.lt.s32.totalorder %s1485_s24, 3  ;;  %p2036_p3 = scmp.eq.s32.totalorder %s1556_s25, 2 }
  0x5a   : > { %s1681_s16 = scalar_select %p33_p4, %s1481_s23, %s35_s8  }
  0x5b   : > { %p44_p0 = por %p43_p12, %p42_p8  ;;  %p1685_p5 = por %p2036_p3, %p42_p8 }
  0x5c   : > { %s248_s19 = sand.u32 1, %s1481_s23   ;;  %s1033_s20 = sshll.u32 %s1485_s24, 10 }
  0x5d   : > { %s975_s12 = sshll.u32 %s248_s19, 6  ;;  %s1694_s13 = scalar_lea.hbm %s2020_s0, %s1033_s20 }
  0x5e   : > { %s252_s10 = scalar_lea.vmem [#allocation2], %s975_s12  ;;  %p1696_p10 = pnand %p1181_p6, %p44_p0 }
  0x5f   : > { %s259_s26 = sshll.u32 %s252_s10, 4  ;;  %s1702_s15 = scalar_lea.sflag [#allocation3], %s248_s19  ;;  %s1700_s26 = int_to_ptr.vmem [resolvable:$true] %s259_s26 }
  0x60   : > { %s1321_s8 = scalar_lea.hbm %s1694_s13, 1024  ;;  %p1323_p9 = pneg %p1696_p10 }
  0x61   : > { %p1322_p7 = scmp.ne.s32.totalorder %s1694_s13, %s1321_s8  ;;  %s1326_s30 = scalar_lea.hbm %s2020_s0, 3072 }
  0x62   : > { %p1327_p1 = scmp.lt.u32.totalorder %s1694_s13, %s2020_s0  ;;  %p1328_p2 = scmp.lt.u32.totalorder %s1326_s30, %s1321_s8 }
  0x63   : > { %p1324_p11 = pnand %p1323_p9, %p1322_p7  ;;  %p1330_p8 = scmp.lt.u32.totalorder %s1321_s8, %s1694_s13 }
  0x64   : > { %p1329_p4 = por %p1328_p2, %p1327_p1 }
  0x65   : > { %p1325_p13 = pneg %p1324_p11 }
  0x66   : > { %p1331_p12 = por %p1330_p8, %p1329_p4 }
  0x68   : > { %p1332_p6 = pnand %p1331_p12, %p1325_p13 }
  0x6a   : > { %1335 = shalt.err (!%p1332_p6)
}
  0x6b   : > { %s1336_s19 = scalar_lea.vmem %s1700_s26, 1024  ;;  %s1492_s20 = smov [#allocation2]  }
  0x6c   : > { %p1337_p0 = scmp.ne.s32.totalorder %s1700_s26, %s1336_s19  ;;  %s1341_s12 = sshll.u32 %s1492_s20, 4  ;;  %s1342_s12 = int_to_ptr.vmem [resolvable:$false] %s1341_s12 }
  0x6d   : > { %s1343_s7 = scalar_lea.vmem %s1342_s12, 2048  ;;  %p1344_p11 = scmp.lt.s32.totalorder %s1700_s26, %s1342_s12 }
  0x6e   : > { %p1339_p3 = pnand %p1337_p0, %p1323_p9  ;;  %p1345_p1 = scmp.lt.s32.totalorder %s1343_s7, %s1336_s19 }
  0x70   : > { %p1340_p7 = pneg %p1339_p3  ;;  %p1346_p2 = por %p1345_p1, %p1344_p11 }
  0x72   : > { %p1347_p4 = pnand %p1346_p2, %p1340_p7 }
  0x74   : > { %1350 = shalt.err (!%p1347_p4)
}
  0x75   : > { %1167 = dma.hbm_to_vmem [thread:$0]  (!%p1696_p10), %s1694_s13, 1024, %s1700_s26, %s1702_s15, %s1490_s9, %s1490_s9, %s1491_s11  }
  0x76   : > { %p2039_p9 = scmp.ne.s32.totalorder %s2033_s29, 0 }
  0x77   : > { %s1736_s8 = sand.u32 (!%p2039_p9), 1, %s1477_s22   ;;  %p2040_p13 = scmp.ne.s32.totalorder (!%p2039_p9), %s2031_s27, 0 }
  0x78   : > { %271 = sbr.rel (%p2039_p9) target bundleno = 586 (0x24a), region = 36  ;;  %s979_s30 = sshll.u32 (!%p2039_p9), %s1736_s8, 6 }
  0x79   : > { %s274_s10 = scalar_lea.sflag (!%p2039_p9), [#allocation3], %s1736_s8  ;;  %s1742_s14 = scalar_lea.vmem (!%p2039_p9), [#allocation2], %s979_s30 }
  0x7f   : > { %1452 = dma.done.wait (%p2040_p13), %s274_s10, 1024  }
  0x80   : > { %1454 = vsyncadd (%p2040_p13), %s274_s10, 4294966272  ;;  %p2041_p10 = scmp.eq.s32.totalorder %s1556_s25, 0 }
  0x82   : > { %1456 = dma.done.wait (%p2041_p10), [#allocation6], 272   ;;  %p2042_p8 = pmov %p2041_p10 }
  0x84   : > { %1458 = vsyncadd (%p2042_p8), [#allocation6], 4294967024  ;;  %p2043_p12 = pmov %p2042_p8 }
  0x85   : > { %p2044_p6 = pmov %p2042_p8 }
  0x86   : > { %1460 = dma.done.wait (%p2043_p12), [#allocation9], 16  }
  0x87   : > { %1462 = vsyncadd (%p2044_p6), [#allocation9], 4294967280  ;;  %v1227_v0 = vld [vmem:[#allocation5] sm:$0xff]   ;;  %v1228_v1 = vld [vmem:[#allocation5 + $0x8] sm:$0xff]   ;;  %vm405_vm0 = vcmask 261120   ;;  %s1780_s27 = scalar_lea.vmem [#allocation10], %s979_s30 }
  0x88   : > { %1110 = vmatprep.subr.bf16.mxu0 %v1227_v0  ;;  %1130 = vmatprep.subr.bf16.mxu1 %v1227_v0  ;;  %v1229_v2 = vld [vmem:[%s1742_s14] sm:$0xff]   ;;  %v1231_v4 = vld [vmem:[%s1742_s14 + $0x8] sm:$0xff]   ;;  %v1233_v6 = vld [vmem:[%s1742_s14 + $0x10] sm:$0xff]   ;;  %s774_s29 = sshll.u32 %s1780_s27, 4  ;;  %s1050_s9 = sshll.u32 %s1556_s25, 10  ;;  %s1827_s29 = int_to_ptr.vmem [resolvable:$true] %s774_s29 }
  0x89   : > { %1111 = vmatpush3.bf16.msra.mxu0 %v1227_v0  ;;  %1132 = vmatpush3.bf16.msra.mxu1 %v1227_v0  ;;  %v1230_v3 = vld [vmem:[%s1742_s14 + $0x20] sm:$0xff]   ;;  %v1232_v5 = vld [vmem:[%s1742_s14 + $0x28] sm:$0xff]   ;;  %v1235_v7 = vld [vmem:[%s1742_s14 + $0x30] sm:$0xff]   ;;  %s1832_s26 = scalar_lea.hbm %s2024_s4, %s1050_s9  ;;  %s751_s15 = scalar_lea.sflag [#allocation4], %s1736_s8 }
  0x8a   : > { %1112 = vmatprep.subr.bf16.mxu0 %v1228_v1  ;;  %1131 = vmatprep.subr.bf16.mxu1 %v1228_v1  ;;  %v1234_v8 = vld [vmem:[%s1742_s14 + $0x18] sm:$0xff]   ;;  %v1772_v10 = vld [vmem:[#allocation7] ss:$0 sm:$0xff]  ;;  %v1776_v19 = vld [vmem:[#allocation8] ss:$0 sm:$0xff]  ;;  %s1351_s19 = scalar_lea.vmem %s1827_s29, 1024 }
  0x8b   : > { %1114 = vmatprep.mubr.msk.bf16.mxu0 %vm405_vm0, %v1229_v2  ;;  %1122 = vmatprep.mubr.msk.bf16.mxu1 %vm405_vm0, %v1230_v3  ;;  %v1236_v9 = vld [vmem:[%s1742_s14 + $0x38] sm:$0xff]   ;;  %p1352_p0 = scmp.ne.s32.totalorder %s1827_s29, %s1351_s19  ;;  %s1493_s20 = smov [#allocation10]  }
  0x8c   : > { %s1355_s12 = sshll.u32 %s1493_s20, 4  ;;  %s1356_s12 = int_to_ptr.vmem [resolvable:$false] %s1355_s12 }
  0x8d   : > { %1113 = vmatpush3.bf16.msra.mxu0 %v1228_v1  ;;  %1133 = vmatpush3.bf16.msra.mxu1 %v1228_v1  ;;  %p1353_p3 = pnand %p1352_p0, %p1685_p5  ;;  %s1357_s7 = scalar_lea.vmem %s1356_s12, 2048 }
  0x8e   : > { %p1358_p11 = scmp.lt.s32.totalorder %s1827_s29, %s1356_s12  ;;  %p1359_p1 = scmp.lt.s32.totalorder %s1357_s7, %s1351_s19 }
  0x8f   : > { %p1354_p7 = pneg %p1353_p3 }
  0x90   : > { %1115 = vmatmul.mubr.msk.bf16.vlgmr.msra.gmra.mrb[0].mxu0 %vm405_vm0, %v1231_v4  ;;  %1123 = vmatmul.mubr.msk.bf16.vlgmr.msra.gmra.mrb[0].mxu1 %vm405_vm0, %v1232_v5  ;;  %p1360_p2 = por %p1359_p1, %p1358_p11 }
  0x91   : > { %1118 = vmatprep.mubr.msk.bf16.mxu0 %vm405_vm0, %v1233_v6  ;;  %1126 = vmatprep.mubr.msk.bf16.mxu1 %vm405_vm0, %v1235_v7 }
  0x92   : > { %p1361_p4 = pnand %p1360_p2, %p1354_p7 }
  0x98   : > { %1119 = vmatmul.mubr.msk.bf16.gmra.mrb[4].mxu0 %vm405_vm0, %v1234_v8  ;;  %1127 = vmatmul.mubr.msk.bf16.gmra.mrb[4].mxu1 %vm405_vm0, %v1236_v9 }
 0x163   : > { %v1116_v11 = vpop.f32.mrb[0].mxu0  ;;  %v1124_v12 = vpop.f32.mrb[0].mxu1 }
 0x164   : > { %v464_v13 = vpop.f32.mrb[1].mxu0  ;;  %v496_v14 = vpop.f32.mrb[1].mxu1  ;;  %v624_v15 = vmul.f32 %v1124_v12, %v1772_v10  ;;  %v616_v16 = vmul.f32 %v1116_v11, %v1772_v10  ;;  %v688_v26 = vmul.f32 %v1116_v11, %v1776_v19  ;;  %v696_v30 = vmul.f32 %v1124_v12, %v1776_v19 }
 0x165   : > { %v1117_v17 = vpop.f32.mrb[2].mxu0  ;;  %v1125_v18 = vpop.f32.mrb[2].mxu1  ;;  %v614_v42 = vmul.f32 %v1772_v10, %v464_v13  ;;  %v622_v44 = vmul.f32 %v1772_v10, %v496_v14  ;;  %v686_v46 = vmul.f32 %v1776_v19, %v464_v13  ;;  %v694_v48 = vmul.f32 %v1776_v19, %v496_v14 }
 0x166   : > { %v1061_v20 = vpack.c.bf16 %v1117_v17, %v1116_v11  ;;  %v1081_v21 = vpack.c.bf16 %v1125_v18, %v1124_v12  ;;  %650 = vadd.xlane.f32.xlu0 %v624_v15  ;;  %v499_v22 = vpop.f32.mrb[3].mxu1  ;;  %634 = vadd.xlane.f32.xlu1 %v616_v16  ;;  %v467_v23 = vpop.f32.mrb[3].mxu0  ;;  %v617_v27 = vmul.f32 %v1117_v17, %v1772_v10 }
 0x167   : > { %v1076_v24 = vpack.c.bf16 %v499_v22, %v496_v14  ;;  %v1056_v25 = vpack.c.bf16 %v467_v23, %v464_v13  ;;  %v625_v31 = vmul.f32 %v1125_v18, %v1772_v10  ;;  %v689_v43 = vmul.f32 %v1117_v17, %v1776_v19 }
 0x168   : > { %1093 = vst [vmem:[%s1780_s27 + $0x8] sm:$0xff] %v1061_v20   ;;  %1097 = vst [vmem:[%s1780_s27 + $0x28] sm:$0xff] %v1081_v21   ;;  %v697_v45 = vmul.f32 %v1125_v18, %v1776_v19  ;;  %v623_v47 = vmul.f32 %v1772_v10, %v499_v22  ;;  %v687_v49 = vmul.f32 %v1776_v19, %v467_v23 }
 0x169   : > { %1096 = vst [vmem:[%s1780_s27 + $0x20] sm:$0xff] %v1076_v24   ;;  %1057 = vst [vmem:[%s1780_s27] sm:$0xff] %v1056_v25   ;;  %v695_v50 = vmul.f32 %v1776_v19, %v499_v22  ;;  %v615_v51 = vmul.f32 %v1772_v10, %v467_v23 }
 0x16a   : > { %706 = vadd.xlane.f32.xlu0 %v688_v26  ;;  %636 = vadd.xlane.f32.xlu1 %v617_v27 }
 0x16b   : > { %v1120_v28 = vpop.f32.mrb[4].mxu0  ;;  %v1788_v29 = vpop.f32.mrb[4].mxu1 }
 0x16c   : > { %v480_v32 = vpop.f32.mrb[5].mxu0  ;;  %v512_v33 = vpop.f32.mrb[5].mxu1  ;;  %v620_v52 = vmul.f32 %v1120_v28, %v1772_v10  ;;  %v628_v54 = vmul.f32 %v1788_v29, %v1772_v10  ;;  %v692_v56 = vmul.f32 %v1120_v28, %v1776_v19  ;;  %v700_v2 = vmul.f32 %v1788_v29, %v1776_v19 }
 0x16d   : > { %v1121_v34 = vpop.f32.mrb[6].mxu0  ;;  %v1129_v35 = vpop.f32.mrb[6].mxu1  ;;  %v618_v58 = vmul.f32 %v1772_v10, %v480_v32  ;;  %v626_v60 = vmul.f32 %v1772_v10, %v512_v33  ;;  %v690_v62 = vmul.f32 %v1776_v19, %v480_v32  ;;  %v698_v0 = vmul.f32 %v1776_v19, %v512_v33 }
 0x16e   : > { %722 = vadd.xlane.f32.xlu0 %v696_v30  ;;  %652 = vadd.xlane.f32.xlu1 %v625_v31  ;;  %v1071_v36 = vpack.c.bf16 %v1121_v34, %v1120_v28  ;;  %v483_v37 = vpop.f32.mrb[7].mxu0  ;;  %v1091_v38 = vpack.c.bf16 %v1129_v35, %v1788_v29  ;;  %v515_v39 = vpop.f32.mrb[7].mxu1  ;;  %v621_v53 = vmul.f32 %v1121_v34, %v1772_v10 }
 0x16f   : > { %v1066_v40 = vpack.c.bf16 %v483_v37, %v480_v32  ;;  %v1086_v41 = vpack.c.bf16 %v515_v39, %v512_v33  ;;  %v629_v55 = vmul.f32 %v1129_v35, %v1772_v10  ;;  %v693_v57 = vmul.f32 %v1121_v34, %v1776_v19 }
 0x170   : > { %1095 = vst [vmem:[%s1780_s27 + $0x18] sm:$0xff] %v1071_v36   ;;  %1099 = vst [vmem:[%s1780_s27 + $0x38] sm:$0xff] %v1091_v38   ;;  %v619_v59 = vmul.f32 %v1772_v10, %v483_v37  ;;  %v627_v61 = vmul.f32 %v1772_v10, %v515_v39  ;;  %v691_v63 = vmul.f32 %v1776_v19, %v483_v37 }
 0x171   : > { %1094 = vst [vmem:[%s1780_s27 + $0x10] sm:$0xff] %v1066_v40   ;;  %1098 = vst [vmem:[%s1780_s27 + $0x30] sm:$0xff] %v1086_v41   ;;  %v699_v1 = vmul.f32 %v1776_v19, %v515_v39  ;;  %v701_v3 = vmul.f32 %v1129_v35, %v1776_v19 }
 0x172   : > { %630 = vadd.xlane.f32.xlu0 %v614_v42  ;;  %708 = vadd.xlane.f32.xlu1 %v689_v43 }
 0x176   : > { %646 = vadd.xlane.f32.xlu0 %v622_v44  ;;  %724 = vadd.xlane.f32.xlu1 %v697_v45 }
 0x17a   : > { %702 = vadd.xlane.f32.xlu0 %v686_v46  ;;  %648 = vadd.xlane.f32.xlu1 %v623_v47 }
 0x17e   : > { %718 = vadd.xlane.f32.xlu0 %v694_v48  ;;  %704 = vadd.xlane.f32.xlu1 %v687_v49 }
 0x182   : > { %720 = vadd.xlane.f32.xlu1 %v695_v50  ;;  %632 = vadd.xlane.f32.xlu0 %v615_v51 }
 0x186   : > { %642 = vadd.xlane.f32.xlu0 %v620_v52  ;;  %644 = vadd.xlane.f32.xlu1 %v621_v53 }
 0x18a   : > { %658 = vadd.xlane.f32.xlu0 %v628_v54  ;;  %660 = vadd.xlane.f32.xlu1 %v629_v55 }
 0x18e   : > { %714 = vadd.xlane.f32.xlu0 %v692_v56  ;;  %716 = vadd.xlane.f32.xlu1 %v693_v57 }
 0x192   : > { %638 = vadd.xlane.f32.xlu0 %v618_v58  ;;  %640 = vadd.xlane.f32.xlu1 %v619_v59 }
 0x196   : > { %654 = vadd.xlane.f32.xlu0 %v626_v60  ;;  %656 = vadd.xlane.f32.xlu1 %v627_v61 }
 0x19a   : > { %710 = vadd.xlane.f32.xlu0 %v690_v62  ;;  %712 = vadd.xlane.f32.xlu1 %v691_v63 }
 0x19e   : > { %726 = vadd.xlane.f32.xlu0 %v698_v0  ;;  %728 = vadd.xlane.f32.xlu1 %v699_v1 }
 0x1a2   : > { %730 = vadd.xlane.f32.xlu0 %v700_v2  ;;  %732 = vadd.xlane.f32.xlu1 %v701_v3 }
 0x1a3   : > { %1364 = shalt.err (!%p1361_p4)
}
 0x1a4   : > { %s1365_s30 = scalar_lea.hbm %s1832_s26, 1024  ;;  %s1369_s27 = scalar_lea.hbm %s2024_s4, 3072 }
 0x1a5   : > { %p1366_p9 = scmp.ne.s32.totalorder %s1832_s26, %s1365_s30  ;;  %p1370_p8 = scmp.lt.u32.totalorder %s1832_s26, %s2024_s4 }
 0x1a6   : > { %p1371_p12 = scmp.lt.u32.totalorder %s1369_s27, %s1365_s30  ;;  %p1373_p0 = scmp.lt.u32.totalorder %s1365_s30, %s1832_s26 }
 0x1a7   : > { %p1367_p13 = pnand %p1366_p9, %p1685_p5 }
 0x1a8   : > { %p1372_p6 = por %p1371_p12, %p1370_p8 }
 0x1a9   : > { %p1368_p10 = pneg %p1367_p13 }
 0x1aa   : > { %p1374_p3 = por %p1373_p0, %p1372_p6 }
 0x1ac   : > { %p1375_p7 = pnand %p1374_p3, %p1368_p10 }
 0x1ae   : > { %1378 = shalt.err (!%p1375_p7)
}
 0x1af   : > { %s1494_s13 = smov 64   ;;  %s1495_s19 = smov 4   ;;  %vm662_vm1 = vcmask 7168  }
 0x1b0   : > { %1148 = dma.vmem_to_hbm [thread:$0]  (%p1685_p5), %s1827_s29, 1024, %s1832_s26, %s751_s15, %s1494_s13, %s1494_s13, %s1495_s19  }
 0x1b1   : > { %s984_s20 = sshll.u32 %s1736_s8, 7  ;;  %s755_s8 = sand.u32 1, %s1556_s25  }
 0x1b2   : > { %s1859_s12 = scalar_lea.vmem [#allocation11], %s984_s20  ;;  %s1865_s7 = scalar_lea.vmem [#allocation13], %s984_s20 }
 0x1b3   : > { %s1051_s29 = sshll.u32 %s1556_s25, 11  ;;  %s790_s26 = sshll.u32 %s1859_s12, 4  ;;  %s1921_s26 = int_to_ptr.vmem [resolvable:$true] %s790_s26 }
 0x1b4   : > { %s1919_s10 = scalar_lea.hbm %s2025_s5, %s1051_s29  ;;  %s1927_s14 = scalar_lea.sflag [#allocation12], %s755_s8 }
 0x1b5   : > { %s1379_s27 = scalar_lea.vmem %s1921_s26, 2048  ;;  %s1496_s9 = smov [#allocation11]  }
 0x1b6   : > { %p1380_p11 = scmp.ne.s32.totalorder %s1921_s26, %s1379_s27  ;;  %s1383_s11 = sshll.u32 %s1496_s9, 4  ;;  %s1384_s11 = int_to_ptr.vmem [resolvable:$false] %s1383_s11 }
 0x1b7   : > { %s1385_s13 = scalar_lea.vmem %s1384_s11, 4096  ;;  %p1386_p4 = scmp.lt.s32.totalorder %s1921_s26, %s1384_s11 }
 0x1b8   : > { %p1381_p1 = pnand %p1380_p11, %p1685_p5  ;;  %p1387_p9 = scmp.lt.s32.totalorder %s1385_s13, %s1379_s27 }
 0x1ba   : > { %p1382_p2 = pneg %p1381_p1  ;;  %p1388_p13 = por %p1387_p9, %p1386_p4 }
 0x1bc   : > { %p1389_p10 = pnand %p1388_p13, %p1382_p2 }
 0x1f3   : > { %v651_v4 = vpop.xlane.xlu0 %650  ;;  %v635_v5 = vpop.xlane.xlu1 %634 }
 0x1f4   : > { %673 = vst.msk [vmem:[%s1859_s12 + $0x50] sm:$0xff] %vm662_vm1, %v651_v4  ;;  %665 = vst.msk [vmem:[%s1859_s12 + $0x10] sm:$0xff] %vm662_vm1, %v635_v5 }
 0x1f7   : > { %v707_v6 = vpop.xlane.xlu0 %706  ;;  %v637_v7 = vpop.xlane.xlu1 %636 }
 0x1f8   : > { %736 = vst.msk [vmem:[%s1865_s7 + $0x10] sm:$0xff] %vm662_vm1, %v707_v6  ;;  %666 = vst.msk [vmem:[%s1859_s12 + $0x18] sm:$0xff] %vm662_vm1, %v637_v7 }
 0x1fb   : > { %v723_v8 = vpop.xlane.xlu0 %722  ;;  %v653_v9 = vpop.xlane.xlu1 %652 }
 0x1fc   : > { %744 = vst.msk [vmem:[%s1865_s7 + $0x50] sm:$0xff] %vm662_vm1, %v723_v8  ;;  %674 = vst.msk [vmem:[%s1859_s12 + $0x58] sm:$0xff] %vm662_vm1, %v653_v9 }
 0x1ff   : > { %v631_v10 = vpop.xlane.xlu0 %630  ;;  %v709_v11 = vpop.xlane.xlu1 %708 }
 0x200   : > { %663 = vst.msk [vmem:[%s1859_s12] sm:$0xff] %vm662_vm1, %v631_v10  ;;  %737 = vst.msk [vmem:[%s1865_s7 + $0x18] sm:$0xff] %vm662_vm1, %v709_v11 }
 0x203   : > { %v647_v12 = vpop.xlane.xlu0 %646  ;;  %v725_v13 = vpop.xlane.xlu1 %724 }
 0x204   : > { %671 = vst.msk [vmem:[%s1859_s12 + $0x40] sm:$0xff] %vm662_vm1, %v647_v12  ;;  %745 = vst.msk [vmem:[%s1865_s7 + $0x58] sm:$0xff] %vm662_vm1, %v725_v13 }
 0x207   : > { %v703_v14 = vpop.xlane.xlu0 %702  ;;  %v649_v15 = vpop.xlane.xlu1 %648 }
 0x208   : > { %734 = vst.msk [vmem:[%s1865_s7] sm:$0xff] %vm662_vm1, %v703_v14  ;;  %672 = vst.msk [vmem:[%s1859_s12 + $0x48] sm:$0xff] %vm662_vm1, %v649_v15 }
 0x20b   : > { %v719_v16 = vpop.xlane.xlu0 %718  ;;  %v705_v17 = vpop.xlane.xlu1 %704 }
 0x20c   : > { %742 = vst.msk [vmem:[%s1865_s7 + $0x40] sm:$0xff] %vm662_vm1, %v719_v16  ;;  %735 = vst.msk [vmem:[%s1865_s7 + $0x8] sm:$0xff] %vm662_vm1, %v705_v17 }
 0x20f   : > { %v721_v18 = vpop.xlane.xlu1 %720  ;;  %v633_v19 = vpop.xlane.xlu0 %632 }
 0x210   : > { %743 = vst.msk [vmem:[%s1865_s7 + $0x48] sm:$0xff] %vm662_vm1, %v721_v18  ;;  %664 = vst.msk [vmem:[%s1859_s12 + $0x8] sm:$0xff] %vm662_vm1, %v633_v19 }
 0x213   : > { %v643_v20 = vpop.xlane.xlu0 %642  ;;  %v645_v21 = vpop.xlane.xlu1 %644 }
 0x214   : > { %669 = vst.msk [vmem:[%s1859_s12 + $0x30] sm:$0xff] %vm662_vm1, %v643_v20  ;;  %670 = vst.msk [vmem:[%s1859_s12 + $0x38] sm:$0xff] %vm662_vm1, %v645_v21 }
 0x217   : > { %v659_v22 = vpop.xlane.xlu0 %658  ;;  %v661_v23 = vpop.xlane.xlu1 %660 }
 0x218   : > { %677 = vst.msk [vmem:[%s1859_s12 + $0x70] sm:$0xff] %vm662_vm1, %v659_v22  ;;  %678 = vst.msk [vmem:[%s1859_s12 + $0x78] sm:$0xff] %vm662_vm1, %v661_v23 }
 0x21b   : > { %v715_v24 = vpop.xlane.xlu0 %714  ;;  %v717_v25 = vpop.xlane.xlu1 %716 }
 0x21c   : > { %740 = vst.msk [vmem:[%s1865_s7 + $0x30] sm:$0xff] %vm662_vm1, %v715_v24  ;;  %741 = vst.msk [vmem:[%s1865_s7 + $0x38] sm:$0xff] %vm662_vm1, %v717_v25 }
 0x21f   : > { %v639_v26 = vpop.xlane.xlu0 %638  ;;  %v641_v27 = vpop.xlane.xlu1 %640 }
 0x220   : > { %667 = vst.msk [vmem:[%s1859_s12 + $0x20] sm:$0xff] %vm662_vm1, %v639_v26  ;;  %668 = vst.msk [vmem:[%s1859_s12 + $0x28] sm:$0xff] %vm662_vm1, %v641_v27 }
 0x223   : > { %v655_v28 = vpop.xlane.xlu0 %654  ;;  %v657_v29 = vpop.xlane.xlu1 %656 }
 0x224   : > { %675 = vst.msk [vmem:[%s1859_s12 + $0x60] sm:$0xff] %vm662_vm1, %v655_v28  ;;  %676 = vst.msk [vmem:[%s1859_s12 + $0x68] sm:$0xff] %vm662_vm1, %v657_v29 }
 0x225   : > { %1392 = shalt.err (!%p1389_p10)
}
 0x226   : > { %s1393_s19 = scalar_lea.hbm %s1919_s10, 2048  ;;  %s1397_s8 = scalar_lea.hbm %s2025_s5, 6144 }
 0x227   : > { %p1394_p8 = scmp.ne.s32.totalorder %s1919_s10, %s1393_s19  ;;  %p1398_p0 = scmp.lt.u32.totalorder %s1919_s10, %s2025_s5 }
 0x228   : > { %p1399_p3 = scmp.lt.u32.totalorder %s1397_s8, %s1393_s19  ;;  %p1401_p11 = scmp.lt.u32.totalorder %s1393_s19, %s1919_s10 }
 0x229   : > { %p1395_p12 = pnand %p1394_p8, %p1685_p5 }
 0x22a   : > { %p1400_p7 = por %p1399_p3, %p1398_p0 }
 0x22b   : > { %p1396_p6 = pneg %p1395_p12 }
 0x22c   : > { %p1402_p1 = por %p1401_p11, %p1400_p7 }
 0x22e   : > { %p1403_p2 = pnand %p1402_p1, %p1396_p6 }
 0x230   : > { %1406 = shalt.err (!%p1403_p2)
}
 0x231   : > { %s1497_s27 = smov 128   ;;  %s1498_s9 = smov 8   ;;  %v711_v30 = vpop.xlane.xlu0 %710  ;;  %v713_v31 = vpop.xlane.xlu1 %712 }
 0x232   : > { %1149 = dma.vmem_to_hbm [thread:$0]  (%p1685_p5), %s1921_s26, 2048, %s1919_s10, %s1927_s14, %s1497_s27, %s1497_s27, %s1498_s9  }
 0x233   : > { %738 = vst.msk [vmem:[%s1865_s7 + $0x20] sm:$0xff] %vm662_vm1, %v711_v30  ;;  %739 = vst.msk [vmem:[%s1865_s7 + $0x28] sm:$0xff] %vm662_vm1, %v713_v31  ;;  %s806_s11 = sshll.u32 %s1865_s7, 4  ;;  %s1968_s20 = scalar_lea.hbm %s2026_s6, %s1051_s29  ;;  %s1970_s11 = int_to_ptr.vmem [resolvable:$true] %s806_s11 }
 0x234   : > { %s1407_s26 = scalar_lea.vmem %s1970_s11, 2048  ;;  %s1499_s25 = smov [#allocation13]  }
 0x235   : > { %v727_v32 = vpop.xlane.xlu0 %726  ;;  %v729_v33 = vpop.xlane.xlu1 %728  ;;  %p1408_p4 = scmp.ne.s32.totalorder %s1970_s11, %s1407_s26  ;;  %s1411_s10 = sshll.u32 %s1499_s25, 4  ;;  %s1412_s10 = int_to_ptr.vmem [resolvable:$false] %s1411_s10 }
 0x236   : > { %746 = vst.msk [vmem:[%s1865_s7 + $0x60] sm:$0xff] %vm662_vm1, %v727_v32  ;;  %747 = vst.msk [vmem:[%s1865_s7 + $0x68] sm:$0xff] %vm662_vm1, %v729_v33  ;;  %s1413_s29 = scalar_lea.vmem %s1412_s10, 4096  ;;  %p1414_p10 = scmp.lt.s32.totalorder %s1970_s11, %s1412_s10 }
 0x237   : > { %p1409_p9 = pnand %p1408_p4, %p1685_p5  ;;  %p1415_p8 = scmp.lt.s32.totalorder %s1413_s29, %s1407_s26 }
 0x239   : > { %v731_v34 = vpop.xlane.xlu0 %730  ;;  %v733_v35 = vpop.xlane.xlu1 %732  ;;  %p1410_p13 = pneg %p1409_p9  ;;  %p1416_p12 = por %p1415_p8, %p1414_p10 }
 0x23a   : > { %748 = vst.msk [vmem:[%s1865_s7 + $0x70] sm:$0xff] %vm662_vm1, %v731_v34  ;;  %749 = vst.msk [vmem:[%s1865_s7 + $0x78] sm:$0xff] %vm662_vm1, %v733_v35 }
 0x23b   : > { %p1417_p6 = pnand %p1416_p12, %p1410_p13 }
 0x23d   : > { %1420 = shalt.err (!%p1417_p6)
}
 0x23e   : > { %s1421_s7 = scalar_lea.hbm %s1968_s20, 2048  ;;  %s1425_s15 = scalar_lea.hbm %s2026_s6, 6144 }
 0x23f   : > { %p1422_p0 = scmp.ne.s32.totalorder %s1968_s20, %s1421_s7  ;;  %p1426_p11 = scmp.lt.u32.totalorder %s1968_s20, %s2026_s6 }
 0x240   : > { %p1427_p1 = scmp.lt.u32.totalorder %s1425_s15, %s1421_s7  ;;  %p1429_p4 = scmp.lt.u32.totalorder %s1421_s7, %s1968_s20 }
 0x241   : > { %p1423_p3 = pnand %p1422_p0, %p1685_p5 }
 0x242   : > { %p1428_p2 = por %p1427_p1, %p1426_p11 }
 0x243   : > { %p1424_p7 = pneg %p1423_p3 }
 0x244   : > { %p1430_p9 = por %p1429_p4, %p1428_p2 }
 0x246   : > { %p1431_p13 = pnand %p1430_p9, %p1424_p7 }
 0x248   : > { %1434 = shalt.err (!%p1431_p13)
}
 0x249   : > { %1150 = dma.vmem_to_hbm [thread:$0]  (%p1685_p5), %s1970_s11, 2048, %s1968_s20, %s1927_s14, %s1497_s27, %s1497_s27, %s1498_s9  }
 0x24a PF: > { %p1185_p10 = scmp.ge.s32.totalorder %s1485_s24, 2  ;;  %s821_s19 = sand.u32 1, %s1473_s21  }
 0x24b   : > { %p2045_p8 = scmp.ne.s32.totalorder %s2032_s28, 0  ;;  %s822_s26 = scalar_lea.sflag [#allocation4], %s821_s19 }
 0x24d   : > { %p1169_p12 = pnand %p1185_p10, %p2045_p8 }
 0x24f   : > { %1464 = dma.done.wait (!%p1169_p12), %s822_s26, 1024  }
 0x250   : > { %1466 = vsyncadd (!%p1169_p12), %s822_s26, 4294966272  ;;  %s2046_s17 = sadd.s32 4294967294, %s1485_s24  }
 0x251   : > { %s830_s25 = sand.u32 1, %s2046_s17  }
 0x252   : > { %s831_s10 = scalar_lea.sflag [#allocation12], %s830_s25 }
 0x253   : > { %1468 = dma.done.wait (!%p1169_p12), %s831_s10, 4096  }
 0x254   : > { %1470 = vsyncadd (!%p1169_p12), %s831_s10, 4294963200  ;;  %p25_p5 = scmp.ge.s32.totalorder %s1671_s18, 5   ;;  %s2047_s21 = smov %s1477_s22 }
 0x255   : > { %s2048_s22 = smov %s1481_s23  ;;  %s2049_s23 = smov %s1681_s16 }
 0x256   : > { %s2050_s24 = smov %s1671_s18  ;;  %27 = sbr.rel (!%p25_p5) target bundleno = 9 (0x9), region = 125 }
 0x25d   :  { %845 = vsyncpa [#allocation3], 1 }
 0x25e   :  { %847 = vsyncpa [#allocation3 + $0x1], 1 }
 0x25f   :  { %848 = vsyncpa [#allocation6], 1 }
 0x260   :  { %849 = vsyncpa [#allocation9], 1 }
 0x261   :  { %850 = vsyncpa [#allocation4], 1 }
 0x262   :  { %852 = vsyncpa [#allocation4 + $0x1], 1 }
 0x263   :  { %853 = vsyncpa [#allocation12], 1 }
 0x264   :  { %855 = vsyncpa [#allocation12 + $0x1], 1 }

// kernel: node_attention_per_metapath.5
= control target key start
LH: loop header
LB: loop body
LE: loop exit
PB: predicated region body
PF: predicated region fallthrough
CT: control target
= control target key end

     0   :  { %s4053_s0 = inlined_call_operand.hbm [shape: f32[384,1], index: 0, kind: input, shape index: {}]   ;;  %s4054_s1 = inlined_call_operand.hbm [shape: f32[1,384], index: 1, kind: input, shape index: {}]   ;;  %s4055_s2 = inlined_call_operand.hbm [shape: s8[384,384], index: 2, kind: input, shape index: {}]   ;;  %s4056_s3 = inlined_call_operand.hbm [shape: bf16[384,128], index: 3, kind: input, shape index: {}]   ;;  %s4057_s4 = inlined_call_operand.hbm [shape: f32[384,128], index: 4, kind: output, shape index: {}]  }
   0x1   :  { %4117 = sst [smem:[#allocation56_spill]] %s4053_s0 }
   0x2   :  { %4118 = sst [smem:[#allocation57_spill]] %s4054_s1 }
   0x3   :  { %9 = vsyncpa [#allocation3], 0 }
   0x4   :  { %11 = vsyncpa [#allocation3 + $0x1], 0 }
   0x5   :  { %12 = vsyncpa [#allocation6], 0 }
   0x6   :  { %13 = vsyncpa [#allocation4], 0 }
   0x7   :  { %15 = vsyncpa [#allocation4 + $0x1], 0  ;;  %s2372_s15 = smov 0   ;;  %s2374_s16 = smov 0  }
   0x8   :  { %s2376_s17 = smov 0   ;;  %s2378_s18 = smov 0  }
   0x9 LB: > { %s2393_s19 = sadd.s32 4294967295, %s2331_s18   ;;  %s1740_s20 = sadd.s32 4294967294, %s2331_s18   ;;  %s2331_s18 = sphi %s2378_s18, %s4409_s18   ;;  %s2327_s17 = sphi %s2376_s17, %s4408_s17   ;;  %s2323_s16 = sphi %s2374_s16, %s4407_s16   ;;  %s2319_s15 = sphi %s2372_s15, %s4406_s15  }
   0xa   : > { %s2397_s21 = sadd.s32 1, %s2331_s18   ;;  %s28_s22 = sadd.s32 1, %s2327_s17 }
   0xb   : > { %s25_s23 = ssub.s32 %s2331_s18, %s2397_s21  ;;  %p35_p0 = scmp.ne.s32.totalorder %s2327_s17, %s2323_s16 }
   0xc   : > { %p26_p1 = scmp.eq.s32.totalorder %s25_s23, 0  ;;  %p36_p2 = scmp.eq.s32.totalorder %s2331_s18, 0 }
   0xd   : > { %p41_p3 = scmp.ne.s32.totalorder %s2323_s16, %s2319_s15  ;;  %p4058_p4 = scmp.eq.s32.totalorder %s2393_s19, 0 }
   0xe   : > { %s2409_s24 = scalar_select %p26_p1, %s2327_s17, %s28_s22  }
   0xf   : > { %p2411_p5 = por %p36_p2, %p35_p0  ;;  %p2417_p6 = por %p4058_p4, %p41_p3 }
  0x10   : > { %p133_p7 = scmp.eq.s32.totalorder %s2393_s19, 2  ;;  %p139_p8 = scmp.eq.s32.totalorder %s1740_s20, 2 }
  0x11   : > { %s4120_s26 = scalar_select %p2417_p6, 1, 0 }
  0x12   : > { %p1741_p9 = scmp.ge.s32.totalorder %s2331_s18, 1  ;;  %p146_p10 = scmp.lt.s32.totalorder %s2331_s18, 4 }
  0x13   : > { %p2424_p11 = por %p133_p7, %p35_p0  ;;  %p2428_p12 = por %p139_p8, %p41_p3 }
  0x14   : > { %p2432_p13 = pnand %p1741_p9, %p146_p10  ;;  %s2333_s30 = smov [#allocation5]  }
  0x15   : > { %s4121_s27 = scalar_select %p2424_p11, 1, 0 }
  0x16   : > { %s4122_s28 = scalar_select %p2428_p12, 1, 0 }
  0x17   : > { %s4123_s29 = scalar_select %p2432_p13, 1, 0 }
  0x18   : > { %p1916_p1 = pneg %p2432_p13  ;;  %s159_s5 = sshll.u32 %s2333_s30, 4  ;;  %s160_s5 = int_to_ptr.vmem [resolvable:$true] %s159_s5 }
  0x19   : > { %p1936_p2 = scmp.lt.s32.totalorder %s2331_s18, 3  ;;  %s183_s7 = sand.u32 1, %s2331_s18  }
  0x1a   : > { %p2441_p0 = pnand %p1916_p1, %p4058_p4  ;;  %s185_s9 = sand.u32 1, %s2327_s17  }
  0x1b   : > { %p2448_p3 = pnand %p1936_p2, %p2411_p5  ;;  %s4126_s1 = sld [smem:[#allocation57_spill]] }
  0x1c   : > { %p4063_p8 = pneg %p2441_p0 }
  0x1d   : > { %s4125_s8 = scalar_select %p2448_p3, 1, 0 }
  0x21   : > { %s2137_s12 = scalar_lea.hbm %s4126_s1, 48 }
  0x22   : > { %p2138_p7 = scmp.ne.s32.totalorder %s4126_s1, %s2137_s12  ;;  %p2144_p5 = scmp.lt.u32.totalorder %s2137_s12, %s4126_s1 }
  0x24   : > { %p2140_p9 = pnand %p4063_p8, %p2138_p7 }
  0x26   : > { %p2141_p10 = pneg %p2140_p9 }
  0x28   : > { %p2146_p1 = pnand %p2144_p5, %p2141_p10 }
  0x2a   : > { %2149 = shalt.err (!%p2146_p1)
}
  0x2b   : > { %s2150_s23 = scalar_lea.vmem %s160_s5, 48  ;;  %s2157_s25 = scalar_lea.vmem %s160_s5, 64 }
  0x2c   : > { %p2151_p2 = scmp.ne.s32.totalorder %s160_s5, %s2150_s23  ;;  %p2158_p11 = scmp.lt.s32.totalorder %s160_s5, %s160_s5 }
  0x2d   : > { %p2159_p6 = scmp.lt.s32.totalorder %s2157_s25, %s2150_s23 }
  0x2e   : > { %p2153_p4 = pnand %p2151_p2, %p4063_p8 }
  0x2f   : > { %p2160_p13 = por %p2159_p6, %p2158_p11 }
  0x30   : > { %p2154_p12 = pneg %p2153_p4 }
  0x32   : > { %p2161_p3 = pnand %p2160_p13, %p2154_p12 }
  0x34   : > { %2164 = shalt.err (!%p2161_p3)
}
  0x35   : > { %1919 = dma.hbm_to_vmem [thread:$0]  (!%p2441_p0), %s4126_s1, 48, %s160_s5, [#allocation6]  }
  0x36   : > { %s1745_s11 = sshll.u32 %s185_s9, 7  ;;  %s1785_s12 = sshll.u32 %s2331_s18, 11 }
  0x37   : > { %s4127_s0 = sld [smem:[#allocation56_spill]]  ;;  %s187_s22 = scalar_lea.vmem [#allocation2], %s1745_s11 }
  0x38   : > { %s194_s23 = sshll.u32 %s187_s22, 4  ;;  %s2483_s25 = smul.u32 96, %s185_s9  ;;  %s2481_s23 = int_to_ptr.vmem [resolvable:$true] %s194_s23 }
  0x39   : > { %s2485_s30 = scalar_lea.sflag [#allocation3], %s183_s7  ;;  %p4128_p6 = scmp.ne.s32.totalorder %s4125_s8, 0 }
  0x3b   : > { %p4064_p11 = pneg %p4128_p6 }
  0x3d   : > { %s2479_s20 = scalar_lea.hbm %s4127_s0, %s1785_s12  ;;  %s2170_s13 = scalar_lea.hbm %s4127_s0, 6144 }
  0x3e   : > { %s2165_s5 = scalar_lea.hbm %s2479_s20, 2048  ;;  %p2171_p3 = scmp.lt.u32.totalorder %s2479_s20, %s4127_s0 }
  0x3f   : > { %p2166_p4 = scmp.ne.s32.totalorder %s2479_s20, %s2165_s5  ;;  %p2172_p7 = scmp.lt.u32.totalorder %s2170_s13, %s2165_s5 }
  0x40   : > { %p2174_p10 = scmp.lt.u32.totalorder %s2165_s5, %s2479_s20 }
  0x41   : > { %p2168_p12 = pnand %p4064_p11, %p2166_p4  ;;  %p2173_p9 = por %p2172_p7, %p2171_p3 }
  0x43   : > { %p2169_p13 = pneg %p2168_p12  ;;  %p2175_p5 = por %p2174_p10, %p2173_p9 }
  0x45   : > { %p2176_p1 = pnand %p2175_p5, %p2169_p13 }
  0x47   : > { %2179 = shalt.err (!%p2176_p1)
}
  0x48   : > { %s2180_s7 = scalar_lea.vmem %s2481_s23, 2048  ;;  %s2334_s9 = smov [#allocation2]  }
  0x49   : > { %p2181_p2 = scmp.ne.s32.totalorder %s2481_s23, %s2180_s7  ;;  %s2185_s22 = sshll.u32 %s2334_s9, 4  ;;  %s2186_s22 = int_to_ptr.vmem [resolvable:$false] %s2185_s22 }
  0x4a   : > { %s2187_s10 = scalar_lea.vmem %s2186_s22, 4096  ;;  %p2188_p8 = scmp.lt.s32.totalorder %s2481_s23, %s2186_s22 }
  0x4b   : > { %p2183_p4 = pnand %p2181_p2, %p4064_p11  ;;  %p2189_p3 = scmp.lt.s32.totalorder %s2187_s10, %s2180_s7 }
  0x4d   : > { %p2184_p12 = pneg %p2183_p4  ;;  %p2190_p7 = por %p2189_p3, %p2188_p8 }
  0x4f   : > { %p2191_p9 = pnand %p2190_p7, %p2184_p12 }
  0x51   : > { %2194 = shalt.err (!%p2191_p9)
}
  0x52   : > { %s2335_s5 = smov 128   ;;  %s2336_s12 = smov 8  }
  0x53   : > { %1926 = dma.hbm_to_vmem [thread:$0]  (!%p4128_p6), %s2479_s20, 2048, %s2481_s23, %s2485_s30, %s2335_s5, %s2335_s5, %s2336_s12  }
  0x54   : > { %s2337_s13 = smov [#allocation8]   ;;  %s2195_s22 = scalar_lea.hbm %s4056_s3, 3072 }
  0x55   : > { %s169_s11 = sshll.u32 %s2337_s13, 4  ;;  %p2196_p8 = scmp.ne.s32.totalorder %s4056_s3, %s2195_s22  ;;  %s170_s11 = int_to_ptr.vmem [resolvable:$true] %s169_s11 }
  0x56   : > { %p4129_p13 = pneg %p2441_p0  ;;  %p2202_p1 = scmp.lt.u32.totalorder %s2195_s22, %s4056_s3 }
  0x58   : > { %p2198_p10 = pnand %p2196_p8, %p4129_p13 }
  0x5a   : > { %p2199_p5 = pneg %p2198_p10 }
  0x5c   : > { %p2204_p2 = pnand %p2202_p1, %p2199_p5 }
  0x5e   : > { %2207 = shalt.err (!%p2204_p2)
}
  0x5f   : > { %s2208_s20 = scalar_lea.vmem %s170_s11, 3072  ;;  %p4130_p12 = pmov %p4129_p13 }
  0x60   : > { %p2209_p4 = scmp.ne.s32.totalorder %s170_s11, %s2208_s20  ;;  %p2216_p9 = scmp.lt.s32.totalorder %s170_s11, %s170_s11 }
  0x61   : > { %p2217_p11 = scmp.lt.s32.totalorder %s2208_s20, %s2208_s20 }
  0x62   : > { %p2211_p3 = pnand %p2209_p4, %p4130_p12 }
  0x63   : > { %p2218_p6 = por %p2217_p11, %p2216_p9 }
  0x64   : > { %p2212_p7 = pneg %p2211_p3 }
  0x66   : > { %p2219_p8 = pnand %p2218_p6, %p2212_p7 }
  0x68   : > { %2222 = shalt.err (!%p2219_p8)
}
  0x69   : > { %s2338_s23 = smov 64   ;;  %s2339_s0 = smov 4  }
  0x6a   : > { %1922 = dma.hbm_to_vmem [thread:$0]  (!%p2441_p0), %s4056_s3, 3072, %s170_s11, [#allocation6], %s2338_s23, %s2338_s23, %s2339_s0  }
  0x6b   : > { %s1900_s12 = smul.u32 1536, %s2331_s18  ;;  %s208_s13 = scalar_lea.vmem [#allocation7], %s2483_s25 }
  0x6c   : > { %s216_s14 = sshll.u32 %s208_s13, 4  ;;  %p4131_p11 = scmp.ne.s32.totalorder %s4125_s8, 0  ;;  %s2535_s14 = int_to_ptr.vmem [resolvable:$true] %s216_s14 }
  0x6d   : > { %s2540_s7 = scalar_lea.hbm %s4055_s2, %s1900_s12  ;;  %s2228_s11 = scalar_lea.hbm %s4055_s2, 4608 }
  0x6e   : > { %s2223_s10 = scalar_lea.hbm %s2540_s7, 1536  ;;  %p4132_p13 = pneg %p4131_p11 }
  0x6f   : > { %p2224_p6 = scmp.ne.s32.totalorder %s2540_s7, %s2223_s10  ;;  %p2229_p5 = scmp.lt.u32.totalorder %s2540_s7, %s4055_s2 }
  0x70   : > { %p2230_p1 = scmp.lt.u32.totalorder %s2228_s11, %s2223_s10  ;;  %p2232_p4 = scmp.lt.u32.totalorder %s2223_s10, %s2540_s7 }
  0x71   : > { %p2226_p10 = pnand %p2224_p6, %p4132_p13 }
  0x72   : > { %p2231_p2 = por %p2230_p1, %p2229_p5 }
  0x73   : > { %p2227_p0 = pneg %p2226_p10 }
  0x74   : > { %p2233_p12 = por %p2232_p4, %p2231_p2 }
  0x76   : > { %p2234_p3 = pnand %p2233_p12, %p2227_p0 }
  0x78   : > { %2237 = shalt.err (!%p2234_p3)
}
  0x79   : > { %s2238_s0 = scalar_lea.vmem %s2535_s14, 1536  ;;  %p4133_p9 = pmov %p4132_p13 }
  0x7a   : > { %p2239_p7 = scmp.ne.s32.totalorder %s2535_s14, %s2238_s0  ;;  %s2340_s1 = smov [#allocation7]  }
  0x7b   : > { %s2243_s5 = sshll.u32 %s2340_s1, 4  ;;  %s2244_s5 = int_to_ptr.vmem [resolvable:$false] %s2243_s5 }
  0x7c   : > { %p2241_p8 = pnand %p2239_p7, %p4133_p9  ;;  %s2245_s12 = scalar_lea.vmem %s2244_s5, 3072 }
  0x7d   : > { %p2246_p13 = scmp.lt.s32.totalorder %s2535_s14, %s2244_s5  ;;  %p2247_p10 = scmp.lt.s32.totalorder %s2245_s12, %s2238_s0 }
  0x7e   : > { %p2242_p6 = pneg %p2241_p8 }
  0x7f   : > { %p2248_p5 = por %p2247_p10, %p2246_p13 }
  0x81   : > { %p2249_p1 = pnand %p2248_p5, %p2242_p6 }
  0x83   : > { %2252 = shalt.err (!%p2249_p1)
}
  0x84   : > { %s2341_s13 = smov 384   ;;  %s2342_s9 = smov 24  }
  0x85   : > { %1929 = dma.hbm_to_vmem [thread:$0]  (!%p4131_p11), %s2540_s7, 1536, %s2535_s14, %s2485_s30, %s2341_s13, %s2341_s13, %s2342_s9  }
  0x86   : > { %p4134_p0 = scmp.ne.s32.totalorder %s4123_s29, 0 }
  0x88   : > { %228 = sbr.rel (%p4134_p0) target bundleno = 951 (0x3b7), region = 36 }
  0x8f   : > { %s230_s22 = sand.u32 1, %s2393_s19   ;;  %s2570_s10 = sand.u32 1, %s2323_s16  }
  0x90   : > { %s1752_s6 = sshll.u32 %s2570_s10, 7  ;;  %s231_s25 = scalar_lea.sflag [#allocation3], %s230_s22 }
  0x91   : > { %s2575_s11 = scalar_lea.vmem [#allocation2], %s1752_s6  ;;  %p4135_p2 = scmp.ne.s32.totalorder %s4120_s26, 0 }
  0x93   : > { %2298 = dma.done.wait (%p4135_p2), %s231_s25, 2048  }
  0x94   : > { %2300 = vsyncadd (%p4135_p2), %s231_s25, 4294965248  ;;  %p4136_p11 = scmp.eq.s32.totalorder %s2393_s19, 0 }
  0x96   : > { %2302 = dma.done.wait (%p4136_p11), [#allocation6], 48   ;;  %p4137_p4 = pmov %p4136_p11 }
  0x97   : > { %s1901_s29 = smul.u32 96, %s2570_s10 }
  0x98   : > { %2304 = vsyncadd (%p4137_p4), [#allocation6], 4294967248 }
  0x99   : > { %s2586_s8 = scalar_lea.vmem [#allocation7], %s1901_s29 }
  0x9a   : > { %2306 = dma.done.wait (%p4135_p2), %s231_s25, 1536  }
  0x9b   : > { %2308 = vsyncadd (%p4135_p2), %s231_s25, 4294965760  ;;  %p4138_p12 = pmov %p4137_p4 }
  0x9c   : > { %p4139_p3 = pmov %p4137_p4 }
  0x9d   : > { %2310 = dma.done.wait (%p4138_p12), [#allocation6], 3072  }
  0x9e   : > { %2312 = vsyncadd (%p4139_p3), [#allocation6], 4294964224  ;;  %v2343_v0 = vmov 0   ;;  %v289_v1 = vld [vmem:[%s2575_s11 + $0x10] sm:$0xff]  ;;  %v287_v2 = vld [vmem:[%s2575_s11] sm:$0xff]  ;;  %v397_v36 = vlaneseq  ;;  %s3985_s26 = scalar_lea.vmem [#allocation9], %s1752_s6 }
  0x9f   : > { %1984 = vset.pattern.permute.xlu1 %v2343_v0  ;;  %1983 = vset.pattern.permute.xlu0 %v2343_v0  ;;  %v290_v3 = vld [vmem:[%s2575_s11 + $0x18] sm:$0xff]  ;;  %v288_v4 = vld [vmem:[%s2575_s11 + $0x8] sm:$0xff]  ;;  %v291_v6 = vld [vmem:[%s2575_s11 + $0x20] sm:$0xff]  ;;  %s1786_s30 = sshll.u32 %s2393_s19, 11  ;;  %s1628_s14 = sshll.u32 %s3985_s26, 4  ;;  %s4008_s14 = int_to_ptr.vmem [resolvable:$true] %s1628_s14 }
  0xa0   : > { %328 = vperm.xlu1 %1984, %v289_v1   ;;  %318 = vperm.xlu0 %1983, %v287_v2   ;;  %v292_v5 = vld [vmem:[%s2575_s11 + $0x28] sm:$0xff]  ;;  %v294_v7 = vld [vmem:[%s2575_s11 + $0x38] sm:$0xff]  ;;  %v293_v8 = vld [vmem:[%s2575_s11 + $0x30] sm:$0xff]  ;;  %v398_v45 = vshrl.u32 %v397_v36, 7  ;;  %s4006_s23 = scalar_lea.hbm %s4057_s4, %s1786_s30  ;;  %s1615_s0 = scalar_lea.sflag [#allocation4], %s2570_s10 }
  0xa1   : > { %v296_v9 = vld [vmem:[%s2575_s11 + $0x48] sm:$0xff]  ;;  %v295_v10 = vld [vmem:[%s2575_s11 + $0x40] sm:$0xff]  ;;  %v298_v11 = vld [vmem:[%s2575_s11 + $0x58] sm:$0xff]  ;;  %s2253_s1 = scalar_lea.vmem %s4008_s14, 2048  ;;  %p4404_p9 = scmp.ne.s32.totalorder %s4121_s27, 0 }
  0xa2   : > { %v297_v12 = vld [vmem:[%s2575_s11 + $0x50] sm:$0xff]  ;;  %v300_v13 = vld [vmem:[%s2575_s11 + $0x68] sm:$0xff]  ;;  %v299_v14 = vld [vmem:[%s2575_s11 + $0x60] sm:$0xff]  ;;  %v399_v57 = vsub.s32 0, %v398_v45  ;;  %v403_v58 = vsub.s32 1, %v398_v45  ;;  %v407_v59 = vsub.s32 2, %v398_v45  ;;  %p2254_p7 = scmp.ne.s32.totalorder %s4008_s14, %s2253_s1 }
  0xa3   : > { %v302_v15 = vld [vmem:[%s2575_s11 + $0x78] sm:$0xff]  ;;  %v301_v16 = vld [vmem:[%s2575_s11 + $0x70] sm:$0xff]  ;;  %v304_v17 = vld [vmem:[%s2586_s8] sm:$0xff]  ;;  %s2344_s19 = smov [#allocation9]  }
  0xa4   : > { %333 = vperm.xlu1 %1984, %v290_v3   ;;  %323 = vperm.xlu0 %1983, %v288_v4   ;;  %v305_v18 = vld [vmem:[%s2586_s8 + $0x8] sm:$0xff]  ;;  %v306_v19 = vld [vmem:[%s2586_s8 + $0x10] sm:$0xff]  ;;  %vm556_vm0 = vnez %v304_v17  ;;  %v307_v33 = vld [vmem:[%s2586_s8 + $0x18] sm:$0xff]  ;;  %p2255_p8 = pnand %p2254_p7, %p4404_p9  ;;  %s2257_s5 = sshll.u32 %s2344_s19, 4  ;;  %s2258_s5 = int_to_ptr.vmem [resolvable:$false] %s2257_s5 }
  0xa5   : > { %vm557_vm1 = vnez %v305_v18  ;;  %vm558_vm2 = vnez %v306_v19  ;;  %v568_v20 = vsel %vm556_vm0, 16843009, %v2343_v0  ;;  %v308_v34 = vld [vmem:[%s2586_s8 + $0x20] sm:$0xff]  ;;  %v309_v35 = vld [vmem:[%s2586_s8 + $0x28] sm:$0xff]  ;;  %vm559_vm3 = vnez %v307_v33  ;;  %v303_v60 = vld [vmem:[#allocation5] sm:$0x7]  ;;  %p2260_p13 = scmp.lt.s32.totalorder %s4008_s14, %s2258_s5 }
  0xa6   : > { %v569_v21 = vsel %vm557_vm1, 16843009, %v2343_v0  ;;  %v570_v22 = vsel %vm558_vm2, 16843009, %v2343_v0  ;;  %v580_v23 = vunpack.c.0.s8 %v568_v20  ;;  %v586_v26 = vunpack.c.2.s8 %v568_v20  ;;  %p2256_p6 = pneg %p2255_p8  ;;  %s2259_s12 = scalar_lea.vmem %s2258_s5, 4096 }
  0xa7   : > { %v581_v24 = vunpack.c.0.s8 %v569_v21  ;;  %v582_v25 = vunpack.c.0.s8 %v570_v22  ;;  %v587_v27 = vunpack.c.2.s8 %v569_v21  ;;  %v588_v28 = vunpack.c.2.s8 %v570_v22  ;;  %p2261_p10 = scmp.lt.s32.totalorder %s2259_s12, %s2253_s1 }
  0xa8   : > { %343 = vperm.xlu1 %1984, %v292_v5   ;;  %338 = vperm.xlu0 %1983, %v291_v6   ;;  %v583_v37 = vunpack.c.1.s8 %v568_v20  ;;  %v584_v38 = vunpack.c.1.s8 %v569_v21  ;;  %v585_v39 = vunpack.c.1.s8 %v570_v22  ;;  %vm560_vm4 = vnez %v308_v34 }
  0xa9   : > { %v628_v29 = vpack.c.b16 %v581_v24, %v580_v23  ;;  %v629_v30 = vpack.c.b16 %v582_v25, %v582_v25  ;;  %v634_v31 = vpack.c.b16 %v587_v27, %v586_v26  ;;  %v635_v32 = vpack.c.b16 %v588_v28, %v588_v28  ;;  %p2262_p5 = por %p2261_p10, %p2260_p13 }
  0xaa   : > { %vm561_vm5 = vnez %v309_v35  ;;  %v589_v42 = vunpack.c.3.s8 %v568_v20  ;;  %v590_v43 = vunpack.c.3.s8 %v569_v21  ;;  %v591_v44 = vunpack.c.3.s8 %v570_v22  ;;  %v313_v35 = vld [vmem:[%s2586_s8 + $0x48] sm:$0xff] }
  0xab   : > { %v630_v40 = vpack.c.b8 %v629_v30, %v628_v29  ;;  %v636_v41 = vpack.c.b8 %v635_v32, %v634_v31  ;;  %v631_v46 = vpack.c.b16 %v584_v38, %v583_v37  ;;  %v632_v47 = vpack.c.b16 %v585_v39, %v585_v39  ;;  %p2263_p1 = pnand %p2262_p5, %p2256_p6 }
  0xac   : > { %353 = vperm.xlu1 %1984, %v294_v7   ;;  %348 = vperm.xlu0 %1983, %v293_v8   ;;  %v2624_v48 = vsel %vm559_vm3, 16843009, %v2343_v0  ;;  %v2627_v49 = vsel %vm560_vm4, 16843009, %v2343_v0  ;;  %v2630_v50 = vsel %vm561_vm5, 16843009, %v2343_v0  ;;  %v637_v51 = vpack.c.b16 %v590_v43, %v589_v42 }
  0xad   : > { %vm676_vm6 = vnez %v630_v40  ;;  %vm678_vm7 = vnez %v636_v41  ;;  %v638_v52 = vpack.c.b16 %v591_v44, %v591_v44  ;;  %v633_v53 = vpack.c.b8 %v632_v47, %v631_v46  ;;  %v310_v7 = vld [vmem:[%s2586_s8 + $0x30] sm:$0xff]  ;;  %v311_v8 = vld [vmem:[%s2586_s8 + $0x38] sm:$0xff] }
  0xae   : > { %v592_v54 = vunpack.c.0.s8 %v2624_v48  ;;  %v593_v55 = vunpack.c.0.s8 %v2627_v49  ;;  %v594_v56 = vunpack.c.0.s8 %v2630_v50  ;;  %v2636_v61 = vsel %vm676_vm6, 16843009, %v2343_v0  ;;  %v314_v40 = vld [vmem:[%s2586_s8 + $0x50] sm:$0xff]  ;;  %v315_v41 = vld [vmem:[%s2586_s8 + $0x58] sm:$0xff] }
  0xaf   : > { %v2639_v62 = vsel %vm678_vm7, 16843009, %v2343_v0  ;;  %v639_v63 = vpack.c.b8 %v638_v52, %v637_v51  ;;  %vm677_vm8 = vnez %v633_v53  ;;  %v2641_v3 = vrot.slane %v303_v60, %v399_v57 }
  0xb0   : > { %363 = vperm.xlu1 %1984, %v296_v9   ;;  %358 = vperm.xlu0 %1983, %v295_v10   ;;  %v640_v1 = vpack.c.b16 %v593_v55, %v592_v54  ;;  %v641_v2 = vpack.c.b16 %v594_v56, %v594_v56  ;;  %v2643_v4 = vrot.slane %v303_v60, %v403_v58  ;;  %v708_v6 = vunpack.c.0.s8 %v2636_v61 }
  0xb1   : > { %v2645_v5 = vrot.slane %v303_v60, %v407_v59  ;;  %v709_v9 = vunpack.c.1.s8 %v2636_v61  ;;  %v710_v10 = vunpack.c.2.s8 %v2636_v61  ;;  %vm2658_vm9 = vnez %v639_v63 }
  0xb2   : > { %v596_v17 = vunpack.c.1.s8 %v2627_v49  ;;  %v642_v18 = vpack.c.b8 %v641_v2, %v640_v1  ;;  %v597_v19 = vunpack.c.1.s8 %v2630_v50  ;;  %vm562_vm10 = vnez %v310_v7 }
  0xb3   : > { %vm563_vm11 = vnez %v311_v8  ;;  %v598_v20 = vunpack.c.2.s8 %v2624_v48  ;;  %v599_v21 = vunpack.c.2.s8 %v2627_v49  ;;  %v600_v22 = vunpack.c.2.s8 %v2630_v50 }
  0xb4   : > { %373 = vperm.xlu1 %1984, %v298_v11   ;;  %368 = vperm.xlu0 %1983, %v297_v12   ;;  %v714_v11 = vunpack.c.0.s8 %v2639_v62  ;;  %v715_v12 = vunpack.c.1.s8 %v2639_v62  ;;  %v716_v23 = vunpack.c.2.s8 %v2639_v62  ;;  %v601_v24 = vunpack.c.3.s8 %v2624_v48 }
  0xb5   : > { %v602_v25 = vunpack.c.3.s8 %v2627_v49  ;;  %v603_v26 = vunpack.c.3.s8 %v2630_v50  ;;  %v574_v29 = vsel %vm562_vm10, 16843009, %v2343_v0  ;;  %v575_v30 = vsel %vm563_vm11, 16843009, %v2343_v0 }
  0xb6   : > { %v2680_v32 = vsel %vm2658_vm9, 16843009, %v2343_v0  ;;  %vm2684_vm13 = vnez %v642_v18  ;;  %v644_v37 = vpack.c.b16 %v597_v19, %v597_v19  ;;  %v646_v38 = vpack.c.b16 %v599_v21, %v598_v20 }
  0xb7   : > { %v647_v39 = vpack.c.b16 %v600_v22, %v600_v22  ;;  %v649_v42 = vpack.c.b16 %v602_v25, %v601_v24  ;;  %v650_v43 = vpack.c.b16 %v603_v26, %v603_v26  ;;  %v604_v44 = vunpack.c.0.s8 %v574_v29 }
  0xb8   : > { %383 = vperm.xlu1 %1984, %v300_v13   ;;  %378 = vperm.xlu0 %1983, %v299_v14   ;;  %v312_v13 = vld [vmem:[%s2586_s8 + $0x40] sm:$0xff]  ;;  %v2656_v14 = vsel %vm677_vm8, 16843009, %v2343_v0  ;;  %v605_v45 = vunpack.c.0.s8 %v575_v30  ;;  %vm565_vm14 = vnez %v313_v35  ;;  %v607_v49 = vunpack.c.1.s8 %v574_v29 }
  0xb9   : > { %vm564_vm12 = vnez %v312_v13  ;;  %v711_v27 = vunpack.c.0.s8 %v2656_v14  ;;  %v712_v28 = vunpack.c.1.s8 %v2656_v14  ;;  %v713_v31 = vunpack.c.2.s8 %v2656_v14 }
  0xba   : > { %v576_v34 = vsel %vm564_vm12, 16843009, %v2343_v0  ;;  %v608_v50 = vunpack.c.1.s8 %v575_v30  ;;  %vm566_vm15 = vnez %v314_v40  ;;  %vm567_vm0 = vnez %v315_v41 }
  0xbb   : > { %v2696_v52 = vsel %vm2684_vm13, 16843009, %v2343_v0  ;;  %v609_v54 = vunpack.c.1.s8 %v576_v34  ;;  %v648_v55 = vpack.c.b8 %v647_v39, %v646_v38  ;;  %v651_v56 = vpack.c.b8 %v650_v43, %v649_v42 }
  0xbc   : > { %393 = vperm.xlu1 %1984, %v302_v15   ;;  %388 = vperm.xlu0 %1983, %v301_v16   ;;  %v595_v16 = vunpack.c.1.s8 %v2624_v48  ;;  %v606_v48 = vunpack.c.0.s8 %v576_v34  ;;  %v652_v57 = vpack.c.b16 %v605_v45, %v604_v44  ;;  %v577_v58 = vsel %vm565_vm14, 16843009, %v2343_v0 }
  0xbd   : > { %v610_v60 = vunpack.c.2.s8 %v574_v29  ;;  %v578_v63 = vsel %vm566_vm15, 16843009, %v2343_v0  ;;  %v579_v1 = vsel %vm567_vm0, 16843009, %v2343_v0  ;;  %v655_v2 = vpack.c.b16 %v608_v50, %v607_v49 }
  0xbe   : > { %v643_v33 = vpack.c.b16 %v596_v17, %v595_v16  ;;  %v653_v59 = vpack.c.b16 %v606_v48, %v606_v48  ;;  %v611_v7 = vunpack.c.2.s8 %v575_v30  ;;  %v612_v8 = vunpack.c.2.s8 %v576_v34 }
  0xbf   : > { %v613_v13 = vunpack.c.3.s8 %v574_v29  ;;  %v656_v15 = vpack.c.b16 %v609_v54, %v609_v54  ;;  %v614_v16 = vunpack.c.3.s8 %v575_v30  ;;  %v615_v17 = vunpack.c.3.s8 %v576_v34 }
  0xc0   : > { %v645_v53 = vpack.c.b8 %v644_v37, %v643_v33  ;;  %v616_v18 = vunpack.c.0.s8 %v577_v58  ;;  %v617_v19 = vunpack.c.0.s8 %v578_v63  ;;  %v618_v20 = vunpack.c.0.s8 %v579_v1 }
  0xc1   : > { %v619_v21 = vunpack.c.1.s8 %v577_v58  ;;  %v620_v22 = vunpack.c.1.s8 %v578_v63  ;;  %vm2705_vm2 = vnez %v648_v55  ;;  %vm2709_vm3 = vnez %v651_v56 }
  0xc2   : > { %vm2701_vm1 = vnez %v645_v53  ;;  %v621_v29 = vunpack.c.1.s8 %v579_v1  ;;  %v654_v30 = vpack.c.b8 %v653_v59, %v652_v57  ;;  %v622_v33 = vunpack.c.2.s8 %v577_v58 }
  0xc3   : > { %v623_v34 = vunpack.c.2.s8 %v578_v63  ;;  %v624_v35 = vunpack.c.2.s8 %v579_v1  ;;  %v657_v36 = vpack.c.b8 %v656_v15, %v655_v2  ;;  %v658_v37 = vpack.c.b16 %v611_v7, %v610_v60 }
  0xc4   : > { %v659_v38 = vpack.c.b16 %v612_v8, %v612_v8  ;;  %v661_v39 = vpack.c.b16 %v614_v16, %v613_v13  ;;  %v662_v40 = vpack.c.b16 %v615_v17, %v615_v17  ;;  %v664_v41 = vpack.c.b16 %v617_v19, %v616_v18 }
  0xc5   : > { %v665_v42 = vpack.c.b16 %v618_v20, %v618_v20  ;;  %v667_v43 = vpack.c.b16 %v620_v22, %v619_v21  ;;  %v668_v44 = vpack.c.b16 %v621_v29, %v621_v29  ;;  %v625_v45 = vunpack.c.3.s8 %v577_v58 }
  0xc6   : > { %v626_v48 = vunpack.c.3.s8 %v578_v63  ;;  %v627_v49 = vunpack.c.3.s8 %v579_v1  ;;  %v670_v54 = vpack.c.b16 %v623_v34, %v622_v33  ;;  %v671_v55 = vpack.c.b16 %v624_v35, %v624_v35 }
  0xc7   : > { %v2719_v57 = vsel %vm2701_vm1, 16843009, %v2343_v0  ;;  %v2724_v59 = vsel %vm2705_vm2, 16843009, %v2343_v0  ;;  %v660_v58 = vpack.c.b8 %v659_v38, %v658_v37  ;;  %v2729_v60 = vsel %vm2709_vm3, 16843009, %v2343_v0 }
  0xc8   : > { %vm684_vm4 = vnez %v654_v30  ;;  %vm2731_vm5 = vnez %v657_v36  ;;  %v663_v1 = vpack.c.b8 %v662_v40, %v661_v39  ;;  %v666_v2 = vpack.c.b8 %v665_v42, %v664_v41 }
  0xc9   : > { %v669_v7 = vpack.c.b8 %v668_v44, %v667_v43  ;;  %v673_v8 = vpack.c.b16 %v626_v48, %v625_v45  ;;  %v674_v13 = vpack.c.b16 %v627_v49, %v627_v49  ;;  %v672_v18 = vpack.c.b8 %v671_v55, %v670_v54 }
  0xca   : > { %v2741_v21 = vsel %vm684_vm4, 16843009, %v2343_v0  ;;  %vm686_vm6 = vnez %v660_v58  ;;  %v2748_v25 = vsel %vm2731_vm5, 16843009, %v2343_v0  ;;  %vm687_vm7 = vnez %v663_v1 }
  0xcb   : > { %4152 = vst [vmem:[#allocation15_spill] sm:$0xff] %v2748_v25  ;;  %vm688_vm8 = vnez %v666_v2  ;;  %vm689_vm9 = vnez %v669_v7  ;;  %v675_v29 = vpack.c.b8 %v674_v13, %v673_v8  ;;  %v2754_v34 = vsel %vm686_vm6, 16843009, %v2343_v0 }
  0xcc   : > { %4153 = vst [vmem:[#allocation16_spill] sm:$0xff] %v2754_v34  ;;  %vm690_vm10 = vnez %v672_v18  ;;  %v2760_v38 = vsel %vm687_vm7, 16843009, %v2343_v0  ;;  %v2765_v41 = vsel %vm688_vm8, 16843009, %v2343_v0  ;;  %vm2777_vm12 = vcmp.ne.s32.totalorder %v708_v6, 0 }
  0xcd   : > { %4154 = vst [vmem:[#allocation17_spill] sm:$0xff] %v2760_v38  ;;  %4155 = vst [vmem:[#allocation18_spill] sm:$0xff] %v2765_v41  ;;  %v2768_v42 = vsel %vm689_vm9, 16843009, %v2343_v0  ;;  %v2773_v45 = vsel %vm690_vm10, 16843009, %v2343_v0  ;;  %vm691_vm11 = vnez %v675_v29  ;;  %v4186_v41 = vunpack.c.0.s8 %v2680_v32 }
  0xce   : > { %4156 = vst [vmem:[#allocation19_spill] sm:$0xff] %v2768_v42  ;;  %4157 = vst [vmem:[#allocation20_spill] sm:$0xff] %v2773_v45  ;;  %v2793_v49 = vsel %vm691_vm11, 16843009, %v2343_v0  ;;  %vm2827_vm13 = vcmp.ne.s32.totalorder %v709_v9, 0  ;;  %vm2853_vm14 = vcmp.ne.s32.totalorder %v710_v10, 0  ;;  %v4192_v30 = vunpack.c.2.s8 %v2680_v32 }
  0xcf   : > { %4160 = vst [vmem:[#allocation21_spill] sm:$0xff] %v2793_v49  ;;  %vm2891_vm15 = vcmp.ne.s32.totalorder %v714_v11, 0  ;;  %vm2909_vm0 = vcmp.ne.s32.totalorder %v715_v12, 0  ;;  %vm2926_vm1 = vcmp.ne.s32.totalorder %v716_v23, 0  ;;  %vm2943_vm2 = vcmp.ne.s32.totalorder %v711_v27, 0 }
  0xd0   : > { %vm2949_vm3 = vcmp.ne.s32.totalorder %v712_v28, 0  ;;  %vm2955_vm4 = vcmp.ne.s32.totalorder %v713_v31, 0  ;;  %vm3017_vm5 = vcmp.ne.s32.totalorder %v4186_v41, 0  ;;  %vm3029_vm7 = vcmp.ne.s32.totalorder %v4192_v30, 0 }
 0x11f   : > { %v329_v6 = vpop.permute.xlu1 %328  ;;  %v319_v8 = vpop.permute.xlu0 %318 }
 0x120   : > { %v2796_v58 = vadd.f32 %v2641_v3, %v329_v6  ;;  %v2799_v1 = vadd.f32 %v2643_v4, %v329_v6  ;;  %v2802_v2 = vadd.f32 %v2645_v5, %v329_v6  ;;  %v412_v7 = vadd.f32 %v2641_v3, %v319_v8 }
 0x121   : > { %v2806_v13 = vadd.f32 %v2643_v4, %v319_v8  ;;  %v2809_v18 = vadd.f32 %v2645_v5, %v319_v8 }
 0x122   : > { %v2814_v63 = vmul.f32 0.2, %v2796_v58  ;;  %v2817_v55 = vmul.f32 0.2, %v2799_v1  ;;  %v460_v44 = vmul.f32 0.2, %v412_v7 }
 0x123   : > { %v461_v43 = vmul.f32 0.2, %v2806_v13  ;;  %v2823_v8 = vmul.f32 0.2, %v2809_v18  ;;  %v334_v40 = vpop.permute.xlu1 %333  ;;  %v324_v0 = vpop.permute.xlu0 %323  ;;  %v2833_v6 = vmul.f32 0.2, %v2802_v2 }
 0x124   : > { %v2838_v37 = vadd.f32 %v2641_v3, %v334_v40  ;;  %v2841_v36 = vadd.f32 %v2643_v4, %v334_v40  ;;  %v508_v35 = vmax.f32 %v412_v7, %v460_v44  ;;  %v2846_v33 = vadd.f32 %v2645_v5, %v334_v40 }
 0x125   : > { %v2849_v39 = vadd.f32 %v2641_v3, %v324_v0  ;;  %v2864_v44 = vadd.f32 %v2643_v4, %v324_v0  ;;  %v2867_v40 = vadd.f32 %v2645_v5, %v324_v0  ;;  %v509_v7 = vmax.f32 %v2806_v13, %v461_v43 }
 0x126   : > { %v2858_v26 = vmul.f32 0.2, %v2838_v37  ;;  %v2861_v24 = vmul.f32 0.2, %v2841_v36  ;;  %v2871_v61 = vmul.f32 0.2, %v2846_v33  ;;  %v510_v19 = vmax.f32 %v2809_v18, %v2823_v8 }
 0x127   : > { %v2874_v10 = vmul.f32 0.2, %v2849_v39  ;;  %v344_v22 = vpop.permute.xlu1 %343  ;;  %v339_v20 = vpop.permute.xlu0 %338  ;;  %v2883_v16 = vmul.f32 0.2, %v2864_v44  ;;  %v2887_v43 = vsel %vm2777_vm12, %v508_v35, -1e+15  ;;  %v516_v28 = vmax.f32 %v2802_v2, %v2833_v6 }
 0x128   : > { %4165 = vst [vmem:[#allocation22_spill] sm:$0xff] %v2887_v43  ;;  %v2896_v18 = vmul.f32 0.2, %v2867_v40  ;;  %v2899_v8 = vadd.f32 %v2641_v3, %v344_v22  ;;  %v2902_v0 = vadd.f32 %v2643_v4, %v344_v22  ;;  %v2905_v17 = vadd.f32 %v2645_v5, %v344_v22 }
 0x129   : > { %v2916_v48 = vadd.f32 %v2641_v3, %v339_v20  ;;  %v2919_v15 = vadd.f32 %v2643_v4, %v339_v20  ;;  %v2922_v9 = vadd.f32 %v2645_v5, %v339_v20  ;;  %v512_v12 = vmax.f32 %v2864_v44, %v2883_v16 }
 0x12a   : > { %v2933_v11 = vmul.f32 0.2, %v2899_v8  ;;  %v2936_v56 = vmul.f32 0.2, %v2902_v0  ;;  %v2939_v54 = vmul.f32 0.2, %v2905_v17  ;;  %v4207_v13 = vmax.f32 %v2799_v1, %v2817_v55 }
 0x12b   : > { %v354_v20 = vpop.permute.xlu1 %353  ;;  %v2960_v44 = vmul.f32 0.2, %v2916_v48  ;;  %v2963_v27 = vmul.f32 0.2, %v2919_v15  ;;  %v2973_v14 = vmul.f32 0.2, %v2922_v9  ;;  %v349_v47 = vpop.permute.xlu0 %348  ;;  %v4210_v55 = vmax.f32 %v2849_v39, %v2874_v10 }
 0x12c   : > { %v2966_v53 = vadd.f32 %v2641_v3, %v354_v20  ;;  %v2976_v31 = vadd.f32 %v2643_v4, %v354_v20  ;;  %v2979_v51 = vadd.f32 %v2645_v5, %v354_v20  ;;  %v2990_v6 = vsel %vm2827_vm13, %v509_v7, -1e+15 }
 0x12d   : > { %4182 = vst [vmem:[#allocation27_spill] sm:$0xff] %v2990_v6  ;;  %v852_v46 = vmax.f32 %v2887_v43, %v2990_v6  ;;  %v3004_v42 = vsel %vm2853_vm14, %v510_v19, -1e+15  ;;  %v3007_v29 = vadd.f32 %v2641_v3, %v349_v47  ;;  %v3010_v7 = vadd.f32 %v2643_v4, %v349_v47 }
 0x12e   : > { %4178 = vst [vmem:[#allocation23_spill] sm:$0xff] %v2966_v53  ;;  %4179 = vst [vmem:[#allocation24_spill] sm:$0xff] %v2976_v31  ;;  %v2986_v2 = vmul.f32 0.2, %v2966_v53  ;;  %v2995_v20 = vmul.f32 0.2, %v2976_v31  ;;  %v3013_v50 = vadd.f32 %v2645_v5, %v349_v47  ;;  %v4189_v6 = vunpack.c.1.s8 %v2680_v32 }
 0x12f   : > { %4180 = vst [vmem:[#allocation25_spill] sm:$0xff] %v2979_v51  ;;  %v2998_v45 = vmul.f32 0.2, %v2979_v51  ;;  %v364_v49 = vpop.permute.xlu1 %363  ;;  %4185 = vst [vmem:[#allocation30_spill] sm:$0xff] %v3004_v42  ;;  %v853_v41 = vmax.f32 %v852_v46, %v3004_v42  ;;  %v3045_v32 = vmul.f32 0.2, %v3007_v29  ;;  %v4195_v46 = vunpack.c.0.s8 %v2696_v52  ;;  %v359_v31 = vpop.permute.xlu0 %358 }
 0x130   : > { %4181 = vst [vmem:[#allocation26_spill] sm:$0xff] %v2986_v2  ;;  %4183 = vst [vmem:[#allocation28_spill] sm:$0xff] %v2995_v20  ;;  %vm3023_vm6 = vcmp.ne.s32.totalorder %v4189_v6, 0  ;;  %v3040_v38 = vadd.f32 %v2643_v4, %v364_v49  ;;  %v3048_v30 = vmul.f32 0.2, %v3010_v7  ;;  %v3051_v34 = vadd.f32 %v2645_v5, %v364_v49 }
 0x131   : > { %4184 = vst [vmem:[#allocation29_spill] sm:$0xff] %v2998_v45  ;;  %v3037_v45 = vadd.f32 %v2641_v3, %v364_v49  ;;  %vm3055_vm8 = vcmp.ne.s32.totalorder %v4195_v46, 0  ;;  %v4198_v42 = vunpack.c.1.s8 %v2696_v52  ;;  %854 = vmax.xlane.f32.xlu0 %v853_v41  ;;  %v3066_v6 = vmul.f32 0.2, %v3013_v50 }
 0x132   : > { %v4201_v49 = vmax.f32 %v2796_v58, %v2814_v63  ;;  %v4203_v53 = vunpack.c.2.s8 %v2696_v52  ;;  %v3091_v63 = vmul.f32 0.2, %v3040_v38  ;;  %v3101_v52 = vmul.f32 0.2, %v3051_v34 }
 0x133   : > { %vm3061_vm9 = vcmp.ne.s32.totalorder %v4198_v42, 0  ;;  %v3069_v20 = vmul.f32 0.2, %v3037_v45  ;;  %v513_v42 = vmax.f32 %v2867_v40, %v2896_v18  ;;  %v3098_v40 = vsel %vm2909_vm0, %v4207_v13, -1e+15  ;;  %v374_v58 = vpop.permute.xlu1 %373 }
 0x134   : > { %v3076_v46 = vsel %vm2891_vm15, %v4201_v49, -1e+15  ;;  %vm3082_vm10 = vcmp.ne.s32.totalorder %v4203_v53, 0  ;;  %4206 = vst [vmem:[#allocation32_spill] sm:$0xff] %v3091_v63  ;;  %4208 = vst [vmem:[#allocation33_spill] sm:$0xff] %v3098_v40  ;;  %v3133_v10 = vadd.f32 %v2643_v4, %v359_v31  ;;  %v3136_v62 = vadd.f32 %v2645_v5, %v359_v31 }
 0x135   : > { %4202 = vst [vmem:[#allocation31_spill] sm:$0xff] %v3076_v46  ;;  %v3107_v18 = vsel %vm2926_vm1, %v516_v28, -1e+15  ;;  %v860_v49 = vmax.f32 %v3076_v46, %v3098_v40  ;;  %v3116_v1 = vsel %vm2943_vm2, %v4210_v55, -1e+15  ;;  %v3127_v28 = vadd.f32 %v2641_v3, %v359_v31  ;;  %v369_v40 = vpop.permute.xlu0 %368 }
 0x136   : > { %4209 = vst [vmem:[#allocation34_spill] sm:$0xff] %v3107_v18  ;;  %4211 = vst [vmem:[#allocation35_spill] sm:$0xff] %v3116_v1  ;;  %v3120_v35 = vsel %vm2949_vm3, %v512_v12, -1e+15  ;;  %v3124_v22 = vsel %vm2955_vm4, %v513_v42, -1e+15  ;;  %v4214_v12 = vunpack.c.0.s8 %v2719_v57  ;;  %v4217_v16 = vunpack.c.1.s8 %v2719_v57 }
 0x137   : > { %4212 = vst [vmem:[#allocation36_spill] sm:$0xff] %v3120_v35  ;;  %4213 = vst [vmem:[#allocation37_spill] sm:$0xff] %v3124_v22  ;;  %v861_v13 = vmax.f32 %v860_v49, %v3107_v18  ;;  %v856_v39 = vmax.f32 %v3116_v1, %v3120_v35  ;;  %v3151_v49 = vmul.f32 0.2, %v3127_v28  ;;  %v3154_v55 = vadd.f32 %v2641_v3, %v374_v58 }
 0x138   : > { %vm3140_vm11 = vcmp.ne.s32.totalorder %v4214_v12, 0  ;;  %vm3146_vm12 = vcmp.ne.s32.totalorder %v4217_v16, 0  ;;  %v3157_v31 = vadd.f32 %v2643_v4, %v374_v58  ;;  %v3160_v12 = vadd.f32 %v2645_v5, %v374_v58 }
 0x139   : > { %v4220_v53 = vunpack.c.2.s8 %v2719_v57  ;;  %862 = vmax.xlane.f32.xlu0 %v861_v13  ;;  %v857_v16 = vmax.f32 %v856_v39, %v3124_v22  ;;  %v3170_v18 = vmul.f32 0.2, %v3133_v10  ;;  %v3173_v35 = vmul.f32 0.2, %v3136_v62  ;;  %v4287_v13 = vld [vmem:[#allocation16_spill] sm:$0xff] }
 0x13a   : > { %v519_v1 = vmax.f32 %v2846_v33, %v2871_v61  ;;  %v4223_v58 = vunpack.c.0.s8 %v2724_v59  ;;  %v4229_v39 = vunpack.c.2.s8 %v2724_v59  ;;  %v3198_v61 = vmul.f32 0.2, %v3154_v55 }
 0x13b   : > { %vm3164_vm13 = vcmp.ne.s32.totalorder %v4220_v53, 0  ;;  %v4226_v53 = vunpack.c.1.s8 %v2724_v59  ;;  %858 = vmax.xlane.f32.xlu1 %v857_v16  ;;  %v4234_v46 = vmax.f32 %v2841_v36, %v2861_v24  ;;  %v522_v24 = vmax.f32 %v2922_v9, %v2973_v14  ;;  %v384_v36 = vpop.permute.xlu1 %383 }
 0x13c   : > { %vm3179_vm14 = vcmp.ne.s32.totalorder %v4223_v58, 0  ;;  %vm3191_vm0 = vcmp.ne.s32.totalorder %v4229_v39, 0  ;;  %v3201_v58 = vmul.f32 0.2, %v3157_v31  ;;  %v4232_v39 = vmax.f32 %v2838_v37, %v2858_v26 }
 0x13d   : > { %vm3185_vm15 = vcmp.ne.s32.totalorder %v4226_v53, 0  ;;  %v3204_v53 = vmul.f32 0.2, %v3160_v12  ;;  %v3220_v63 = vsel %vm3023_vm6, %v4234_v46, -1e+15  ;;  %v4237_v37 = vmax.f32 %v2916_v48, %v2960_v44 }
 0x13e   : > { %v3213_v33 = vsel %vm3017_vm5, %v4232_v39, -1e+15  ;;  %4235 = vst [vmem:[#allocation39_spill] sm:$0xff] %v3220_v63  ;;  %v3224_v16 = vsel %vm3029_vm7, %v519_v1, -1e+15  ;;  %v4239_v19 = vmax.f32 %v2919_v15, %v2963_v27  ;;  %v3249_v1 = vadd.f32 %v2641_v3, %v369_v40 }
 0x13f   : > { %4233 = vst [vmem:[#allocation38_spill] sm:$0xff] %v3213_v33  ;;  %4236 = vst [vmem:[#allocation40_spill] sm:$0xff] %v3224_v16  ;;  %v864_v51 = vmax.f32 %v3213_v33, %v3220_v63  ;;  %v3239_v43 = vsel %vm3055_vm8, %v4237_v37, -1e+15  ;;  %v3252_v9 = vadd.f32 %v2643_v4, %v369_v40  ;;  %v3257_v48 = vsel %vm3082_vm10, %v522_v24, -1e+15 }
 0x140   : > { %4238 = vst [vmem:[#allocation41_spill] sm:$0xff] %v3239_v43  ;;  %v3246_v46 = vsel %vm3061_vm9, %v4239_v19, -1e+15  ;;  %4241 = vst [vmem:[#allocation43_spill] sm:$0xff] %v3257_v48  ;;  %v3262_v15 = vadd.f32 %v2645_v5, %v369_v40  ;;  %v4242_v27 = vunpack.c.0.s8 %v2729_v60  ;;  %v4245_v47 = vunpack.c.1.s8 %v2729_v60 }
 0x141   : > { %4240 = vst [vmem:[#allocation42_spill] sm:$0xff] %v3246_v46  ;;  %v865_v14 = vmax.f32 %v864_v51, %v3224_v16  ;;  %v868_v44 = vmax.f32 %v3239_v43, %v3246_v46  ;;  %v3277_v41 = vmul.f32 0.2, %v3249_v1  ;;  %v3280_v51 = vmul.f32 0.2, %v3252_v9 }
 0x142   : > { %vm3266_vm1 = vcmp.ne.s32.totalorder %v4242_v27, 0  ;;  %vm3272_vm2 = vcmp.ne.s32.totalorder %v4245_v47, 0  ;;  %v3283_v40 = vadd.f32 %v2641_v3, %v384_v36  ;;  %v3286_v24 = vadd.f32 %v2643_v4, %v384_v36 }
 0x143   : > { %v4250_v37 = vunpack.c.2.s8 %v2729_v60  ;;  %866 = vmax.xlane.f32.xlu0 %v865_v14  ;;  %v869_v47 = vmax.f32 %v868_v44, %v3257_v48  ;;  %v3298_v26 = vadd.f32 %v2645_v5, %v384_v36  ;;  %v525_v59 = vmax.f32 %v2905_v17, %v2939_v54 }
 0x144   : > { %4248 = vst [vmem:[#allocation44_spill] sm:$0xff] %v3283_v40  ;;  %4249 = vst [vmem:[#allocation45_spill] sm:$0xff] %v3286_v24  ;;  %v4254_v46 = vunpack.c.0.s8 %v2741_v21  ;;  %v3315_v14 = vmul.f32 0.2, %v3262_v15  ;;  %v3322_v54 = vmul.f32 0.2, %v3283_v40  ;;  %v4261_v44 = vunpack.c.2.s8 %v2741_v21 }
 0x145   : > { %vm3290_vm3 = vcmp.ne.s32.totalorder %v4250_v37, 0  ;;  %4253 = vst [vmem:[#allocation46_spill] sm:$0xff] %v3298_v26  ;;  %v4257_v37 = vunpack.c.1.s8 %v2741_v21  ;;  %870 = vmax.xlane.f32.xlu1 %v869_v47  ;;  %v3331_v27 = vmul.f32 0.2, %v3286_v24  ;;  %v4265_v36 = vmax.f32 %v2899_v8, %v2933_v11  ;;  %v4324_v24 = vld [vmem:[#allocation23_spill] sm:$0xff] }
 0x146   : > { %vm3304_vm4 = vcmp.ne.s32.totalorder %v4254_v46, 0  ;;  %4260 = vst [vmem:[#allocation47_spill] sm:$0xff] %v3322_v54  ;;  %v379_v46 = vpop.permute.xlu0 %378  ;;  %vm3326_vm6 = vcmp.ne.s32.totalorder %v4261_v44, 0  ;;  %v4267_v48 = vmax.f32 %v2902_v0, %v2936_v56  ;;  %v528_v47 = vmax.f32 %v3013_v50, %v3066_v6  ;;  %v4269_v44 = vld [vmem:[#allocation15_spill] sm:$0xff]  ;;  %v394_v50 = vpop.permute.xlu1 %393 }
 0x147   : > { %vm3310_vm5 = vcmp.ne.s32.totalorder %v4257_v37, 0  ;;  %4264 = vst [vmem:[#allocation48_spill] sm:$0xff] %v3331_v27  ;;  %v3338_v17 = vsel %vm3140_vm11, %v4265_v36, -1e+15  ;;  %v4270_v16 = vunpack.c.0.s8 %v4269_v44  ;;  %v3356_v8 = vmul.f32 0.2, %v3298_v26 }
 0x148   : > { %4266 = vst [vmem:[#allocation49_spill] sm:$0xff] %v3338_v17  ;;  %v3345_v21 = vsel %vm3146_vm12, %v4267_v48, -1e+15  ;;  %v3362_v56 = vsel %vm3164_vm13, %v525_v59, -1e+15  ;;  %v4275_v6 = vunpack.c.1.s8 %v4269_v44  ;;  %v4278_v42 = vmax.f32 %v3007_v29, %v3045_v32 }
 0x149   : > { %4268 = vst [vmem:[#allocation50_spill] sm:$0xff] %v3345_v21  ;;  %vm3351_vm7 = vcmp.ne.s32.totalorder %v4270_v16, 0  ;;  %4273 = vst [vmem:[#allocation15_spill] sm:$0xff] %v3356_v8  ;;  %v872_v0 = vmax.f32 %v3338_v17, %v3345_v21  ;;  %v4280_v25 = vmax.f32 %v3010_v7, %v3048_v30  ;;  %v3388_v48 = vsel %vm3191_vm0, %v528_v47, -1e+15  ;;  %v4301_v17 = vld [vmem:[#allocation29_spill] sm:$0xff] }
 0x14a   : > { %4274 = vst [vmem:[#allocation51_spill] sm:$0xff] %v3362_v56  ;;  %vm3368_vm8 = vcmp.ne.s32.totalorder %v4275_v6, 0  ;;  %v3377_v16 = vsel %vm3179_vm14, %v4278_v42, -1e+15  ;;  %4282 = vst [vmem:[#allocation54_spill] sm:$0xff] %v3388_v48  ;;  %v3391_v36 = vadd.f32 %v2641_v3, %v379_v46  ;;  %v3397_v57 = vadd.f32 %v2643_v4, %v379_v46 }
 0x14b   : > { %4279 = vst [vmem:[#allocation52_spill] sm:$0xff] %v3377_v16  ;;  %v3384_v59 = vsel %vm3185_vm15, %v4280_v25, -1e+15  ;;  %v873_v29 = vmax.f32 %v872_v0, %v3362_v56  ;;  %v3400_v7 = vadd.f32 %v2645_v5, %v379_v46  ;;  %v4284_v30 = vunpack.c.2.s8 %v4269_v44 }
 0x14c   : > { %4281 = vst [vmem:[#allocation53_spill] sm:$0xff] %v3384_v59  ;;  %v876_v32 = vmax.f32 %v3377_v16, %v3384_v59  ;;  %v4288_v47 = vunpack.c.0.s8 %v4287_v13  ;;  %v4291_v0 = vunpack.c.1.s8 %v4287_v13  ;;  %v3421_v46 = vmul.f32 0.2, %v3391_v36 }
 0x14d   : > { %4283 = vst [vmem:[#allocation55_spill] sm:$0xff] %v3400_v7  ;;  %vm3404_vm9 = vcmp.ne.s32.totalorder %v4284_v30, 0  ;;  %v3424_v44 = vadd.f32 %v2641_v3, %v394_v50  ;;  %v3427_v25 = vadd.f32 %v2643_v4, %v394_v50  ;;  %v3430_v30 = vadd.f32 %v2645_v5, %v394_v50  ;;  %874 = vmax.xlane.f32.xlu0 %v873_v29 }
 0x14e   : > { %vm3410_vm10 = vcmp.ne.s32.totalorder %v4288_v47, 0  ;;  %vm3416_vm11 = vcmp.ne.s32.totalorder %v4291_v0, 0  ;;  %v4294_v47 = vld [vmem:[#allocation17_spill] sm:$0xff]  ;;  %v877_v21 = vmax.f32 %v876_v32, %v3388_v48  ;;  %v3448_v50 = vmul.f32 0.2, %v3397_v57 }
 0x14f   : > { %v4295_v11 = vunpack.c.0.s8 %v4294_v47  ;;  %v4298_v0 = vunpack.c.1.s8 %v4294_v47  ;;  %v4303_v26 = vunpack.c.2.s8 %v4287_v13  ;;  %v4304_v8 = vmov 0  ;;  %v389_v13 = vpop.permute.xlu0 %388 }
 0x150   : > { %v4308_v40 = vmov 0  ;;  %v3465_v29 = vmul.f32 0.2, %v3400_v7  ;;  %v544_v32 = vmax.f32 %v3391_v36, %v3421_v46  ;;  %v4316_v48 = vmov 0  ;;  %v4319_v36 = vld [vmem:[#allocation19_spill] sm:$0xff]  ;;  %878 = vmax.xlane.f32.xlu1 %v877_v21  ;;  %v4328_v7 = vld [vmem:[#allocation28_spill] sm:$0xff] }
 0x151   : > { %vm3434_vm12 = vcmp.ne.s32.totalorder %v4295_v11, 0  ;;  %vm3440_vm13 = vcmp.ne.s32.totalorder %v4298_v0, 0  ;;  %v4302_v11 = vld [vmem:[#allocation25_spill] sm:$0xff]  ;;  %vm3454_vm14 = vcmp.ne.s32.totalorder %v4303_v26, 0  ;;  %v4306_v0 = vld [vmem:[#allocation18_spill] sm:$0xff]  ;;  %v4320_v46 = vunpack.c.0.s8 %v4319_v36 }
 0x152   : > { %v531_v33 = vmax.f32 %v4302_v11, %v4301_v17  ;;  %v4305_v8 = vsel %vm3454_vm14, 4294967295, %v4304_v8  ;;  %v4307_v54 = vunpack.c.0.s8 %v4306_v0  ;;  %v3470_v17 = vmul.f32 0.2, %v3424_v44 }
 0x153   : > { %v3473_v26 = vmul.f32 0.2, %v3427_v25  ;;  %v4311_v11 = vunpack.c.2.s8 %v4294_v47  ;;  %v4315_v56 = vunpack.c.1.s8 %v4306_v0  ;;  %vm3489_vm14 = vcmp.ne.s32.totalorder %v4320_v46, 0 }
 0x154   : > { %vm3460_vm15 = vcmp.ne.s32.totalorder %v4307_v54, 0  ;;  %v4312_v54 = vmov 0  ;;  %v4321_v27 = vmov 0  ;;  %v545_v47 = vmax.f32 %v3397_v57, %v3448_v50  ;;  %v4336_v50 = vld [vmem:[#allocation20_spill] sm:$0xff] }
 0x155   : > { %v4309_v40 = vsel %vm3460_vm15, 4294967295, %v4308_v40  ;;  %vm3477_vm0 = vcmp.ne.s32.totalorder %v4311_v11, 0  ;;  %vm3483_vm15 = vcmp.ne.s32.totalorder %v4315_v56, 0  ;;  %v4322_v27 = vsel %vm3489_vm14, 4294967295, %v4321_v27 }
 0x156   : > { %4310 = vst [vmem:[#allocation16_spill] sm:$0xff] %v4309_v40  ;;  %v4313_v54 = vsel %vm3477_vm0, 4294967295, %v4312_v54  ;;  %v4317_v48 = vsel %vm3483_vm15, 4294967295, %v4316_v48  ;;  %4323 = vst [vmem:[#allocation25_spill] sm:$0xff] %v4322_v27  ;;  %v3496_v11 = vmul.f32 0.2, %v3430_v30  ;;  %v4330_v21 = vunpack.c.1.s8 %v4319_v36 }
 0x157   : > { %4314 = vst [vmem:[#allocation17_spill] sm:$0xff] %v4313_v54  ;;  %4318 = vst [vmem:[#allocation29_spill] sm:$0xff] %v4317_v48  ;;  %v4325_v54 = vld [vmem:[#allocation26_spill] sm:$0xff]  ;;  %v4327_v48 = vld [vmem:[#allocation24_spill] sm:$0xff]  ;;  %v3522_v2 = vsel %vm3290_vm3, %v531_v33, -1e+15  ;;  %v534_v39 = vmax.f32 %v3136_v62, %v3173_v35  ;;  %v4340_v33 = vmax.f32 %v3127_v28, %v3151_v49  ;;  %v4341_v35 = vmax.f32 %v3133_v10, %v3170_v18 }
 0x158   : > { %v4326_v40 = vmax.f32 %v4324_v24, %v4325_v54  ;;  %v4329_v46 = vmax.f32 %v4327_v48, %v4328_v7  ;;  %vm3514_vm14 = vcmp.ne.s32.totalorder %v4330_v21, 0  ;;  %v553_v24 = vmax.f32 %v3424_v44, %v3470_v17  ;;  %v4345_v28 = vld [vmem:[#allocation21_spill] sm:$0xff] }
 0x159   : > { %v4333_v48 = vunpack.c.2.s8 %v4306_v0  ;;  %v4337_v54 = vunpack.c.0.s8 %v4336_v50  ;;  %v3545_v19 = vsel %vm3304_vm4, %v4340_v33, -1e+15  ;;  %v3552_v62 = vsel %vm3310_vm5, %v4341_v35, -1e+15 }
 0x15a   : > { %v3503_v56 = vsel %vm3266_vm1, %v4326_v40, -1e+15  ;;  %v3510_v27 = vsel %vm3272_vm2, %v4329_v46, -1e+15  ;;  %v454_v0 = vadd.f32 %v2641_v3, %v389_v13  ;;  %v455_v17 = vadd.f32 %v2643_v4, %v389_v13 }
 0x15b   : > { %v880_v40 = vmax.f32 %v3503_v56, %v3510_v27  ;;  %vm3530_vm1 = vcmp.ne.s32.totalorder %v4333_v48, 0  ;;  %vm3536_vm2 = vcmp.ne.s32.totalorder %v4337_v54, 0  ;;  %v4342_v46 = vunpack.c.1.s8 %v4336_v50 }
 0x15c   : > { %v4346_v49 = vunpack.c.0.s8 %v4345_v28  ;;  %v3571_v10 = vsel %vm3326_vm6, %v534_v39, -1e+15  ;;  %v884_v3 = vmax.f32 %v3545_v19, %v3552_v62  ;;  %v456_v4 = vadd.f32 %v2645_v5, %v389_v13 }
 0x15d   : > { %vm3558_vm3 = vcmp.ne.s32.totalorder %v4342_v46, 0  ;;  %v881_v18 = vmax.f32 %v880_v40, %v3522_v2  ;;  %v4349_v43 = vunpack.c.1.s8 %v4345_v28  ;;  %v4350_v48 = vmov 0  ;;  %v4367_v59 = vld [vmem:[#allocation16_spill] sm:$0xff] }
 0x15e   : > { %vm3564_vm4 = vcmp.ne.s32.totalorder %v4346_v49, 0  ;;  %v502_v54 = vmul.f32 0.2, %v454_v0  ;;  %v503_v33 = vmul.f32 0.2, %v455_v17  ;;  %v537_v40 = vmax.f32 %v3051_v34, %v3101_v52 }
 0x15f   : > { %vm3578_vm5 = vcmp.ne.s32.totalorder %v4349_v43, 0  ;;  %v4352_v37 = vmax.f32 %v3037_v45, %v3069_v20  ;;  %v4353_v5 = vunpack.c.2.s8 %v4319_v36  ;;  %v4356_v35 = vunpack.c.2.s8 %v4336_v50  ;;  %882 = vmax.xlane.f32.xlu0 %v881_v18  ;;  %v4359_v20 = vld [vmem:[#allocation32_spill] sm:$0xff]  ;;  %v4372_v18 = vld [vmem:[#allocation47_spill] sm:$0xff] }
 0x160   : > { %v4351_v48 = vsel %vm3578_vm5, 4294967295, %v4350_v48  ;;  %v554_v34 = vmax.f32 %v3427_v25, %v3473_v26  ;;  %v885_v45 = vmax.f32 %v884_v3, %v3571_v10  ;;  %v4360_v63 = vmax.f32 %v3040_v38, %v4359_v20  ;;  %v4379_v20 = vld [vmem:[#allocation48_spill] sm:$0xff] }
 0x161   : > { %v3589_v39 = vsel %vm3351_vm7, %v4352_v37, -1e+15  ;;  %vm3593_vm6 = vcmp.ne.s32.totalorder %v4353_v5, 0  ;;  %vm3599_vm5 = vcmp.ne.s32.totalorder %v4356_v35, 0  ;;  %v540_v36 = vmax.f32 %v3262_v15, %v3315_v14  ;;  %v4377_v5 = vld [vmem:[#allocation46_spill] sm:$0xff] }
 0x162   : > { %v3611_v52 = vsel %vm3368_vm8, %v4360_v63, -1e+15  ;;  %v504_v50 = vmul.f32 0.2, %v456_v4  ;;  %v550_v49 = vmax.f32 %v454_v0, %v502_v54  ;;  %v551_v43 = vmax.f32 %v455_v17, %v503_v33  ;;  %886 = vmax.xlane.f32.xlu1 %v885_v45  ;;  %v4371_v17 = vld [vmem:[#allocation44_spill] sm:$0xff]  ;;  %v4374_v54 = vld [vmem:[#allocation25_spill] sm:$0xff] }
 0x163   : > { %v888_v37 = vmax.f32 %v3589_v39, %v3611_v52  ;;  %v3619_v25 = vsel %vm3404_vm9, %v537_v40, -1e+15  ;;  %v4361_v38 = vmax.f32 %v3249_v1, %v3277_v41  ;;  %v4362_v15 = vmax.f32 %v3252_v9, %v3280_v51  ;;  %v4376_v40 = vld [vmem:[#allocation15_spill] sm:$0xff]  ;;  %v4378_v45 = vld [vmem:[#allocation45_spill] sm:$0xff] }
 0x164   : > { %v543_v26 = vmax.f32 %v3160_v12, %v3204_v53  ;;  %v4363_v1 = vmax.f32 %v3154_v55, %v3198_v61  ;;  %v4364_v9 = vmax.f32 %v3157_v31, %v3201_v58  ;;  %vm4365_vm7 = vnez %v4305_v8  ;;  %v4366_v55 = vld [vmem:[#allocation55_spill] sm:$0xff]  ;;  %v4385_v8 = vld [vmem:[#allocation30_spill] sm:$0xff] }
 0x165   : > { %v3626_v23 = vsel %vm3410_vm10, %v4361_v38, -1e+15  ;;  %v3633_v14 = vsel %vm3416_vm11, %v4362_v15, -1e+15  ;;  %v889_v22 = vmax.f32 %v888_v37, %v3619_v25  ;;  %v3656_v12 = vsel %vm4365_vm7, %v540_v36, -1e+15 }
 0x166   : > { %v892_v0 = vmax.f32 %v3626_v23, %v3633_v14  ;;  %v3645_v41 = vsel %vm3434_vm12, %v4363_v1, -1e+15  ;;  %v3652_v51 = vsel %vm3440_vm13, %v4364_v9, -1e+15  ;;  %v546_v61 = vmax.f32 %v4366_v55, %v3465_v29  ;;  %v1991_v1 = vld [vmem:[#allocation8 + $0x50] sm:$0xff]  }
 0x167   : > { %v896_v53 = vmax.f32 %v3645_v41, %v3652_v51  ;;  %vm4368_vm8 = vnez %v4367_v59  ;;  %890 = vmax.xlane.f32.xlu0 %v889_v22  ;;  %v3669_v16 = vsel %vm3477_vm0, %v543_v26, -1e+15  ;;  %v3673_v42 = vsel %vm3483_vm15, %v545_v47, -1e+15  ;;  %v1993_v9 = vld [vmem:[#allocation8 + $0x90] sm:$0xff]  }
 0x168   : > { %v3664_v6 = vsel %vm4368_vm8, %v544_v32, -1e+15  ;;  %v893_v31 = vmax.f32 %v892_v0, %v3656_v12  ;;  %v4373_v3 = vmax.f32 %v4371_v17, %v4372_v18  ;;  %vm4375_vm9 = vnez %v4374_v54  ;;  %v1990_v0 = vld [vmem:[#allocation8 + $0x88] sm:$0xff]  }
 0x169   : > { %v897_v32 = vmax.f32 %v896_v53, %v3669_v16  ;;  %v900_v33 = vmax.f32 %v3664_v6, %v3673_v42  ;;  %v549_v35 = vmax.f32 %v4377_v5, %v4376_v40  ;;  %v4380_v63 = vmax.f32 %v4378_v45, %v4379_v20  ;;  %v1992_v53 = vld [vmem:[#allocation8 + $0x10] sm:$0xff]   ;;  %v4388_v20 = vld [vmem:[#allocation35_spill] sm:$0xff] }
 0x16a   : > { %v3680_v29 = vsel %vm4375_vm9, %v4373_v3, -1e+15  ;;  %894 = vmax.xlane.f32.xlu1 %v893_v31  ;;  %v3696_v36 = vsel %vm3530_vm1, %v546_v61, -1e+15  ;;  %v552_v38 = vmax.f32 %v456_v4, %v504_v50  ;;  %v3702_v15 = vsel %vm3536_vm2, %v550_v49, -1e+15 }
 0x16b   : > { %v3692_v47 = vsel %vm3514_vm14, %v4380_v63, -1e+15  ;;  %v901_v26 = vmax.f32 %v900_v33, %v3696_v36  ;;  %v3707_v57 = vsel %vm3558_vm3, %v551_v43, -1e+15  ;;  %v3711_v22 = vsel %vm3564_vm4, %v553_v24, -1e+15  ;;  %898 = vmax.xlane.f32.xlu0 %v897_v32 }
 0x16c   : > { %v904_v37 = vmax.f32 %v3680_v29, %v3692_v47  ;;  %v908_v7 = vmax.f32 %v3702_v15, %v3707_v57  ;;  %vm4381_vm10 = vnez %v4351_v48  ;;  %v3721_v44 = vsel %vm3593_vm6, %v549_v35, -1e+15  ;;  %v1985_v49 = vld [vmem:[#allocation8 + $0x40] sm:$0xff]   ;;  %v1988_v43 = vld [vmem:[#allocation8 + $0x48] sm:$0xff]   ;;  %v4383_v61 = vld [vmem:[#allocation22_spill] sm:$0xff] }
 0x16d   : > { %v3717_v4 = vsel %vm4381_vm10, %v554_v34, -1e+15  ;;  %v3725_v21 = vsel %vm3599_vm5, %v552_v38, -1e+15  ;;  %v555_v24 = vmax.f32 %v3430_v30, %v3496_v11  ;;  %v4382_v48 = vunpack.c.2.s8 %v4345_v28  ;;  %v1986_v30 = vld [vmem:[#allocation8] sm:$0xff]   ;;  %1787 = vmatprep.subr.bf16.mxu0 %v1985_v49  ;;  %v1989_v28 = vld [vmem:[#allocation8 + $0x8] sm:$0xff]  }
 0x16e   : > { %902 = vmax.xlane.f32.xlu1 %v901_v26  ;;  %v905_v60 = vmax.f32 %v904_v37, %v3721_v44  ;;  %v909_v50 = vmax.f32 %v908_v7, %v3725_v21  ;;  %v912_v13 = vmax.f32 %v3711_v22, %v3717_v4  ;;  %v1987_v11 = vld [vmem:[#allocation8 + $0x80] sm:$0xff]   ;;  %1788 = vmatpush3.bf16.msra.mxu0 %v1986_v30  ;;  %v4387_v5 = vld [vmem:[#allocation33_spill] sm:$0xff]  ;;  %v4389_v37 = vld [vmem:[#allocation36_spill] sm:$0xff] }
 0x16f   : > { %vm803_vm11 = vcmp.ne.s32.totalorder %v4382_v48, 0  ;;  %1867 = vmatprep.subr.bf16.mxu1 %v1987_v11  ;;  %1789 = vmatprep.subr.bf16.mxu0 %v1988_v43  ;;  %v4384_v31 = vld [vmem:[#allocation27_spill] sm:$0xff]  ;;  %v4390_v26 = vld [vmem:[#allocation37_spill] sm:$0xff]  ;;  %v4392_v43 = vld [vmem:[#allocation38_spill] sm:$0xff] }
 0x170   : > { %906 = vmax.xlane.f32.xlu0 %v905_v60  ;;  %v3735_v34 = vsel %vm803_vm11, %v555_v24, -1e+15  ;;  %1868 = vmatpush3.bf16.msra.mxu1 %v1987_v11  ;;  %v4386_v33 = vld [vmem:[#allocation31_spill] sm:$0xff]  ;;  %v4391_v60 = vld [vmem:[#allocation34_spill] sm:$0xff] }
 0x171   : > { %v913_v46 = vmax.f32 %v912_v13, %v3735_v34  ;;  %1869 = vmatprep.subr.bf16.mxu1 %v1990_v0 }
 0x172   : > { %910 = vmax.xlane.f32.xlu1 %v909_v50  ;;  %1790 = vmatpush3.bf16.msra.mxu0 %v1989_v28 }
 0x173   : > { %1791 = vmatprep.subr.bf16.mxu0 %v1991_v1 }
 0x174   : > { %914 = vmax.xlane.f32.xlu0 %v913_v46  ;;  %1870 = vmatpush3.bf16.msra.mxu1 %v1990_v0 }
 0x175   : > { %1871 = vmatprep.subr.bf16.mxu1 %v1993_v9 }
 0x176   : > { %1792 = vmatpush3.bf16.msra.mxu0 %v1992_v53 }
 0x178   : > { %1872 = vmatpush3.bf16.msra.mxu1 %v1993_v9  ;;  %v4393_v9 = vld [vmem:[#allocation39_spill] sm:$0xff] }
 0x1be   : > { %v855_v55 = vpop.xlane.xlu0 %854 }
 0x1bf   : > { %v916_v59 = vsub.f32 %v4383_v61, %v855_v55  ;;  %v917_v58 = vsub.f32 %v4384_v31, %v855_v55  ;;  %v918_v17 = vsub.f32 %v4385_v8, %v855_v55  ;;  %v4394_v55 = vld [vmem:[#allocation40_spill] sm:$0xff]  ;;  %v4395_v31 = vld [vmem:[#allocation41_spill] sm:$0xff]  ;;  %v4396_v8 = vld [vmem:[#allocation42_spill] sm:$0xff] }
 0x1c1   : > { %v964_v18 = vmul.f32 1.442695, %v916_v59  ;;  %v966_v3 = vmul.f32 1.442695, %v917_v58  ;;  %v968_v54 = vmul.f32 1.442695, %v918_v17 }
 0x1c3   : > { %2009 = vpow2.f32 %v964_v18  ;;  %v4397_v18 = vld [vmem:[#allocation43_spill] sm:$0xff] }
 0x1c4   : > { %2011 = vpow2.f32 %v966_v3 }
 0x1c5   : > { %2013 = vpow2.f32 %v968_v54 }
 0x1c6   : > { %v863_v32 = vpop.xlane.xlu0 %862 }
 0x1c7   : > { %v922_v40 = vsub.f32 %v4386_v33, %v863_v32  ;;  %v923_v35 = vsub.f32 %v4387_v5, %v863_v32  ;;  %v924_v50 = vsub.f32 %v4391_v60, %v863_v32 }
 0x1c8   : > { %v859_v45 = vpop.xlane.xlu1 %858 }
 0x1c9   : > { %v919_v63 = vsub.f32 %v4388_v20, %v859_v45  ;;  %v920_v38 = vsub.f32 %v4389_v37, %v859_v45  ;;  %v921_v7 = vsub.f32 %v4390_v26, %v859_v45  ;;  %v976_v24 = vmul.f32 1.442695, %v922_v40  ;;  %v4398_v26 = vld [vmem:[#allocation49_spill] sm:$0xff] }
 0x1ca   : > { %v978_v48 = vmul.f32 1.442695, %v923_v35  ;;  %v980_v11 = vmul.f32 1.442695, %v924_v50  ;;  %v4399_v50 = vld [vmem:[#allocation50_spill] sm:$0xff] }
 0x1cb   : > { %v970_v13 = vmul.f32 1.442695, %v919_v63  ;;  %v972_v46 = vmul.f32 1.442695, %v920_v38  ;;  %2015 = vpow2.f32 %v976_v24  ;;  %v974_v49 = vmul.f32 1.442695, %v921_v7 }
 0x1cc   : > { %2017 = vpow2.f32 %v978_v48 }
 0x1cd   : > { %2019 = vpow2.f32 %v970_v13  ;;  %v3748_v28 = vpop.eup %2009  ;;  %v4400_v13 = vld [vmem:[#allocation51_spill] sm:$0xff] }
 0x1ce   : > { %2021 = vpow2.f32 %v972_v46  ;;  %v3752_v59 = vpop.eup %2011 }
 0x1cf   : > { %2023 = vpow2.f32 %v974_v49  ;;  %v1060_v32 = vadd.f32 %v3752_v59, %v3748_v28  ;;  %v3759_v33 = vpop.eup %2013 }
 0x1d0   : > { %v867_v30 = vpop.xlane.xlu0 %866  ;;  %2025 = vpow2.f32 %v980_v11 }
 0x1d1   : > { %v925_v0 = vsub.f32 %v4392_v43, %v867_v30  ;;  %v926_v53 = vsub.f32 %v4393_v9, %v867_v30  ;;  %v927_v61 = vsub.f32 %v4394_v55, %v867_v30  ;;  %v1061_v20 = vadd.f32 %v3759_v33, %v1060_v32  ;;  %v4401_v30 = vld [vmem:[#allocation52_spill] sm:$0xff]  ;;  %v4402_v43 = vld [vmem:[#allocation53_spill] sm:$0xff] }
 0x1d2   : > { %v871_v1 = vpop.xlane.xlu1 %870 }
 0x1d3   : > { %v928_v58 = vsub.f32 %v4395_v31, %v871_v1  ;;  %v929_v17 = vsub.f32 %v4396_v8, %v871_v1  ;;  %v930_v3 = vsub.f32 %v4397_v18, %v871_v1  ;;  %v982_v54 = vmul.f32 1.442695, %v925_v0  ;;  %1062 = vadd.xlane.f32.xlu1 %v1061_v20  ;;  %v4403_v1 = vld [vmem:[#allocation54_spill] sm:$0xff] }
 0x1d4   : > { %v984_v45 = vmul.f32 1.442695, %v926_v53  ;;  %v986_v63 = vmul.f32 1.442695, %v927_v61 }
 0x1d5   : > { %v988_v40 = vmul.f32 1.442695, %v928_v58  ;;  %v990_v5 = vmul.f32 1.442695, %v929_v17  ;;  %v992_v35 = vmul.f32 1.442695, %v930_v3  ;;  %2027 = vpow2.f32 %v982_v54  ;;  %v3762_v38 = vpop.eup %2015 }
 0x1d6   : > { %v3765_v24 = vpop.eup %2017 }
 0x1d7   : > { %2029 = vpow2.f32 %v988_v40  ;;  %v3769_v49 = vpop.eup %2019  ;;  %v1068_v3 = vadd.f32 %v3765_v24, %v3762_v38 }
 0x1d8   : > { %2031 = vpow2.f32 %v990_v5  ;;  %v3774_v53 = vpop.eup %2021 }
 0x1d9   : > { %2033 = vpow2.f32 %v992_v35  ;;  %v1064_v8 = vadd.f32 %v3774_v53, %v3769_v49  ;;  %v3778_v17 = vpop.eup %2023 }
 0x1da   : > { %v875_v37 = vpop.xlane.xlu0 %874  ;;  %2035 = vpow2.f32 %v984_v45  ;;  %v3783_v5 = vpop.eup %2025 }
 0x1db   : > { %v931_v7 = vsub.f32 %v4398_v26, %v875_v37  ;;  %v932_v48 = vsub.f32 %v4399_v50, %v875_v37  ;;  %v933_v46 = vsub.f32 %v4400_v13, %v875_v37  ;;  %2037 = vpow2.f32 %v986_v63 }
 0x1dc   : > { %v1065_v40 = vadd.f32 %v3778_v17, %v1064_v8  ;;  %v1069_v26 = vadd.f32 %v3783_v5, %v1068_v3  ;;  %v1995_v3 = vld [vmem:[#allocation8 + $0x18] sm:$0xff]  }
 0x1dd   : > { %v879_v60 = vpop.xlane.xlu1 %878  ;;  %v994_v55 = vmul.f32 1.442695, %v931_v7  ;;  %v996_v18 = vmul.f32 1.442695, %v932_v48  ;;  %v998_v54 = vmul.f32 1.442695, %v933_v46 }
 0x1de   : > { %v934_v11 = vsub.f32 %v4401_v30, %v879_v60  ;;  %v935_v0 = vsub.f32 %v4402_v43, %v879_v60  ;;  %v936_v9 = vsub.f32 %v4403_v1, %v879_v60  ;;  %1066 = vadd.xlane.f32.xlu0 %v1065_v40  ;;  %1070 = vadd.xlane.f32.xlu1 %v1069_v26 }
 0x1df   : > { %2039 = vpow2.f32 %v994_v55  ;;  %v3786_v45 = vpop.eup %2027 }
 0x1e0   : > { %v1000_v61 = vmul.f32 1.442695, %v934_v11  ;;  %v1002_v31 = vmul.f32 1.442695, %v935_v0  ;;  %v1004_v58 = vmul.f32 1.442695, %v936_v9 }
 0x1e1   : > { %v3791_v7 = vpop.eup %2029 }
 0x1e2   : > { %2041 = vpow2.f32 %v1000_v61  ;;  %v3796_v48 = vpop.eup %2031 }
 0x1e3   : > { %2043 = vpow2.f32 %v1002_v31  ;;  %v1076_v43 = vadd.f32 %v3796_v48, %v3791_v7 }
 0x1e4   : > { %2045 = vpow2.f32 %v1004_v58 }
 0x1e5   : > { %2047 = vpow2.f32 %v996_v18  ;;  %v1994_v18 = vld [vmem:[#allocation8 + $0x58] sm:$0xff]  }
 0x1e6   : > { %2049 = vpow2.f32 %v998_v54  ;;  %v1996_v54 = vld [vmem:[#allocation8 + $0x98] sm:$0xff]   ;;  %1793 = vmatprep.subr.bf16.mxu0 %v1994_v18 }
 0x1e7   : > { %1873 = vmatprep.subr.bf16.mxu1 %v1996_v54  ;;  %1794 = vmatpush3.bf16.msra.mxu0 %v1995_v3 }
 0x1e8   : > { %1874 = vmatpush3.bf16.msra.mxu1 %v1996_v54 }
 0x1ec   : > { %v883_v32 = vpop.xlane.xlu0 %882 }
 0x1ed   : > { %v937_v35 = vsub.f32 %v3503_v56, %v883_v32  ;;  %v938_v63 = vsub.f32 %v3510_v27, %v883_v32  ;;  %v939_v37 = vsub.f32 %v3522_v2, %v883_v32  ;;  %v3798_v27 = vpop.eup %2033 }
 0x1ee   : > { %v3802_v0 = vpop.eup %2035  ;;  %v1077_v61 = vadd.f32 %v3798_v27, %v1076_v43 }
 0x1ef   : > { %v887_v20 = vpop.xlane.xlu1 %886  ;;  %v1006_v13 = vmul.f32 1.442695, %v937_v35  ;;  %v1072_v26 = vadd.f32 %v3802_v0, %v3786_v45 }
 0x1f0   : > { %v940_v60 = vsub.f32 %v3545_v19, %v887_v20  ;;  %v941_v50 = vsub.f32 %v3552_v62, %v887_v20  ;;  %v942_v56 = vsub.f32 %v3571_v10, %v887_v20  ;;  %v1008_v19 = vmul.f32 1.442695, %v938_v63  ;;  %v3804_v10 = vpop.eup %2037  ;;  %1078 = vadd.xlane.f32.xlu1 %v1077_v61 }
 0x1f1   : > { %2051 = vpow2.f32 %v1006_v13  ;;  %v1010_v62 = vmul.f32 1.442695, %v939_v37  ;;  %v3812_v32 = vpop.eup %2039 }
 0x1f2   : > { %v1012_v2 = vmul.f32 1.442695, %v940_v60  ;;  %v1014_v46 = vmul.f32 1.442695, %v941_v50  ;;  %v1016_v30 = vmul.f32 1.442695, %v942_v56 }
 0x1f4   : > { %v891_v11 = vpop.xlane.xlu0 %890  ;;  %2053 = vpow2.f32 %v1012_v2 }
 0x1f5   : > { %v943_v9 = vsub.f32 %v3589_v39, %v891_v11  ;;  %v944_v55 = vsub.f32 %v3611_v52, %v891_v11  ;;  %2055 = vpow2.f32 %v1014_v46  ;;  %v945_v40 = vsub.f32 %v3619_v25, %v891_v11  ;;  %v3815_v52 = vpop.eup %2041 }
 0x1f6   : > { %2057 = vpow2.f32 %v1016_v30 }
 0x1f7   : > { %v895_v1 = vpop.xlane.xlu1 %894  ;;  %2059 = vpow2.f32 %v1008_v19  ;;  %v1020_v63 = vmul.f32 1.442695, %v944_v55  ;;  %v1022_v2 = vmul.f32 1.442695, %v945_v40 }
 0x1f8   : > { %v946_v31 = vsub.f32 %v3626_v23, %v895_v1  ;;  %v947_v58 = vsub.f32 %v3633_v14, %v895_v1  ;;  %v948_v8 = vsub.f32 %v3656_v12, %v895_v1  ;;  %v899_v39 = vpop.xlane.xlu0 %898  ;;  %v3817_v14 = vpop.eup %2043  ;;  %2061 = vpow2.f32 %v1010_v62 }
 0x1f9   : > { %v1018_v12 = vmul.f32 1.442695, %v943_v9  ;;  %v3821_v25 = vpop.eup %2045  ;;  %v949_v46 = vsub.f32 %v3645_v41, %v899_v39  ;;  %v950_v30 = vsub.f32 %v3652_v51, %v899_v39 }
 0x1fa   : > { %v1024_v35 = vmul.f32 1.442695, %v946_v31  ;;  %v1026_v20 = vmul.f32 1.442695, %v947_v58  ;;  %v1028_v23 = vmul.f32 1.442695, %v948_v8  ;;  %v3826_v13 = vpop.eup %2047 }
 0x1fb   : > { %v903_v37 = vpop.xlane.xlu1 %902  ;;  %v3832_v43 = vpop.eup %2049  ;;  %v1030_v61 = vmul.f32 1.442695, %v949_v46  ;;  %v1032_v31 = vmul.f32 1.442695, %v950_v30  ;;  %v1080_v54 = vadd.f32 %v3826_v13, %v3812_v32 }
 0x1fc   : > { %2063 = vpow2.f32 %v1024_v35  ;;  %v952_v60 = vsub.f32 %v3664_v6, %v903_v37  ;;  %v953_v50 = vsub.f32 %v3673_v42, %v903_v37  ;;  %v954_v56 = vsub.f32 %v3696_v36, %v903_v37  ;;  %v3836_v1 = vpop.eup %2051  ;;  %v1998_v35 = vld [vmem:[#allocation8 + $0x20] sm:$0xff]  }
 0x1fd   : > { %2065 = vpow2.f32 %v1026_v20  ;;  %v3830_v11 = vpop.xlane.xlu0 %906  ;;  %v951_v6 = vsub.f32 %v3669_v16, %v899_v39  ;;  %v1073_v36 = vadd.f32 %v3804_v10, %v1072_v26  ;;  %v1997_v39 = vld [vmem:[#allocation8 + $0x60] sm:$0xff]   ;;  %v1081_v37 = vadd.f32 %v3832_v43, %v1080_v54 }
 0x1fe   : > { %2067 = vpow2.f32 %v1028_v23  ;;  %v1036_v19 = vmul.f32 1.442695, %v952_v60  ;;  %v1038_v42 = vmul.f32 1.442695, %v953_v50  ;;  %v1040_v9 = vmul.f32 1.442695, %v954_v56  ;;  %v3840_v55 = vpop.eup %2053  ;;  %1795 = vmatprep.subr.bf16.mxu0 %v1997_v39 }
 0x1ff   : > { %2069 = vpow2.f32 %v1018_v12  ;;  %v911_v62 = vpop.xlane.xlu1 %910  ;;  %1074 = vadd.xlane.f32.xlu0 %v1073_v36  ;;  %v3842_v16 = vpop.eup %2055  ;;  %v1034_v58 = vmul.f32 1.442695, %v951_v6  ;;  %v955_v18 = vsub.f32 %v3680_v29, %v3830_v11  ;;  %v1999_v20 = vld [vmem:[#allocation8 + $0xa0] sm:$0xff]   ;;  %v957_v12 = vsub.f32 %v3721_v44, %v3830_v11  ;;  %1796 = vmatpush3.bf16.msra.mxu0 %v1998_v35  ;;  %v2000_v39 = vld [vmem:[#allocation8 + $0x68] sm:$0xff]  }
 0x200   : > { %2071 = vpow2.f32 %v1020_v63  ;;  %v958_v41 = vsub.f32 %v3702_v15, %v911_v62  ;;  %v959_v51 = vsub.f32 %v3707_v57, %v911_v62  ;;  %v960_v8 = vsub.f32 %v3725_v21, %v911_v62  ;;  %v3847_v3 = vpop.eup %2057  ;;  %1875 = vmatprep.subr.bf16.mxu1 %v1999_v20  ;;  %v2001_v35 = vld [vmem:[#allocation8 + $0x28] sm:$0xff]   ;;  %1797 = vmatprep.subr.bf16.mxu0 %v2000_v39 }
 0x201   : > { %2073 = vpow2.f32 %v1022_v2  ;;  %v956_v15 = vsub.f32 %v3692_v47, %v3830_v11  ;;  %v1084_v57 = vadd.f32 %v3817_v14, %v3815_v52  ;;  %v915_v40 = vpop.xlane.xlu0 %914  ;;  %v3855_v21 = vpop.eup %2059  ;;  %v1092_v26 = vadd.f32 %v3842_v16, %v3840_v55  ;;  %1876 = vmatpush3.bf16.msra.mxu1 %v1999_v20  ;;  %v2002_v20 = vld [vmem:[#allocation8 + $0xa8] sm:$0xff]  }
 0x202   : > { %2075 = vpow2.f32 %v1036_v19  ;;  %v1048_v29 = vmul.f32 1.442695, %v958_v41  ;;  %v1050_v23 = vmul.f32 1.442695, %v959_v51  ;;  %v3859_v63 = vpop.eup %2061  ;;  %v1052_v50 = vmul.f32 1.442695, %v960_v8  ;;  %1877 = vmatprep.subr.bf16.mxu1 %v2002_v20 }
 0x203   : > { %2077 = vpow2.f32 %v1038_v42  ;;  %v1085_v47 = vadd.f32 %v3821_v25, %v1084_v57  ;;  %v1042_v56 = vmul.f32 1.442695, %v955_v18  ;;  %v961_v2 = vsub.f32 %v3711_v22, %v915_v40  ;;  %1082 = vadd.xlane.f32.xlu0 %v1081_v37  ;;  %1798 = vmatpush3.bf16.msra.mxu0 %v2001_v35 }
 0x204   : > { %2079 = vpow2.f32 %v1040_v9  ;;  %v962_v46 = vsub.f32 %v3717_v4, %v915_v40  ;;  %v1093_v30 = vadd.f32 %v3847_v3, %v1092_v26  ;;  %v1088_v11 = vadd.f32 %v3855_v21, %v3836_v1 }
 0x205   : > { %2081 = vpow2.f32 %v1030_v61  ;;  %1086 = vadd.xlane.f32.xlu1 %v1085_v47  ;;  %v1044_v6 = vmul.f32 1.442695, %v956_v15  ;;  %v1046_v62 = vmul.f32 1.442695, %v957_v12  ;;  %v963_v36 = vsub.f32 %v3735_v34, %v915_v40  ;;  %1878 = vmatpush3.bf16.msra.mxu1 %v2002_v20 }
 0x206   : > { %v3865_v60 = vpop.eup %2063  ;;  %2083 = vpow2.f32 %v1032_v31  ;;  %v1089_v4 = vadd.f32 %v3859_v63, %v1088_v11  ;;  %v1054_v41 = vmul.f32 1.442695, %v961_v2  ;;  %v1056_v61 = vmul.f32 1.442695, %v962_v46 }
 0x207   : > { %v3868_v44 = vpop.eup %2065  ;;  %2085 = vpow2.f32 %v1034_v58  ;;  %v1058_v18 = vmul.f32 1.442695, %v963_v36 }
 0x208   : > { %v3874_v19 = vpop.eup %2067  ;;  %2087 = vpow2.f32 %v1048_v29  ;;  %v1100_v22 = vadd.f32 %v3868_v44, %v3865_v60  ;;  %1090 = vadd.xlane.f32.xlu0 %v1089_v4 }
 0x209   : > { %v3878_v42 = vpop.eup %2069  ;;  %2089 = vpow2.f32 %v1050_v23  ;;  %1094 = vadd.xlane.f32.xlu1 %v1093_v30 }
 0x20a   : > { %v3882_v9 = vpop.eup %2071  ;;  %2091 = vpow2.f32 %v1052_v50  ;;  %v1101_v31 = vadd.f32 %v3874_v19, %v1100_v22  ;;  %v2004_v22 = vld [vmem:[#allocation8 + $0x30] sm:$0xff]  }
 0x20b   : > { %v3884_v51 = vpop.eup %2073  ;;  %2093 = vpow2.f32 %v1042_v56  ;;  %v1096_v58 = vadd.f32 %v3882_v9, %v3878_v42 }
 0x20c   : > { %v3889_v8 = vpop.eup %2075  ;;  %2095 = vpow2.f32 %v1044_v6  ;;  %v2003_v6 = vld [vmem:[#allocation8 + $0x70] sm:$0xff]  }
 0x20d   : > { %v3891_v34 = vpop.eup %2077  ;;  %2097 = vpow2.f32 %v1046_v62  ;;  %v1097_v15 = vadd.f32 %v3884_v51, %v1096_v58  ;;  %1102 = vadd.xlane.f32.xlu1 %v1101_v31  ;;  %v2005_v62 = vld [vmem:[#allocation8 + $0xb0] sm:$0xff]   ;;  %1799 = vmatprep.subr.bf16.mxu0 %v2003_v6 }
 0x20e   : > { %v3894_v57 = vpop.eup %2079  ;;  %2099 = vpow2.f32 %v1054_v41  ;;  %v1108_v54 = vadd.f32 %v3891_v34, %v3889_v8  ;;  %1800 = vmatpush3.bf16.msra.mxu0 %v2004_v22  ;;  %1879 = vmatprep.subr.bf16.mxu1 %v2005_v62 }
 0x20f   : > { %v3898_v40 = vpop.eup %2081  ;;  %2101 = vpow2.f32 %v1056_v61  ;;  %1098 = vadd.xlane.f32.xlu0 %v1097_v15  ;;  %1880 = vmatpush3.bf16.msra.mxu1 %v2005_v62  ;;  %v2007_v15 = vld [vmem:[#allocation8 + $0x38] sm:$0xff]  }
 0x210   : > { %v3900_v29 = vpop.eup %2083  ;;  %v1109_v23 = vadd.f32 %v3894_v57, %v1108_v54  ;;  %2103 = vpow2.f32 %v1058_v18  ;;  %v2006_v18 = vld [vmem:[#allocation8 + $0x78] sm:$0xff]  }
 0x211   : > { %v3903_v12 = vpop.eup %2085  ;;  %v1104_v47 = vadd.f32 %v3900_v29, %v3898_v40  ;;  %v2008_v54 = vld [vmem:[#allocation8 + $0xb8] sm:$0xff]   ;;  %1801 = vmatprep.subr.bf16.mxu0 %v2006_v18 }
 0x212   : > { %v3907_v37 = vpop.eup %2087  ;;  %1110 = vadd.xlane.f32.xlu1 %v1109_v23  ;;  %1881 = vmatprep.subr.bf16.mxu1 %v2008_v54 }
 0x213   : > { %v3909_v26 = vpop.eup %2089  ;;  %v1105_v50 = vadd.f32 %v3903_v12, %v1104_v47  ;;  %1802 = vmatpush3.bf16.msra.mxu0 %v2007_v15  ;;  %1882 = vmatpush3.bf16.msra.mxu1 %v2008_v54 }
 0x214   : > { %v3912_v56 = vpop.eup %2091  ;;  %v1116_v2 = vadd.f32 %v3909_v26, %v3907_v37 }
 0x215   : > { %v3916_v46 = vpop.eup %2093  ;;  %1106 = vadd.xlane.f32.xlu0 %v1105_v50 }
 0x216   : > { %v3918_v30 = vpop.eup %2095  ;;  %v1117_v11 = vadd.f32 %v3912_v56, %v1116_v2 }
 0x217   : > { %v3921_v36 = vpop.eup %2097  ;;  %v1112_v4 = vadd.f32 %v3918_v30, %v3916_v46 }
 0x218   : > { %v3925_v41 = vpop.eup %2099  ;;  %1118 = vadd.xlane.f32.xlu1 %v1117_v11 }
 0x219   : > { %v3927_v61 = vpop.eup %2101  ;;  %v1113_v31 = vadd.f32 %v3921_v36, %v1112_v4 }
 0x21a   : > { %v1120_v58 = vadd.f32 %v3927_v61, %v3925_v41  ;;  %v3932_v39 = vpop.eup %2103 }
 0x21b   : > { %1114 = vadd.xlane.f32.xlu0 %v1113_v31 }
 0x21c   : > { %v1121_v35 = vadd.f32 %v3932_v39, %v1120_v58 }
 0x21f   : > { %1122 = vadd.xlane.f32.xlu0 %v1121_v35 }
 0x260   : > { %v1063_v20 = vpop.xlane.xlu1 %1062 }
 0x261   : > { %2105 = vrcp.f32 %v1063_v20 }
 0x26b   : > { %v1067_v23 = vpop.xlane.xlu0 %1066  ;;  %v2106_v47 = vpop.eup %2105 }
 0x26c   : > { %2107 = vrcp.f32 %v1067_v23  ;;  %v1071_v50 = vpop.xlane.xlu1 %1070  ;;  %v1141_v11 = vmul.f32 %v2106_v47, %v3752_v59  ;;  %v1142_v6 = vmul.f32 %v2106_v47, %v3759_v33  ;;  %v1140_v4 = vmul.f32 %v2106_v47, %v3748_v28 }
 0x26d   : > { %2109 = vrcp.f32 %v1071_v50 }
 0x276   : > { %v2108_v2 = vpop.eup %2107 }
 0x277   : > { %v1144_v22 = vmul.f32 %v2108_v2, %v3774_v53  ;;  %v1145_v62 = vmul.f32 %v2108_v2, %v3778_v17  ;;  %v1143_v31 = vmul.f32 %v2108_v2, %v3769_v49  ;;  %v2110_v53 = vpop.eup %2109 }
 0x278   : > { %v1147_v49 = vmul.f32 %v2110_v53, %v3765_v24  ;;  %v1148_v23 = vmul.f32 %v2110_v53, %v3783_v5 }
 0x279   : > { %v1189_v58 = vpack.c.bf16 %v1144_v22, %v1141_v11  ;;  %v1190_v18 = vpack.c.bf16 %v1145_v62, %v1142_v6  ;;  %v1188_v15 = vpack.c.bf16 %v1143_v31, %v1140_v4  ;;  %v1146_v11 = vmul.f32 %v2110_v53, %v3762_v38 }
 0x27b   : > { %1436 = vmatprep.mubr.bf16.mxu0 %v1189_v58  ;;  %1883 = vmatprep.mubr.bf16.mxu1 %v1190_v18 }
 0x27c   : > { %1437 = vmatmul.mubr.bf16.vlgmr.msra.gmra.mrb[0].mxu0 %v1188_v15 }
 0x27d   : > { %v1079_v54 = vpop.xlane.xlu1 %1078 }
 0x28c   : > { %v1075_v35 = vpop.xlane.xlu0 %1074 }
 0x28d   : > { %2111 = vrcp.f32 %v1075_v35 }
 0x28e   : > { %2113 = vrcp.f32 %v1079_v54 }
 0x290   : > { %v1083_v33 = vpop.xlane.xlu0 %1082 }
 0x291   : > { %2115 = vrcp.f32 %v1083_v33 }
 0x292   : > { %v1087_v59 = vpop.xlane.xlu1 %1086 }
 0x293   : > { %2117 = vrcp.f32 %v1087_v59 }
 0x295   : > { %v1091_v28 = vpop.xlane.xlu0 %1090 }
 0x296   : > { %v1095_v17 = vpop.xlane.xlu1 %1094  ;;  %2119 = vrcp.f32 %v1091_v28 }
 0x297   : > { %v2112_v20 = vpop.eup %2111  ;;  %2121 = vrcp.f32 %v1095_v17 }
 0x298   : > { %v1150_v47 = vmul.f32 %v2112_v20, %v3802_v0  ;;  %v1151_v50 = vmul.f32 %v2112_v20, %v3804_v10  ;;  %v1149_v2 = vmul.f32 %v2112_v20, %v3786_v45  ;;  %v2114_v31 = vpop.eup %2113 }
 0x299   : > { %v1154_v5 = vmul.f32 %v2114_v31, %v3798_v27  ;;  %v1153_v0 = vmul.f32 %v2114_v31, %v3796_v48  ;;  %v1152_v33 = vmul.f32 %v2114_v31, %v3791_v7 }
 0x29a   : > { %v1103_v6 = vpop.xlane.xlu1 %1102  ;;  %v1192_v62 = vpack.c.bf16 %v1150_v47, %v1147_v49  ;;  %v1193_v4 = vpack.c.bf16 %v1151_v50, %v1148_v23  ;;  %v1191_v58 = vpack.c.bf16 %v1149_v2, %v1146_v11 }
 0x29b   : > { %v2116_v24 = vpop.eup %2115 }
 0x29c   : > { %v1099_v22 = vpop.xlane.xlu0 %1098  ;;  %1444 = vmatprep.mubr.bf16.mxu0 %v1192_v62  ;;  %1884 = vmatmul.mubr.bf16.vlgmr.msra.gmra.mrb[0].mxu1 %v1193_v4  ;;  %v1157_v38 = vmul.f32 %v2116_v24, %v3832_v43  ;;  %v1156_v45 = vmul.f32 %v2116_v24, %v3826_v13  ;;  %v1155_v18 = vmul.f32 %v2116_v24, %v3812_v32 }
 0x29d   : > { %2123 = vrcp.f32 %v1099_v22  ;;  %1445 = vmatmul.mubr.bf16.gmra.mrb[4].mxu0 %v1191_v58  ;;  %v2118_v10 = vpop.eup %2117 }
 0x29e   : > { %2125 = vrcp.f32 %v1103_v6  ;;  %v1196_v35 = vpack.c.bf16 %v1157_v38, %v1154_v5  ;;  %v1195_v59 = vpack.c.bf16 %v1156_v45, %v1153_v0  ;;  %v1160_v27 = vmul.f32 %v2118_v10, %v3821_v25 }
 0x29f   : > { %v1111_v15 = vpop.xlane.xlu1 %1110  ;;  %v1159_v48 = vmul.f32 %v2118_v10, %v3817_v14  ;;  %v1194_v17 = vpack.c.bf16 %v1155_v18, %v1152_v33  ;;  %v1158_v2 = vmul.f32 %v2118_v10, %v3815_v52 }
 0x2a0   : > { %v2120_v53 = vpop.eup %2119  ;;  %1887 = vmatprep.mubr.bf16.mxu1 %v1196_v35  ;;  %1452 = vmatprep.mubr.bf16.mxu0 %v1195_v59 }
 0x2a1   : > { %v1163_v43 = vmul.f32 %v2120_v53, %v3859_v63  ;;  %v1162_v13 = vmul.f32 %v2120_v53, %v3855_v21  ;;  %v2122_v32 = vpop.eup %2121  ;;  %v1161_v63 = vmul.f32 %v2120_v53, %v3836_v1 }
 0x2a2   : > { %v1107_v54 = vpop.xlane.xlu0 %1106  ;;  %v1166_v25 = vmul.f32 %v2122_v32, %v3847_v3  ;;  %v1165_v6 = vmul.f32 %v2122_v32, %v3842_v16  ;;  %v1164_v16 = vmul.f32 %v2122_v32, %v3840_v55 }
 0x2a3   : > { %2127 = vrcp.f32 %v1107_v54  ;;  %v1199_v28 = vpack.c.bf16 %v1163_v43, %v1160_v27  ;;  %v1198_v20 = vpack.c.bf16 %v1162_v13, %v1159_v48  ;;  %v1197_v62 = vpack.c.bf16 %v1161_v63, %v1158_v2 }
 0x2a4   : > { %2129 = vrcp.f32 %v1111_v15 }
 0x2a5   : > { %1453 = vmatmul.mubr.bf16.gmra.mrb[8].mxu0 %v1194_v17  ;;  %v1119_v23 = vpop.xlane.xlu1 %1118  ;;  %1888 = vmatmul.mubr.bf16.gmra.mrb[4].mxu1 %v1199_v28 }
 0x2a6   : > { %1460 = vmatprep.mubr.bf16.mxu0 %v1198_v20 }
 0x2a7   : > { %v2124_v49 = vpop.eup %2123 }
 0x2a8   : > { %v1115_v7 = vpop.xlane.xlu0 %1114  ;;  %v1169_v14 = vmul.f32 %v2124_v49, %v3884_v51  ;;  %v1168_v47 = vmul.f32 %v2124_v49, %v3882_v9  ;;  %v2126_v21 = vpop.eup %2125  ;;  %v1167_v31 = vmul.f32 %v2124_v49, %v3878_v42 }
 0x2a9   : > { %2131 = vrcp.f32 %v1115_v7  ;;  %v1172_v3 = vmul.f32 %v2126_v21, %v3874_v19  ;;  %v1171_v19 = vmul.f32 %v2126_v21, %v3868_v44 }
 0x2aa   : > { %2133 = vrcp.f32 %v1119_v23  ;;  %v1202_v50 = vpack.c.bf16 %v1169_v14, %v1166_v25  ;;  %v1201_v4 = vpack.c.bf16 %v1168_v47, %v1165_v6  ;;  %v1200_v0 = vpack.c.bf16 %v1167_v31, %v1164_v16 }
 0x2ac   : > { %v1123_v11 = vpop.xlane.xlu0 %1122  ;;  %1891 = vmatprep.mubr.bf16.mxu1 %v1202_v50 }
 0x2ad   : > { %v2128_v22 = vpop.eup %2127  ;;  %2135 = vrcp.f32 %v1123_v11  ;;  %1461 = vmatmul.mubr.bf16.gmra.mrb[12].mxu0 %v1197_v62 }
 0x2ae   : > { %v1175_v51 = vmul.f32 %v2128_v22, %v3903_v12  ;;  %1468 = vmatprep.mubr.bf16.mxu0 %v1201_v4  ;;  %v2130_v9 = vpop.eup %2129  ;;  %v1174_v52 = vmul.f32 %v2128_v22, %v3900_v29  ;;  %v1173_v55 = vmul.f32 %v2128_v22, %v3898_v40 }
 0x2af   : > { %v1178_v24 = vmul.f32 %v2130_v9, %v3894_v57  ;;  %v1177_v44 = vmul.f32 %v2130_v9, %v3891_v34 }
 0x2b0   : > { %v1205_v1 = vpack.c.bf16 %v1175_v51, %v1172_v3  ;;  %v1204_v38 = vpack.c.bf16 %v1174_v52, %v1171_v19 }
 0x2b2   : > { %1892 = vmatmul.mubr.bf16.gmra.mrb[8].mxu1 %v1205_v1 }
 0x2b3   : > { %v2132_v58 = vpop.eup %2131 }
 0x2b4   : > { %v1181_v5 = vmul.f32 %v2132_v58, %v3921_v36  ;;  %v2134_v12 = vpop.eup %2133  ;;  %v1180_v57 = vmul.f32 %v2132_v58, %v3918_v30  ;;  %v1170_v36 = vmul.f32 %v2126_v21, %v3865_v60  ;;  %v1179_v35 = vmul.f32 %v2132_v58, %v3916_v46 }
 0x2b5   : > { %1469 = vmatmul.mubr.bf16.gmra.mrb[16].mxu0 %v1200_v0  ;;  %v1184_v42 = vmul.f32 %v2134_v12, %v3912_v56  ;;  %v1183_v40 = vmul.f32 %v2134_v12, %v3909_v26  ;;  %v1182_v34 = vmul.f32 %v2134_v12, %v3907_v37 }
 0x2b6   : > { %v1208_v10 = vpack.c.bf16 %v1181_v5, %v1178_v24  ;;  %1476 = vmatprep.mubr.bf16.mxu0 %v1204_v38  ;;  %v1203_v15 = vpack.c.bf16 %v1173_v55, %v1170_v36  ;;  %v1207_v54 = vpack.c.bf16 %v1180_v57, %v1177_v44 }
 0x2b7   : > { %v2136_v45 = vpop.eup %2135 }
 0x2b8   : > { %1895 = vmatprep.mubr.bf16.mxu1 %v1208_v10  ;;  %v1187_v29 = vmul.f32 %v2136_v45, %v3932_v39  ;;  %v1186_v56 = vmul.f32 %v2136_v45, %v3927_v61  ;;  %v1176_v39 = vmul.f32 %v2130_v9, %v3889_v8  ;;  %v1185_v60 = vmul.f32 %v2136_v45, %v3925_v41 }
 0x2ba   : > { %v1211_v18 = vpack.c.bf16 %v1187_v29, %v1184_v42  ;;  %v1206_v59 = vpack.c.bf16 %v1179_v35, %v1176_v39  ;;  %v1210_v33 = vpack.c.bf16 %v1186_v56, %v1183_v40  ;;  %v1209_v30 = vpack.c.bf16 %v1185_v60, %v1182_v34 }
 0x2bc   : > { %1896 = vmatmul.mubr.bf16.gmra.mrb[12].mxu1 %v1211_v18 }
 0x2bd   : > { %1477 = vmatmul.mubr.bf16.gmra.mrb[20].mxu0 %v1203_v15 }
 0x2be   : > { %1484 = vmatprep.mubr.bf16.mxu0 %v1207_v54 }
 0x2c5   : > { %1485 = vmatmul.mubr.bf16.gmra.mrb[24].mxu0 %v1206_v59 }
 0x2c6   : > { %1492 = vmatprep.mubr.bf16.mxu0 %v1210_v33 }
 0x2cd   : > { %1493 = vmatmul.mubr.bf16.gmra.mrb[28].mxu0 %v1209_v30 }
 0x34f   : > { %v1803_v53 = vpop.f32.mrb[0].mxu0 }
 0x350   : > { %v1804_v27 = vpop.f32.mrb[1].mxu0 }
 0x351   : > { %v1805_v46 = vadd.f32 %v1804_v27, %v1803_v53  ;;  %v1806_v48 = vpop.f32.mrb[2].mxu0 }
 0x352   : > { %v1807_v61 = vpop.f32.mrb[3].mxu0 }
 0x353   : > { %v1808_v43 = vadd.f32 %v1807_v61, %v1806_v48 }
 0x36f   : > { %v1885_v8 = vpop.f32.mrb[0].mxu1 }
 0x370   : > { %v1535_v17 = vpop.f32.mrb[1].mxu1  ;;  %v1809_v26 = vpop.f32.mrb[4].mxu0 }
 0x371   : > { %v1536_v13 = vadd.f32 %v1805_v46, %v1535_v17  ;;  %v1886_v32 = vpop.f32.mrb[2].mxu1  ;;  %v1810_v28 = vpop.f32.mrb[5].mxu0 }
 0x372   : > { %v1538_v20 = vpop.f32.mrb[3].mxu1  ;;  %v1811_v49 = vadd.f32 %v1810_v28, %v1809_v26  ;;  %v1812_v41 = vpop.f32.mrb[6].mxu0 }
 0x373   : > { %1598 = vst [vmem:[%s3985_s26] sm:$0xff] %v1536_v13  ;;  %v1539_v37 = vadd.f32 %v1808_v43, %v1538_v20  ;;  %v1813_v23 = vpop.f32.mrb[7].mxu0 }
 0x374   : > { %v1544_v7 = vadd.f32 %v1885_v8, %v1811_v49  ;;  %v1814_v25 = vadd.f32 %v1813_v23, %v1812_v41 }
 0x375   : > { %1599 = vst [vmem:[%s3985_s26 + $0x8] sm:$0xff] %v1539_v37 }
 0x376   : > { %1600 = vst [vmem:[%s3985_s26 + $0x10] sm:$0xff] %v1544_v7  ;;  %v1547_v14 = vadd.f32 %v1886_v32, %v1814_v25 }
 0x378   : > { %1601 = vst [vmem:[%s3985_s26 + $0x18] sm:$0xff] %v1547_v14  ;;  %v1815_v63 = vpop.f32.mrb[8].mxu0  ;;  %v1889_v21 = vpop.f32.mrb[4].mxu1 }
 0x379   : > { %v1816_v47 = vpop.f32.mrb[9].mxu0  ;;  %v1551_v11 = vpop.f32.mrb[5].mxu1 }
 0x37a   : > { %v1817_v50 = vadd.f32 %v1816_v47, %v1815_v63  ;;  %v1818_v2 = vpop.f32.mrb[10].mxu0  ;;  %v1890_v22 = vpop.f32.mrb[6].mxu1 }
 0x37b   : > { %v1819_v6 = vpop.f32.mrb[11].mxu0  ;;  %v1554_v51 = vpop.f32.mrb[7].mxu1 }
 0x37c   : > { %v1552_v62 = vadd.f32 %v1817_v50, %v1551_v11  ;;  %v1820_v3 = vadd.f32 %v1819_v6, %v1818_v2 }
 0x37e   : > { %1602 = vst [vmem:[%s3985_s26 + $0x20] sm:$0xff] %v1552_v62  ;;  %v1555_v4 = vadd.f32 %v1820_v3, %v1554_v51 }
 0x380   : > { %1603 = vst [vmem:[%s3985_s26 + $0x28] sm:$0xff] %v1555_v4  ;;  %v1821_v1 = vpop.f32.mrb[12].mxu0 }
 0x381   : > { %v1822_v9 = vpop.f32.mrb[13].mxu0 }
 0x382   : > { %v1823_v31 = vadd.f32 %v1822_v9, %v1821_v1  ;;  %v1824_v52 = vpop.f32.mrb[14].mxu0 }
 0x383   : > { %v1825_v16 = vpop.f32.mrb[15].mxu0 }
 0x384   : > { %v1560_v5 = vadd.f32 %v1889_v21, %v1823_v31  ;;  %v1826_v19 = vadd.f32 %v1825_v16, %v1824_v52 }
 0x385   : > { %v1893_v58 = vpop.f32.mrb[8].mxu1 }
 0x386   : > { %v1567_v24 = vpop.f32.mrb[9].mxu1  ;;  %1604 = vst [vmem:[%s3985_s26 + $0x30] sm:$0xff] %v1560_v5  ;;  %v1563_v10 = vadd.f32 %v1890_v22, %v1826_v19 }
 0x387   : > { %v1894_v12 = vpop.f32.mrb[10].mxu1 }
 0x388   : > { %v1570_v0 = vpop.f32.mrb[11].mxu1  ;;  %1605 = vst [vmem:[%s3985_s26 + $0x38] sm:$0xff] %v1563_v10  ;;  %v1827_v38 = vpop.f32.mrb[16].mxu0 }
 0x389   : > { %v1828_v45 = vpop.f32.mrb[17].mxu0 }
 0x38a   : > { %v1829_v42 = vadd.f32 %v1828_v45, %v1827_v38  ;;  %v1830_v29 = vpop.f32.mrb[18].mxu0 }
 0x38b   : > { %v1831_v55 = vpop.f32.mrb[19].mxu0 }
 0x38c   : > { %v1568_v18 = vadd.f32 %v1829_v42, %v1567_v24  ;;  %v1832_v57 = vadd.f32 %v1831_v55, %v1830_v29 }
 0x38e   : > { %1606 = vst [vmem:[%s3985_s26 + $0x40] sm:$0xff] %v1568_v18  ;;  %v1571_v15 = vadd.f32 %v1832_v57, %v1570_v0 }
 0x38f   : > { %v1897_v36 = vpop.f32.mrb[12].mxu1 }
 0x390   : > { %v1583_v44 = vpop.f32.mrb[13].mxu1  ;;  %1607 = vst [vmem:[%s3985_s26 + $0x48] sm:$0xff] %v1571_v15  ;;  %v1833_v56 = vpop.f32.mrb[20].mxu0 }
 0x391   : > { %v1898_v54 = vpop.f32.mrb[14].mxu1  ;;  %v1834_v39 = vpop.f32.mrb[21].mxu0 }
 0x392   : > { %v1586_v35 = vpop.f32.mrb[15].mxu1  ;;  %v1835_v40 = vadd.f32 %v1834_v39, %v1833_v56  ;;  %v1836_v59 = vpop.f32.mrb[22].mxu0 }
 0x393   : > { %v1837_v33 = vpop.f32.mrb[23].mxu0 }
 0x394   : > { %v1576_v60 = vadd.f32 %v1893_v58, %v1835_v40  ;;  %v1838_v34 = vadd.f32 %v1837_v33, %v1836_v59 }
 0x396   : > { %1608 = vst [vmem:[%s3985_s26 + $0x50] sm:$0xff] %v1576_v60  ;;  %v1579_v30 = vadd.f32 %v1894_v12, %v1838_v34 }
 0x398   : > { %1609 = vst [vmem:[%s3985_s26 + $0x58] sm:$0xff] %v1579_v30  ;;  %v1839_v53 = vpop.f32.mrb[24].mxu0 }
 0x399   : > { %v1840_v27 = vpop.f32.mrb[25].mxu0 }
 0x39a   : > { %v1841_v46 = vadd.f32 %v1840_v27, %v1839_v53  ;;  %v1842_v48 = vpop.f32.mrb[26].mxu0 }
 0x39b   : > { %v1843_v61 = vpop.f32.mrb[27].mxu0 }
 0x39c   : > { %v1584_v43 = vadd.f32 %v1841_v46, %v1583_v44  ;;  %v1844_v8 = vadd.f32 %v1843_v61, %v1842_v48 }
 0x39e   : > { %1610 = vst [vmem:[%s3985_s26 + $0x60] sm:$0xff] %v1584_v43  ;;  %v1587_v17 = vadd.f32 %v1844_v8, %v1586_v35 }
 0x3a0   : > { %1611 = vst [vmem:[%s3985_s26 + $0x68] sm:$0xff] %v1587_v17  ;;  %v1845_v26 = vpop.f32.mrb[28].mxu0 }
 0x3a1   : > { %v1846_v13 = vpop.f32.mrb[29].mxu0 }
 0x3a2   : > { %v1847_v32 = vadd.f32 %v1846_v13, %v1845_v26  ;;  %v1848_v28 = vpop.f32.mrb[30].mxu0 }
 0x3a3   : > { %v1849_v20 = vpop.f32.mrb[31].mxu0 }
 0x3a4   : > { %v1592_v49 = vadd.f32 %v1897_v36, %v1847_v32  ;;  %v1850_v41 = vadd.f32 %v1849_v20, %v1848_v28 }
 0x3a6   : > { %1612 = vst [vmem:[%s3985_s26 + $0x70] sm:$0xff] %v1592_v49  ;;  %v1595_v37 = vadd.f32 %v1898_v54, %v1850_v41 }
 0x3a8   : > { %1613 = vst [vmem:[%s3985_s26 + $0x78] sm:$0xff] %v1595_v37 }
 0x3a9   : > { %2266 = shalt.err (!%p2263_p1)
}
 0x3aa   : > { %s2267_s13 = scalar_lea.hbm %s4006_s23, 2048  ;;  %s2271_s6 = scalar_lea.hbm %s4057_s4, 6144 }
 0x3ab   : > { %p2268_p0 = scmp.ne.s32.totalorder %s4006_s23, %s2267_s13  ;;  %p2272_p4 = scmp.lt.u32.totalorder %s4006_s23, %s4057_s4 }
 0x3ac   : > { %p2273_p12 = scmp.lt.u32.totalorder %s2271_s6, %s2267_s13  ;;  %p2275_p7 = scmp.lt.u32.totalorder %s2267_s13, %s4006_s23 }
 0x3ad   : > { %p2269_p2 = pnand %p2268_p0, %p4404_p9 }
 0x3ae   : > { %p2274_p3 = por %p2273_p12, %p2272_p4 }
 0x3af   : > { %p2270_p11 = pneg %p2269_p2 }
 0x3b0   : > { %p2276_p8 = por %p2275_p7, %p2274_p3 }
 0x3b2   : > { %p2277_p6 = pnand %p2276_p8, %p2270_p11 }
 0x3b4   : > { %2280 = shalt.err (!%p2277_p6)
}
 0x3b5   : > { %s2345_s29 = smov 128   ;;  %s2346_s8 = smov 8  }
 0x3b6   : > { %1914 = dma.vmem_to_hbm [thread:$0]  (%p4404_p9), %s4008_s14, 2048, %s4006_s23, %s1615_s0, %s2345_s29, %s2345_s29, %s2346_s8  }
 0x3b7 PF: > { %p1939_p13 = scmp.ge.s32.totalorder %s2331_s18, 2  ;;  %s1643_s26 = sand.u32 1, %s2319_s15  }
 0x3b8   : > { %p4405_p10 = scmp.ne.s32.totalorder %s4122_s28, 0  ;;  %s1644_s30 = scalar_lea.sflag [#allocation4], %s1643_s26 }
 0x3ba   : > { %p1931_p5 = pnand %p1939_p13, %p4405_p10 }
 0x3bc   : > { %2314 = dma.done.wait (!%p1931_p5), %s1644_s30, 2048  }
 0x3bd   : > { %2316 = vsyncadd (!%p1931_p5), %s1644_s30, 4294965248  ;;  %p18_p1 = scmp.ge.s32.totalorder %s2397_s21, 5   ;;  %s4406_s15 = smov %s2323_s16 }
 0x3be   : > { %s4407_s16 = smov %s2327_s17  ;;  %s4408_s17 = smov %s2409_s24 }
 0x3bf   : > { %s4409_s18 = smov %s2397_s21  ;;  %20 = sbr.rel (!%p18_p1) target bundleno = 9 (0x9), region = 100 }
 0x3c6   :  { %1649 = vsyncpa [#allocation3], 1 }
 0x3c7   :  { %1651 = vsyncpa [#allocation3 + $0x1], 1 }
 0x3c8   :  { %1652 = vsyncpa [#allocation6], 1 }
 0x3c9   :  { %1653 = vsyncpa [#allocation4], 1 }
 0x3ca   :  { %1655 = vsyncpa [#allocation4 + $0x1], 1 }

// kernel: node_attention_per_metapath.4
= control target key start
LH: loop header
LB: loop body
LE: loop exit
PB: predicated region body
PF: predicated region fallthrough
CT: control target
= control target key end

     0   :  { %s5401_s0 = inlined_call_operand.hbm [shape: f32[384,1], index: 0, kind: input, shape index: {}]   ;;  %s5402_s1 = inlined_call_operand.hbm [shape: f32[1,384], index: 1, kind: input, shape index: {}]   ;;  %s5403_s2 = inlined_call_operand.hbm [shape: s8[384,384], index: 2, kind: input, shape index: {}]   ;;  %s5404_s3 = inlined_call_operand.hbm [shape: bf16[384,128], index: 3, kind: input, shape index: {}]   ;;  %s5405_s4 = inlined_call_operand.hbm [shape: bf16[128,128], index: 4, kind: input, shape index: {}]   ;;  %s5406_s5 = inlined_call_operand.hbm [shape: f32[1,128], index: 5, kind: input, shape index: {}]   ;;  %s5407_s6 = inlined_call_operand.hbm [shape: f32[1,128], index: 6, kind: input, shape index: {}]   ;;  %s5408_s7 = inlined_call_operand.hbm [shape: bf16[384,128], index: 7, kind: output, shape index: {0}]   ;;  %s5409_s8 = inlined_call_operand.hbm [shape: f32[384,1], index: 8, kind: output, shape index: {1}]   ;;  %s5410_s9 = inlined_call_operand.hbm [shape: f32[384,1], index: 9, kind: output, shape index: {2}]  }
   0x1   :  { %5482 = sst [smem:[#allocation72_spill]] %s5401_s0 }
   0x2   :  { %5483 = sst [smem:[#allocation73_spill]] %s5402_s1 }
   0x3   :  { %5484 = sst [smem:[#allocation74_spill]] %s5405_s4 }
   0x4   :  { %5485 = sst [smem:[#allocation75_spill]] %s5409_s8 }
   0x5   :  { %5486 = sst [smem:[#allocation76_spill]] %s5410_s9 }
   0x6   :  { %15 = vsyncpa [#allocation3], 0 }
   0x7   :  { %17 = vsyncpa [#allocation3 + $0x1], 0 }
   0x8   :  { %18 = vsyncpa [#allocation6], 0 }
   0x9   :  { %19 = vsyncpa [#allocation10], 0 }
   0xa   :  { %20 = vsyncpa [#allocation13], 0 }
   0xb   :  { %21 = vsyncpa [#allocation4], 0 }
   0xc   :  { %23 = vsyncpa [#allocation4 + $0x1], 0 }
   0xd   :  { %24 = vsyncpa [#allocation16], 0 }
   0xe   :  { %26 = vsyncpa [#allocation16 + $0x1], 0  ;;  %s3462_s30 = smov 0   ;;  %s3464_s10 = smov 0  }
   0xf   :  { %s3466_s11 = smov 0   ;;  %s3468_s12 = smov 0  }
  0x10 LB: > { %5487 = sst [smem:[#allocation26_spill]] %s3377_s30  ;;  %s3391_s13 = smov [#allocation5]   ;;  %s3389_s12 = sphi %s3468_s12, %s5792_s12   ;;  %s3385_s11 = sphi %s3466_s11, %s5797_s11   ;;  %s3381_s10 = sphi %s3464_s10, %s5796_s10   ;;  %s3377_s30 = sphi %s3462_s30, %s5795_s30  }
  0x11   : > { %5488 = sst [smem:[#allocation27_spill]] %s3385_s11  ;;  %s285_s14 = sshll.u32 %s3391_s13, 4  ;;  %s286_s14 = int_to_ptr.vmem [resolvable:$true] %s285_s14 }
  0x12   : > { %s3483_s15 = sadd.s32 4294967295, %s3389_s12   ;;  %p2444_p0 = scmp.ge.s32.totalorder %s3389_s12, 1 }
  0x13   : > { %p5411_p1 = scmp.eq.s32.totalorder %s3483_s15, 0  ;;  %p272_p2 = scmp.lt.s32.totalorder %s3389_s12, 4 }
  0x14   : > { %s3392_s17 = smov [#allocation9]   ;;  %s5491_s1 = sld [smem:[#allocation73_spill]] }
  0x15   : > { %p3488_p3 = pnand %p2444_p0, %p272_p2  ;;  %s308_s18 = sshll.u32 %s3392_s17, 4  ;;  %s3500_s18 = int_to_ptr.vmem [resolvable:$true] %s308_s18 }
  0x17   : > { %s5489_s16 = scalar_select %p3488_p3, 1, 0 }
  0x18   : > { %p2788_p4 = pneg %p3488_p3 }
  0x1a   : > { %p3496_p5 = pnand %p2788_p4, %p5411_p1  ;;  %s3043_s22 = scalar_lea.hbm %s5491_s1, 48 }
  0x1b   : > { %p3044_p6 = scmp.ne.s32.totalorder %s5491_s1, %s3043_s22  ;;  %p3050_p10 = scmp.lt.u32.totalorder %s3043_s22, %s5491_s1 }
  0x1c   : > { %s5490_s19 = scalar_select %p3496_p5, 1, 0 }
  0x1d   : > { %p3510_p7 = pneg %p3496_p5 }
  0x1f   : > { %p3046_p8 = pnand %p3510_p7, %p3044_p6 }
  0x21   : > { %p3047_p9 = pneg %p3046_p8 }
  0x23   : > { %p3052_p11 = pnand %p3050_p10, %p3047_p9 }
  0x25   : > { %3055 = shalt.err (!%p3052_p11)
}
  0x26   : > { %s3056_s28 = scalar_lea.vmem %s286_s14, 48  ;;  %s3063_s29 = scalar_lea.vmem %s286_s14, 64 }
  0x27   : > { %p3057_p12 = scmp.ne.s32.totalorder %s286_s14, %s3056_s28  ;;  %p3064_p2 = scmp.lt.s32.totalorder %s286_s14, %s286_s14 }
  0x28   : > { %p3065_p4 = scmp.lt.s32.totalorder %s3063_s29, %s3056_s28 }
  0x29   : > { %p3059_p13 = pnand %p3057_p12, %p3510_p7 }
  0x2a   : > { %p3066_p1 = por %p3065_p4, %p3064_p2 }
  0x2b   : > { %p3060_p0 = pneg %p3059_p13 }
  0x2d   : > { %p3067_p3 = pnand %p3066_p1, %p3060_p0 }
  0x2f   : > { %3070 = shalt.err (!%p3067_p3)
}
  0x30   : > { %2791 = dma.hbm_to_vmem [thread:$0]  (!%p3496_p5), %s5491_s1, 48, %s286_s14, [#allocation6]  }
  0x31   : > { %s5493_s4 = sld [smem:[#allocation74_spill]] }
  0x37   : > { %s3071_s22 = scalar_lea.hbm %s5493_s4, 1024 }
  0x38   : > { %p3072_p6 = scmp.ne.s32.totalorder %s5493_s4, %s3071_s22  ;;  %p3078_p1 = scmp.lt.u32.totalorder %s3071_s22, %s5493_s4 }
  0x3a   : > { %p3074_p8 = pnand %p3072_p6, %p3510_p7 }
  0x3c   : > { %p3075_p9 = pneg %p3074_p8 }
  0x3e   : > { %p3080_p3 = pnand %p3078_p1, %p3075_p9 }
  0x40   : > { %3083 = shalt.err (!%p3080_p3)
}
  0x41   : > { %s3084_s14 = scalar_lea.vmem %s3500_s18, 1024  ;;  %p3092_p13 = scmp.lt.s32.totalorder %s3500_s18, %s3500_s18 }
  0x42   : > { %p3085_p10 = scmp.ne.s32.totalorder %s3500_s18, %s3084_s14  ;;  %p3093_p0 = scmp.lt.s32.totalorder %s3084_s14, %s3084_s14 }
  0x44   : > { %p3087_p11 = pnand %p3085_p10, %p3510_p7  ;;  %p3094_p2 = por %p3093_p0, %p3092_p13 }
  0x46   : > { %p3088_p12 = pneg %p3087_p11 }
  0x48   : > { %p3095_p4 = pnand %p3094_p2, %p3088_p12 }
  0x4a   : > { %3098 = shalt.err (!%p3095_p4)
}
  0x4b   : > { %s5413_s28 = smov 64   ;;  %s5414_s29 = smov 4  }
  0x4c   : > { %2797 = dma.hbm_to_vmem [thread:$0]  (!%p3496_p5), %s5493_s4, 1024, %s3500_s18, [#allocation10], %s5413_s28, %s5413_s28, %s5414_s29  }
  0x4d   : > { %s5415_s20 = sadd.s32 4294967294, %s3389_s12   ;;  %s3554_s21 = sadd.s32 1, %s3389_s12  }
  0x4e   : > { %5494 = sst [smem:[#allocation28_spill]] %s3554_s21  ;;  %s36_s22 = ssub.s32 %s3389_s12, %s3554_s21 }
  0x4f   : > { %s39_s23 = sadd.s32 1, %s3385_s11  ;;  %p37_p6 = scmp.eq.s32.totalorder %s36_s22, 0 }
  0x50   : > { %p46_p8 = scmp.ne.s32.totalorder %s3385_s11, %s3381_s10  ;;  %p47_p9 = scmp.eq.s32.totalorder %s3389_s12, 0 }
  0x51   : > { %p52_p1 = scmp.ne.s32.totalorder %s3381_s10, %s3377_s30  ;;  %p5497_p10 = scmp.eq.s32.totalorder %s3483_s15, 0 }
  0x52   : > { %s3565_s24 = scalar_select %p37_p6, %s3385_s11, %s39_s23  }
  0x53   : > { %p3567_p3 = por %p47_p9, %p46_p8  ;;  %p3573_p11 = por %p5497_p10, %p52_p1 }
  0x54   : > { %5495 = sst [smem:[#allocation29_spill]] %s3565_s24  ;;  %p207_p12 = scmp.eq.s32.totalorder %s3483_s15, 2 }
  0x55   : > { %s5498_s18 = scalar_select %p3573_p11, 1, 0 }
  0x56   : > { %p213_p13 = scmp.eq.s32.totalorder %s5415_s20, 2  ;;  %p2826_p0 = scmp.lt.s32.totalorder %s3389_s12, 3 }
  0x57   : > { %s344_s27 = sand.u32 1, %s3389_s12   ;;  %p3582_p2 = por %p207_p12, %p46_p8 }
  0x58   : > { %p3586_p4 = por %p213_p13, %p52_p1  ;;  %s5416_s17 = sand.u32 1, %s3385_s11  }
  0x59   : > { %s5499_s14 = scalar_select %p3582_p2, 1, 0 }
  0x5a   : > { %s5500_s13 = scalar_select %p3586_p4, 1, 0 }
  0x5b   : > { %s2451_s22 = sshll.u32 %s5416_s17, 7  ;;  %s2528_s23 = sshll.u32 %s3389_s12, 11 }
  0x5c   : > { %5501 = sst [smem:[#allocation30_spill]] %s5500_s13  ;;  %s5502_s0 = sld [smem:[#allocation72_spill]] }
  0x5d   : > { %s348_s20 = scalar_lea.vmem [#allocation2], %s2451_s22  ;;  %p3601_p6 = pnand %p2826_p0, %p3567_p3 }
  0x5e   : > { %s355_s4 = sshll.u32 %s348_s20, 4  ;;  %s3607_s17 = scalar_lea.sflag [#allocation3], %s344_s27  ;;  %s3605_s4 = int_to_ptr.vmem [resolvable:$true] %s355_s4 }
  0x5f   : > { %s5503_s24 = scalar_select %p3601_p6, 1, 0 }
  0x60   : > { %p5427_p9 = pneg %p3601_p6 }
  0x62   : > { %s3597_s1 = scalar_lea.hbm %s5502_s0, %s2528_s23  ;;  %s3104_s26 = scalar_lea.hbm %s5502_s0, 6144 }
  0x63   : > { %s3099_s28 = scalar_lea.hbm %s3597_s1, 2048  ;;  %p3105_p3 = scmp.lt.u32.totalorder %s3597_s1, %s5502_s0 }
  0x64   : > { %p3100_p8 = scmp.ne.s32.totalorder %s3597_s1, %s3099_s28  ;;  %p3106_p12 = scmp.lt.u32.totalorder %s3104_s26, %s3099_s28 }
  0x65   : > { %p3108_p0 = scmp.lt.u32.totalorder %s3099_s28, %s3597_s1 }
  0x66   : > { %p3102_p1 = pnand %p5427_p9, %p3100_p8  ;;  %p3107_p13 = por %p3106_p12, %p3105_p3 }
  0x68   : > { %p3103_p10 = pneg %p3102_p1  ;;  %p3109_p4 = por %p3108_p0, %p3107_p13 }
  0x6a   : > { %p3110_p2 = pnand %p3109_p4, %p3103_p10 }
  0x6c   : > { %3113 = shalt.err (!%p3110_p2)
}
  0x6d   : > { %s3114_s27 = scalar_lea.vmem %s3605_s4, 2048  ;;  %s3395_s29 = smov [#allocation2]  }
  0x6e   : > { %p3115_p8 = scmp.ne.s32.totalorder %s3605_s4, %s3114_s27  ;;  %s3119_s20 = sshll.u32 %s3395_s29, 4  ;;  %s3120_s20 = int_to_ptr.vmem [resolvable:$false] %s3119_s20 }
  0x6f   : > { %s3121_s22 = scalar_lea.vmem %s3120_s20, 4096  ;;  %p3122_p5 = scmp.lt.s32.totalorder %s3605_s4, %s3120_s20 }
  0x70   : > { %p3117_p1 = pnand %p3115_p8, %p5427_p9  ;;  %p3123_p3 = scmp.lt.s32.totalorder %s3121_s22, %s3114_s27 }
  0x72   : > { %p3118_p11 = pneg %p3117_p1  ;;  %p3124_p12 = por %p3123_p3, %p3122_p5 }
  0x74   : > { %p3125_p13 = pnand %p3124_p12, %p3118_p11 }
  0x76   : > { %3128 = shalt.err (!%p3125_p13)
}
  0x77   : > { %s3396_s28 = smov 128   ;;  %s3397_s26 = smov 8  }
  0x78   : > { %2807 = dma.hbm_to_vmem [thread:$0]  (!%p3601_p6), %s3597_s1, 2048, %s3605_s4, %s3607_s17, %s3396_s28, %s3396_s28, %s3397_s26  }
  0x79   : > { %s5504_s23 = sand.u32 1, %s3385_s11   ;;  %s3398_s29 = smov [#allocation8]  }
  0x7a   : > { %s3637_s0 = smul.u32 96, %s5504_s23  ;;  %s295_s21 = sshll.u32 %s3398_s29, 4  ;;  %s296_s21 = int_to_ptr.vmem [resolvable:$true] %s295_s21 }
  0x7b   : > { %s3129_s22 = scalar_lea.hbm %s5404_s3, 3072 }
  0x7c   : > { %p3130_p5 = scmp.ne.s32.totalorder %s5404_s3, %s3129_s22  ;;  %p3136_p4 = scmp.lt.u32.totalorder %s3129_s22, %s5404_s3 }
  0x7e   : > { %p3132_p11 = pnand %p3130_p5, %p3510_p7 }
  0x80   : > { %p3133_p2 = pneg %p3132_p11 }
  0x82   : > { %p3138_p10 = pnand %p3136_p4, %p3133_p2 }
  0x84   : > { %3141 = shalt.err (!%p3138_p10)
}
  0x85   : > { %s3142_s1 = scalar_lea.vmem %s296_s21, 3072  ;;  %p3150_p3 = scmp.lt.s32.totalorder %s296_s21, %s296_s21 }
  0x86   : > { %p3143_p0 = scmp.ne.s32.totalorder %s296_s21, %s3142_s1  ;;  %p3151_p12 = scmp.lt.s32.totalorder %s3142_s1, %s3142_s1 }
  0x88   : > { %p3145_p8 = pnand %p3143_p0, %p3510_p7  ;;  %p3152_p13 = por %p3151_p12, %p3150_p3 }
  0x8a   : > { %p3146_p1 = pneg %p3145_p8 }
  0x8c   : > { %p3153_p9 = pnand %p3152_p13, %p3146_p1 }
  0x8e   : > { %3156 = shalt.err (!%p3153_p9)
}
  0x8f   : > { %p5505_p5 = scmp.ne.s32.totalorder %s5490_s19, 0  ;;  %s5506_s4 = smov 4  }
  0x90   : > { %s5507_s30 = smov 64   ;;  %s3399_s13 = smov [#allocation11]  }
  0x91   : > { %2794 = dma.hbm_to_vmem [thread:$0]  (!%p5505_p5), %s5404_s3, 3072, %s296_s21, [#allocation6], %s5507_s30, %s5507_s30, %s5506_s4  }
  0x92   : > { %s322_s28 = sshll.u32 %s3399_s13, 4  ;;  %s3400_s26 = smov [#allocation12]   ;;  %s323_s28 = int_to_ptr.vmem [resolvable:$true] %s322_s28 }
  0x93   : > { %s333_s23 = sshll.u32 %s3400_s26, 4  ;;  %s3157_s20 = scalar_lea.hbm %s5406_s5, 16  ;;  %s334_s23 = int_to_ptr.vmem [resolvable:$true] %s333_s23 }
  0x94   : > { %p3158_p9 = scmp.ne.s32.totalorder %s5406_s5, %s3157_s20  ;;  %p3164_p4 = scmp.lt.u32.totalorder %s3157_s20, %s5406_s5 }
  0x96   : > { %p3160_p11 = pnand %p3158_p9, %p3510_p7 }
  0x98   : > { %p3161_p2 = pneg %p3160_p11 }
  0x9a   : > { %p3166_p10 = pnand %p3164_p4, %p3161_p2 }
  0x9c   : > { %3169 = shalt.err (!%p3166_p10)
}
  0x9d   : > { %s3170_s21 = scalar_lea.vmem %s323_s28, 16  ;;  %s3177_s4 = scalar_lea.vmem %s323_s28, 32 }
  0x9e   : > { %p3171_p0 = scmp.ne.s32.totalorder %s323_s28, %s3170_s21  ;;  %p3178_p3 = scmp.lt.s32.totalorder %s323_s28, %s323_s28 }
  0x9f   : > { %p3179_p12 = scmp.lt.s32.totalorder %s3177_s4, %s3170_s21 }
  0xa0   : > { %p3173_p8 = pnand %p3171_p0, %p3510_p7 }
  0xa1   : > { %p3180_p13 = por %p3179_p12, %p3178_p3 }
  0xa2   : > { %p3174_p1 = pneg %p3173_p8 }
  0xa4   : > { %p3181_p6 = pnand %p3180_p13, %p3174_p1 }
  0xa6   : > { %3184 = shalt.err (!%p3181_p6)
}
  0xa7   : > { %2800 = dma.hbm_to_vmem [thread:$0]  (!%p5505_p5), %s5406_s5, 16, %s323_s28, [#allocation10]  }
  0xa8   : > { %s2756_s11 = smul.u32 1536, %s3389_s12  ;;  %s3185_s29 = scalar_lea.hbm %s5407_s6, 16 }
  0xa9   : > { %p3186_p9 = scmp.ne.s32.totalorder %s5407_s6, %s3185_s29  ;;  %p3192_p2 = scmp.lt.u32.totalorder %s3185_s29, %s5407_s6 }
  0xab   : > { %p3188_p6 = pnand %p3186_p9, %p3510_p7 }
  0xad   : > { %p3189_p11 = pneg %p3188_p6 }
  0xaf   : > { %p3194_p4 = pnand %p3192_p2, %p3189_p11 }
  0xb1   : > { %3197 = shalt.err (!%p3194_p4)
}
  0xb2   : > { %s3198_s28 = scalar_lea.vmem %s334_s23, 16  ;;  %s3205_s8 = scalar_lea.vmem %s334_s23, 32 }
  0xb3   : > { %p3199_p10 = scmp.ne.s32.totalorder %s334_s23, %s3198_s28  ;;  %p3206_p1 = scmp.lt.s32.totalorder %s334_s23, %s334_s23 }
  0xb4   : > { %p3207_p3 = scmp.lt.s32.totalorder %s3205_s8, %s3198_s28 }
  0xb5   : > { %p3201_p0 = pnand %p3199_p10, %p3510_p7 }
  0xb6   : > { %p3208_p12 = por %p3207_p3, %p3206_p1 }
  0xb7   : > { %p3202_p8 = pneg %p3201_p0 }
  0xb9   : > { %p3209_p13 = pnand %p3208_p12, %p3202_p8 }
  0xbb   : > { %3212 = shalt.err (!%p3209_p13)
}
  0xbc   : > { %2803 = dma.hbm_to_vmem [thread:$0]  (!%p5505_p5), %s5407_s6, 16, %s334_s23, [#allocation13]  }
  0xbd   : > { %s3700_s25 = scalar_lea.hbm %s5403_s2, %s2756_s11  ;;  %s369_s13 = scalar_lea.vmem [#allocation7], %s3637_s0 }
  0xbe   : > { %s377_s26 = sshll.u32 %s369_s13, 4  ;;  %s3213_s19 = scalar_lea.hbm %s3700_s25, 1536  ;;  %s3703_s26 = int_to_ptr.vmem [resolvable:$true] %s377_s26 }
  0xbf   : > { %p3214_p7 = scmp.ne.s32.totalorder %s3700_s25, %s3213_s19  ;;  %p5508_p9 = scmp.ne.s32.totalorder %s5503_s24, 0 }
  0xc0   : > { %s3218_s27 = scalar_lea.hbm %s5403_s2, 4608  ;;  %p3219_p5 = scmp.lt.u32.totalorder %s3700_s25, %s5403_s2 }
  0xc1   : > { %p5509_p6 = pneg %p5508_p9  ;;  %p3220_p4 = scmp.lt.u32.totalorder %s3218_s27, %s3213_s19 }
  0xc2   : > { %p3222_p0 = scmp.lt.u32.totalorder %s3213_s19, %s3700_s25 }
  0xc3   : > { %p3216_p11 = pnand %p3214_p7, %p5509_p6  ;;  %p3221_p10 = por %p3220_p4, %p3219_p5 }
  0xc5   : > { %p3217_p2 = pneg %p3216_p11  ;;  %p3223_p8 = por %p3222_p0, %p3221_p10 }
  0xc7   : > { %p3224_p1 = pnand %p3223_p8, %p3217_p2 }
  0xc9   : > { %3227 = shalt.err (!%p3224_p1)
}
  0xca   : > { %s3228_s0 = scalar_lea.vmem %s3703_s26, 1536  ;;  %p5510_p12 = pmov %p5509_p6 }
  0xcb   : > { %p3229_p3 = scmp.ne.s32.totalorder %s3703_s26, %s3228_s0  ;;  %s3401_s22 = smov [#allocation7]  }
  0xcc   : > { %s3233_s1 = sshll.u32 %s3401_s22, 4  ;;  %s3234_s1 = int_to_ptr.vmem [resolvable:$false] %s3233_s1 }
  0xcd   : > { %p3231_p13 = pnand %p3229_p3, %p5510_p12  ;;  %s3235_s28 = scalar_lea.vmem %s3234_s1, 3072 }
  0xce   : > { %p3236_p6 = scmp.lt.s32.totalorder %s3703_s26, %s3234_s1  ;;  %p3237_p11 = scmp.lt.s32.totalorder %s3235_s28, %s3228_s0 }
  0xcf   : > { %p3232_p7 = pneg %p3231_p13 }
  0xd0   : > { %p3238_p5 = por %p3237_p11, %p3236_p6 }
  0xd2   : > { %p3239_p4 = pnand %p3238_p5, %p3232_p7 }
  0xd4   : > { %3242 = shalt.err (!%p3239_p4)
}
  0xd5   : > { %s3402_s8 = smov 384   ;;  %s3403_s21 = smov 24  }
  0xd6   : > { %2810 = dma.hbm_to_vmem [thread:$0]  (!%p5508_p9), %s3700_s25, 1536, %s3703_s26, %s3607_s17, %s3402_s8, %s3402_s8, %s3403_s21  }
  0xd7   : > { %p5511_p2 = scmp.ne.s32.totalorder %s5489_s16, 0 }
  0xd9   : > { %389 = sbr.rel (%p5511_p2) target bundleno = 1427 (0x593), region = 48 }
  0xe0   : > { %s391_s4 = sand.u32 1, %s3483_s15   ;;  %s3733_s30 = sand.u32 1, %s3381_s10  }
  0xe1   : > { %s3736_s9 = sshll.u32 %s3733_s30, 7  ;;  %s392_s13 = scalar_lea.sflag [#allocation3], %s391_s4 }
  0xe2   : > { %s3741_s19 = scalar_lea.vmem [#allocation2], %s3736_s9  ;;  %p5512_p10 = scmp.ne.s32.totalorder %s5498_s18, 0 }
  0xe4   : > { %3344 = dma.done.wait (%p5512_p10), %s392_s13, 2048  }
  0xe5   : > { %3346 = vsyncadd (%p5512_p10), %s392_s13, 4294965248  ;;  %p5513_p9 = scmp.eq.s32.totalorder %s3483_s15, 0 }
  0xe7   : > { %3348 = dma.done.wait (%p5513_p9), [#allocation6], 48   ;;  %p5514_p0 = pmov %p5513_p9 }
  0xe8   : > { %s2757_s16 = smul.u32 96, %s3733_s30 }
  0xe9   : > { %3350 = vsyncadd (%p5514_p0), [#allocation6], 4294967248 }
  0xea   : > { %s3752_s24 = scalar_lea.vmem [#allocation7], %s2757_s16 }
  0xeb   : > { %3352 = dma.done.wait (%p5512_p10), %s392_s13, 1536  }
  0xec   : > { %3354 = vsyncadd (%p5512_p10), %s392_s13, 4294965760  ;;  %p5515_p8 = pmov %p5514_p0 }
  0xed   : > { %p5516_p1 = pmov %p5514_p0 }
  0xee   : > { %3356 = dma.done.wait (%p5515_p8), [#allocation6], 3072  }
  0xef   : > { %3358 = vsyncadd (%p5516_p1), [#allocation6], 4294964224  ;;  %p5517_p3 = pmov %p5514_p0 }
  0xf0   : > { %p5518_p12 = pmov %p5514_p0 }
  0xf1   : > { %3360 = dma.done.wait (%p5517_p3), [#allocation10], 1040  }
  0xf2   : > { %3362 = vsyncadd (%p5518_p12), [#allocation10], 4294966256  ;;  %p5519_p13 = pmov %p5514_p0 }
  0xf3   : > { %p5520_p7 = pmov %p5514_p0 }
  0xf4   : > { %3364 = dma.done.wait (%p5519_p13), [#allocation13], 16  }
  0xf5   : > { %3366 = vsyncadd (%p5520_p7), [#allocation13], 4294967280  ;;  %v3404_v0 = vmov 0   ;;  %v484_v1 = vld [vmem:[%s3741_s19 + $0x10] sm:$0xff]  ;;  %v482_v2 = vld [vmem:[%s3741_s19] sm:$0xff]  ;;  %v592_v36 = vlaneseq  ;;  %s2464_s18 = sshll.u32 %s3733_s30, 6 }
  0xf6   : > { %2882 = vset.pattern.permute.xlu1 %v3404_v0  ;;  %2881 = vset.pattern.permute.xlu0 %v3404_v0  ;;  %v485_v3 = vld [vmem:[%s3741_s19 + $0x18] sm:$0xff]  ;;  %v483_v4 = vld [vmem:[%s3741_s19 + $0x8] sm:$0xff]  ;;  %v486_v6 = vld [vmem:[%s3741_s19 + $0x20] sm:$0xff]  ;;  %s5164_s17 = scalar_lea.vmem [#allocation14], %s2464_s18  ;;  %s2545_s26 = sshll.u32 %s3483_s15, 10 }
  0xf7   : > { %523 = vperm.xlu1 %2882, %v484_v1   ;;  %513 = vperm.xlu0 %2881, %v482_v2   ;;  %v487_v5 = vld [vmem:[%s3741_s19 + $0x28] sm:$0xff]  ;;  %v489_v7 = vld [vmem:[%s3741_s19 + $0x38] sm:$0xff]  ;;  %v488_v8 = vld [vmem:[%s3741_s19 + $0x30] sm:$0xff]  ;;  %v593_v45 = vshrl.u32 %v592_v36, 7  ;;  %s2209_s25 = sshll.u32 %s5164_s17, 4  ;;  %s5209_s27 = scalar_lea.hbm %s5408_s7, %s2545_s26  ;;  %s5211_s25 = int_to_ptr.vmem [resolvable:$true] %s2209_s25 }
  0xf8   : > { %v491_v9 = vld [vmem:[%s3741_s19 + $0x48] sm:$0xff]  ;;  %v490_v10 = vld [vmem:[%s3741_s19 + $0x40] sm:$0xff]  ;;  %v493_v11 = vld [vmem:[%s3741_s19 + $0x58] sm:$0xff]  ;;  %s2186_s11 = scalar_lea.sflag [#allocation4], %s3733_s30  ;;  %s3243_s20 = scalar_lea.vmem %s5211_s25, 1024 }
  0xf9   : > { %v492_v12 = vld [vmem:[%s3741_s19 + $0x50] sm:$0xff]  ;;  %v495_v13 = vld [vmem:[%s3741_s19 + $0x68] sm:$0xff]  ;;  %v494_v14 = vld [vmem:[%s3741_s19 + $0x60] sm:$0xff]  ;;  %v594_v57 = vsub.s32 0, %v593_v45  ;;  %v598_v58 = vsub.s32 1, %v593_v45  ;;  %v602_v59 = vsub.s32 2, %v593_v45  ;;  %p3244_p6 = scmp.ne.s32.totalorder %s5211_s25, %s3243_s20 }
  0xfa   : > { %v497_v15 = vld [vmem:[%s3741_s19 + $0x78] sm:$0xff]  ;;  %v496_v16 = vld [vmem:[%s3741_s19 + $0x70] sm:$0xff]  ;;  %v499_v17 = vld [vmem:[%s3752_s24] sm:$0xff]  ;;  %p5785_p11 = scmp.ne.s32.totalorder %s5499_s14, 0  ;;  %s3405_s0 = smov [#allocation14]  }
  0xfb   : > { %528 = vperm.xlu1 %2882, %v485_v3   ;;  %518 = vperm.xlu0 %2881, %v483_v4   ;;  %v500_v18 = vld [vmem:[%s3752_s24 + $0x8] sm:$0xff]  ;;  %v501_v19 = vld [vmem:[%s3752_s24 + $0x10] sm:$0xff]  ;;  %vm751_vm0 = vnez %v499_v17  ;;  %v502_v33 = vld [vmem:[%s3752_s24 + $0x18] sm:$0xff]  ;;  %s3247_s22 = sshll.u32 %s3405_s0, 4  ;;  %s3248_s22 = int_to_ptr.vmem [resolvable:$false] %s3247_s22 }
  0xfc   : > { %vm752_vm1 = vnez %v500_v18  ;;  %vm753_vm2 = vnez %v501_v19  ;;  %v763_v20 = vsel %vm751_vm0, 16843009, %v3404_v0  ;;  %v503_v34 = vld [vmem:[%s3752_s24 + $0x20] sm:$0xff]  ;;  %v504_v35 = vld [vmem:[%s3752_s24 + $0x28] sm:$0xff]  ;;  %vm754_vm3 = vnez %v502_v33  ;;  %v498_v60 = vld [vmem:[#allocation5] sm:$0x7]  ;;  %p3245_p5 = pnand %p3244_p6, %p5785_p11  ;;  %p3250_p2 = scmp.lt.s32.totalorder %s5211_s25, %s3248_s22 }
  0xfd   : > { %v764_v21 = vsel %vm752_vm1, 16843009, %v3404_v0  ;;  %v765_v22 = vsel %vm753_vm2, 16843009, %v3404_v0  ;;  %v775_v23 = vunpack.c.0.s8 %v763_v20  ;;  %v781_v26 = vunpack.c.2.s8 %v763_v20  ;;  %s3249_s1 = scalar_lea.vmem %s3248_s22, 2048 }
  0xfe   : > { %v776_v24 = vunpack.c.0.s8 %v764_v21  ;;  %v777_v25 = vunpack.c.0.s8 %v765_v22  ;;  %v782_v27 = vunpack.c.2.s8 %v764_v21  ;;  %v783_v28 = vunpack.c.2.s8 %v765_v22  ;;  %p3246_p4 = pneg %p3245_p5  ;;  %p3251_p10 = scmp.lt.s32.totalorder %s3249_s1, %s3243_s20 }
  0xff   : > { %538 = vperm.xlu1 %2882, %v487_v5   ;;  %533 = vperm.xlu0 %2881, %v486_v6   ;;  %v778_v37 = vunpack.c.1.s8 %v763_v20  ;;  %v779_v38 = vunpack.c.1.s8 %v764_v21  ;;  %v780_v39 = vunpack.c.1.s8 %v765_v22  ;;  %vm755_vm4 = vnez %v503_v34 }
 0x100   : > { %v823_v29 = vpack.c.b16 %v776_v24, %v775_v23  ;;  %v824_v30 = vpack.c.b16 %v777_v25, %v777_v25  ;;  %v829_v31 = vpack.c.b16 %v782_v27, %v781_v26  ;;  %v830_v32 = vpack.c.b16 %v783_v28, %v783_v28  ;;  %p3252_p9 = por %p3251_p10, %p3250_p2 }
 0x101   : > { %vm756_vm5 = vnez %v504_v35  ;;  %v784_v42 = vunpack.c.3.s8 %v763_v20  ;;  %v785_v43 = vunpack.c.3.s8 %v764_v21  ;;  %v786_v44 = vunpack.c.3.s8 %v765_v22  ;;  %v508_v35 = vld [vmem:[%s3752_s24 + $0x48] sm:$0xff] }
 0x102   : > { %v825_v40 = vpack.c.b8 %v824_v30, %v823_v29  ;;  %v831_v41 = vpack.c.b8 %v830_v32, %v829_v31  ;;  %v826_v46 = vpack.c.b16 %v779_v38, %v778_v37  ;;  %v827_v47 = vpack.c.b16 %v780_v39, %v780_v39  ;;  %p3253_p0 = pnand %p3252_p9, %p3246_p4 }
 0x103   : > { %548 = vperm.xlu1 %2882, %v489_v7   ;;  %543 = vperm.xlu0 %2881, %v488_v8   ;;  %v3798_v48 = vsel %vm754_vm3, 16843009, %v3404_v0  ;;  %v3801_v49 = vsel %vm755_vm4, 16843009, %v3404_v0  ;;  %v3804_v50 = vsel %vm756_vm5, 16843009, %v3404_v0  ;;  %v832_v51 = vpack.c.b16 %v785_v43, %v784_v42 }
 0x104   : > { %vm871_vm6 = vnez %v825_v40  ;;  %vm873_vm7 = vnez %v831_v41  ;;  %v833_v52 = vpack.c.b16 %v786_v44, %v786_v44  ;;  %v828_v53 = vpack.c.b8 %v827_v47, %v826_v46  ;;  %v505_v7 = vld [vmem:[%s3752_s24 + $0x30] sm:$0xff]  ;;  %v506_v8 = vld [vmem:[%s3752_s24 + $0x38] sm:$0xff] }
 0x105   : > { %v787_v54 = vunpack.c.0.s8 %v3798_v48  ;;  %v788_v55 = vunpack.c.0.s8 %v3801_v49  ;;  %v789_v56 = vunpack.c.0.s8 %v3804_v50  ;;  %v3810_v61 = vsel %vm871_vm6, 16843009, %v3404_v0  ;;  %v509_v40 = vld [vmem:[%s3752_s24 + $0x50] sm:$0xff]  ;;  %v510_v41 = vld [vmem:[%s3752_s24 + $0x58] sm:$0xff] }
 0x106   : > { %v3813_v62 = vsel %vm873_vm7, 16843009, %v3404_v0  ;;  %v834_v63 = vpack.c.b8 %v833_v52, %v832_v51  ;;  %vm872_vm8 = vnez %v828_v53  ;;  %v3815_v3 = vrot.slane %v498_v60, %v594_v57 }
 0x107   : > { %558 = vperm.xlu1 %2882, %v491_v9   ;;  %553 = vperm.xlu0 %2881, %v490_v10   ;;  %v835_v1 = vpack.c.b16 %v788_v55, %v787_v54  ;;  %v836_v2 = vpack.c.b16 %v789_v56, %v789_v56  ;;  %v3817_v4 = vrot.slane %v498_v60, %v598_v58  ;;  %v903_v6 = vunpack.c.0.s8 %v3810_v61 }
 0x108   : > { %v3819_v5 = vrot.slane %v498_v60, %v602_v59  ;;  %v904_v9 = vunpack.c.1.s8 %v3810_v61  ;;  %v905_v10 = vunpack.c.2.s8 %v3810_v61  ;;  %vm3832_vm9 = vnez %v834_v63 }
 0x109   : > { %v791_v17 = vunpack.c.1.s8 %v3801_v49  ;;  %v837_v18 = vpack.c.b8 %v836_v2, %v835_v1  ;;  %v792_v19 = vunpack.c.1.s8 %v3804_v50  ;;  %vm757_vm10 = vnez %v505_v7 }
 0x10a   : > { %vm758_vm11 = vnez %v506_v8  ;;  %v793_v20 = vunpack.c.2.s8 %v3798_v48  ;;  %v794_v21 = vunpack.c.2.s8 %v3801_v49  ;;  %v795_v22 = vunpack.c.2.s8 %v3804_v50 }
 0x10b   : > { %568 = vperm.xlu1 %2882, %v493_v11   ;;  %563 = vperm.xlu0 %2881, %v492_v12   ;;  %v909_v11 = vunpack.c.0.s8 %v3813_v62  ;;  %v910_v12 = vunpack.c.1.s8 %v3813_v62  ;;  %v911_v23 = vunpack.c.2.s8 %v3813_v62  ;;  %v796_v24 = vunpack.c.3.s8 %v3798_v48 }
 0x10c   : > { %v797_v25 = vunpack.c.3.s8 %v3801_v49  ;;  %v798_v26 = vunpack.c.3.s8 %v3804_v50  ;;  %v769_v29 = vsel %vm757_vm10, 16843009, %v3404_v0  ;;  %v770_v30 = vsel %vm758_vm11, 16843009, %v3404_v0 }
 0x10d   : > { %v3854_v32 = vsel %vm3832_vm9, 16843009, %v3404_v0  ;;  %vm3858_vm13 = vnez %v837_v18  ;;  %v839_v37 = vpack.c.b16 %v792_v19, %v792_v19  ;;  %v841_v38 = vpack.c.b16 %v794_v21, %v793_v20 }
 0x10e   : > { %v842_v39 = vpack.c.b16 %v795_v22, %v795_v22  ;;  %v844_v42 = vpack.c.b16 %v797_v25, %v796_v24  ;;  %v845_v43 = vpack.c.b16 %v798_v26, %v798_v26  ;;  %v799_v44 = vunpack.c.0.s8 %v769_v29 }
 0x10f   : > { %578 = vperm.xlu1 %2882, %v495_v13   ;;  %573 = vperm.xlu0 %2881, %v494_v14   ;;  %v507_v13 = vld [vmem:[%s3752_s24 + $0x40] sm:$0xff]  ;;  %v3830_v14 = vsel %vm872_vm8, 16843009, %v3404_v0  ;;  %v800_v45 = vunpack.c.0.s8 %v770_v30  ;;  %vm760_vm14 = vnez %v508_v35  ;;  %v802_v49 = vunpack.c.1.s8 %v769_v29 }
 0x110   : > { %vm759_vm12 = vnez %v507_v13  ;;  %v906_v27 = vunpack.c.0.s8 %v3830_v14  ;;  %v907_v28 = vunpack.c.1.s8 %v3830_v14  ;;  %v908_v31 = vunpack.c.2.s8 %v3830_v14 }
 0x111   : > { %v771_v34 = vsel %vm759_vm12, 16843009, %v3404_v0  ;;  %v803_v50 = vunpack.c.1.s8 %v770_v30  ;;  %vm761_vm15 = vnez %v509_v40  ;;  %vm762_vm0 = vnez %v510_v41 }
 0x112   : > { %v3870_v52 = vsel %vm3858_vm13, 16843009, %v3404_v0  ;;  %v804_v54 = vunpack.c.1.s8 %v771_v34  ;;  %v843_v55 = vpack.c.b8 %v842_v39, %v841_v38  ;;  %v846_v56 = vpack.c.b8 %v845_v43, %v844_v42 }
 0x113   : > { %588 = vperm.xlu1 %2882, %v497_v15   ;;  %583 = vperm.xlu0 %2881, %v496_v16   ;;  %v790_v16 = vunpack.c.1.s8 %v3798_v48  ;;  %v801_v48 = vunpack.c.0.s8 %v771_v34  ;;  %v847_v57 = vpack.c.b16 %v800_v45, %v799_v44  ;;  %v772_v58 = vsel %vm760_vm14, 16843009, %v3404_v0 }
 0x114   : > { %v805_v60 = vunpack.c.2.s8 %v769_v29  ;;  %v773_v63 = vsel %vm761_vm15, 16843009, %v3404_v0  ;;  %v774_v1 = vsel %vm762_vm0, 16843009, %v3404_v0  ;;  %v850_v2 = vpack.c.b16 %v803_v50, %v802_v49 }
 0x115   : > { %v838_v33 = vpack.c.b16 %v791_v17, %v790_v16  ;;  %v848_v59 = vpack.c.b16 %v801_v48, %v801_v48  ;;  %v806_v7 = vunpack.c.2.s8 %v770_v30  ;;  %v807_v8 = vunpack.c.2.s8 %v771_v34 }
 0x116   : > { %v808_v13 = vunpack.c.3.s8 %v769_v29  ;;  %v851_v15 = vpack.c.b16 %v804_v54, %v804_v54  ;;  %v809_v16 = vunpack.c.3.s8 %v770_v30  ;;  %v810_v17 = vunpack.c.3.s8 %v771_v34 }
 0x117   : > { %v840_v53 = vpack.c.b8 %v839_v37, %v838_v33  ;;  %v811_v18 = vunpack.c.0.s8 %v772_v58  ;;  %v812_v19 = vunpack.c.0.s8 %v773_v63  ;;  %v813_v20 = vunpack.c.0.s8 %v774_v1 }
 0x118   : > { %v814_v21 = vunpack.c.1.s8 %v772_v58  ;;  %v815_v22 = vunpack.c.1.s8 %v773_v63  ;;  %vm3879_vm2 = vnez %v843_v55  ;;  %vm3883_vm3 = vnez %v846_v56 }
 0x119   : > { %vm3875_vm1 = vnez %v840_v53  ;;  %v816_v29 = vunpack.c.1.s8 %v774_v1  ;;  %v849_v30 = vpack.c.b8 %v848_v59, %v847_v57  ;;  %v817_v33 = vunpack.c.2.s8 %v772_v58 }
 0x11a   : > { %v818_v34 = vunpack.c.2.s8 %v773_v63  ;;  %v819_v35 = vunpack.c.2.s8 %v774_v1  ;;  %v852_v36 = vpack.c.b8 %v851_v15, %v850_v2  ;;  %v853_v37 = vpack.c.b16 %v806_v7, %v805_v60 }
 0x11b   : > { %v854_v38 = vpack.c.b16 %v807_v8, %v807_v8  ;;  %v856_v39 = vpack.c.b16 %v809_v16, %v808_v13  ;;  %v857_v40 = vpack.c.b16 %v810_v17, %v810_v17  ;;  %v859_v41 = vpack.c.b16 %v812_v19, %v811_v18 }
 0x11c   : > { %v860_v42 = vpack.c.b16 %v813_v20, %v813_v20  ;;  %v862_v43 = vpack.c.b16 %v815_v22, %v814_v21  ;;  %v863_v44 = vpack.c.b16 %v816_v29, %v816_v29  ;;  %v820_v45 = vunpack.c.3.s8 %v772_v58 }
 0x11d   : > { %v821_v48 = vunpack.c.3.s8 %v773_v63  ;;  %v822_v49 = vunpack.c.3.s8 %v774_v1  ;;  %v865_v54 = vpack.c.b16 %v818_v34, %v817_v33  ;;  %v866_v55 = vpack.c.b16 %v819_v35, %v819_v35 }
 0x11e   : > { %v3893_v57 = vsel %vm3875_vm1, 16843009, %v3404_v0  ;;  %v3898_v59 = vsel %vm3879_vm2, 16843009, %v3404_v0  ;;  %v855_v58 = vpack.c.b8 %v854_v38, %v853_v37  ;;  %v3903_v60 = vsel %vm3883_vm3, 16843009, %v3404_v0 }
 0x11f   : > { %vm879_vm4 = vnez %v849_v30  ;;  %vm3905_vm5 = vnez %v852_v36  ;;  %v858_v1 = vpack.c.b8 %v857_v40, %v856_v39  ;;  %v861_v2 = vpack.c.b8 %v860_v42, %v859_v41 }
 0x120   : > { %v864_v7 = vpack.c.b8 %v863_v44, %v862_v43  ;;  %v868_v8 = vpack.c.b16 %v821_v48, %v820_v45  ;;  %v869_v13 = vpack.c.b16 %v822_v49, %v822_v49  ;;  %v867_v18 = vpack.c.b8 %v866_v55, %v865_v54 }
 0x121   : > { %v3915_v21 = vsel %vm879_vm4, 16843009, %v3404_v0  ;;  %vm881_vm6 = vnez %v855_v58  ;;  %v3922_v25 = vsel %vm3905_vm5, 16843009, %v3404_v0  ;;  %vm882_vm7 = vnez %v858_v1 }
 0x122   : > { %5533 = vst [vmem:[#allocation31_spill] sm:$0xff] %v3922_v25  ;;  %vm883_vm8 = vnez %v861_v2  ;;  %vm884_vm9 = vnez %v864_v7  ;;  %v870_v29 = vpack.c.b8 %v869_v13, %v868_v8  ;;  %v3928_v34 = vsel %vm881_vm6, 16843009, %v3404_v0 }
 0x123   : > { %5534 = vst [vmem:[#allocation32_spill] sm:$0xff] %v3928_v34  ;;  %vm885_vm10 = vnez %v867_v18  ;;  %v3934_v38 = vsel %vm882_vm7, 16843009, %v3404_v0  ;;  %v3939_v41 = vsel %vm883_vm8, 16843009, %v3404_v0  ;;  %vm3951_vm12 = vcmp.ne.s32.totalorder %v903_v6, 0 }
 0x124   : > { %5535 = vst [vmem:[#allocation33_spill] sm:$0xff] %v3934_v38  ;;  %5536 = vst [vmem:[#allocation34_spill] sm:$0xff] %v3939_v41  ;;  %v3942_v42 = vsel %vm884_vm9, 16843009, %v3404_v0  ;;  %v3947_v45 = vsel %vm885_vm10, 16843009, %v3404_v0  ;;  %vm886_vm11 = vnez %v870_v29  ;;  %v5567_v41 = vunpack.c.0.s8 %v3854_v32 }
 0x125   : > { %5537 = vst [vmem:[#allocation35_spill] sm:$0xff] %v3942_v42  ;;  %5538 = vst [vmem:[#allocation36_spill] sm:$0xff] %v3947_v45  ;;  %v3967_v49 = vsel %vm886_vm11, 16843009, %v3404_v0  ;;  %vm4001_vm13 = vcmp.ne.s32.totalorder %v904_v9, 0  ;;  %vm4027_vm14 = vcmp.ne.s32.totalorder %v905_v10, 0  ;;  %v5573_v30 = vunpack.c.2.s8 %v3854_v32 }
 0x126   : > { %5541 = vst [vmem:[#allocation37_spill] sm:$0xff] %v3967_v49  ;;  %vm4065_vm15 = vcmp.ne.s32.totalorder %v909_v11, 0  ;;  %vm4083_vm0 = vcmp.ne.s32.totalorder %v910_v12, 0  ;;  %vm4100_vm1 = vcmp.ne.s32.totalorder %v911_v23, 0  ;;  %vm4117_vm2 = vcmp.ne.s32.totalorder %v906_v27, 0 }
 0x127   : > { %vm4123_vm3 = vcmp.ne.s32.totalorder %v907_v28, 0  ;;  %vm4129_vm4 = vcmp.ne.s32.totalorder %v908_v31, 0  ;;  %vm4191_vm5 = vcmp.ne.s32.totalorder %v5567_v41, 0  ;;  %vm4203_vm7 = vcmp.ne.s32.totalorder %v5573_v30, 0 }
 0x176   : > { %v524_v6 = vpop.permute.xlu1 %523  ;;  %v514_v8 = vpop.permute.xlu0 %513 }
 0x177   : > { %v3970_v58 = vadd.f32 %v3815_v3, %v524_v6  ;;  %v3973_v1 = vadd.f32 %v3817_v4, %v524_v6  ;;  %v3976_v2 = vadd.f32 %v3819_v5, %v524_v6  ;;  %v607_v7 = vadd.f32 %v3815_v3, %v514_v8 }
 0x178   : > { %v3980_v13 = vadd.f32 %v3817_v4, %v514_v8  ;;  %v3983_v18 = vadd.f32 %v3819_v5, %v514_v8 }
 0x179   : > { %v3988_v63 = vmul.f32 0.2, %v3970_v58  ;;  %v3991_v55 = vmul.f32 0.2, %v3973_v1  ;;  %v655_v44 = vmul.f32 0.2, %v607_v7 }
 0x17a   : > { %v656_v43 = vmul.f32 0.2, %v3980_v13  ;;  %v3997_v8 = vmul.f32 0.2, %v3983_v18  ;;  %v529_v40 = vpop.permute.xlu1 %528  ;;  %v519_v0 = vpop.permute.xlu0 %518  ;;  %v4007_v6 = vmul.f32 0.2, %v3976_v2 }
 0x17b   : > { %v4012_v37 = vadd.f32 %v3815_v3, %v529_v40  ;;  %v4015_v36 = vadd.f32 %v3817_v4, %v529_v40  ;;  %v703_v35 = vmax.f32 %v607_v7, %v655_v44  ;;  %v4020_v33 = vadd.f32 %v3819_v5, %v529_v40 }
 0x17c   : > { %v4023_v39 = vadd.f32 %v3815_v3, %v519_v0  ;;  %v4038_v44 = vadd.f32 %v3817_v4, %v519_v0  ;;  %v4041_v40 = vadd.f32 %v3819_v5, %v519_v0  ;;  %v704_v7 = vmax.f32 %v3980_v13, %v656_v43 }
 0x17d   : > { %v4032_v26 = vmul.f32 0.2, %v4012_v37  ;;  %v4035_v24 = vmul.f32 0.2, %v4015_v36  ;;  %v4045_v61 = vmul.f32 0.2, %v4020_v33  ;;  %v705_v19 = vmax.f32 %v3983_v18, %v3997_v8 }
 0x17e   : > { %v4048_v10 = vmul.f32 0.2, %v4023_v39  ;;  %v539_v22 = vpop.permute.xlu1 %538  ;;  %v534_v20 = vpop.permute.xlu0 %533  ;;  %v4057_v16 = vmul.f32 0.2, %v4038_v44  ;;  %v4061_v43 = vsel %vm3951_vm12, %v703_v35, -1e+15  ;;  %v711_v28 = vmax.f32 %v3976_v2, %v4007_v6 }
 0x17f   : > { %5546 = vst [vmem:[#allocation38_spill] sm:$0xff] %v4061_v43  ;;  %v4070_v18 = vmul.f32 0.2, %v4041_v40  ;;  %v4073_v8 = vadd.f32 %v3815_v3, %v539_v22  ;;  %v4076_v0 = vadd.f32 %v3817_v4, %v539_v22  ;;  %v4079_v17 = vadd.f32 %v3819_v5, %v539_v22 }
 0x180   : > { %v4090_v48 = vadd.f32 %v3815_v3, %v534_v20  ;;  %v4093_v15 = vadd.f32 %v3817_v4, %v534_v20  ;;  %v4096_v9 = vadd.f32 %v3819_v5, %v534_v20  ;;  %v707_v12 = vmax.f32 %v4038_v44, %v4057_v16 }
 0x181   : > { %v4107_v11 = vmul.f32 0.2, %v4073_v8  ;;  %v4110_v56 = vmul.f32 0.2, %v4076_v0  ;;  %v4113_v54 = vmul.f32 0.2, %v4079_v17  ;;  %v5588_v13 = vmax.f32 %v3973_v1, %v3991_v55 }
 0x182   : > { %v549_v20 = vpop.permute.xlu1 %548  ;;  %v4134_v44 = vmul.f32 0.2, %v4090_v48  ;;  %v4137_v27 = vmul.f32 0.2, %v4093_v15  ;;  %v4147_v14 = vmul.f32 0.2, %v4096_v9  ;;  %v544_v47 = vpop.permute.xlu0 %543  ;;  %v5591_v55 = vmax.f32 %v4023_v39, %v4048_v10 }
 0x183   : > { %v4140_v53 = vadd.f32 %v3815_v3, %v549_v20  ;;  %v4150_v31 = vadd.f32 %v3817_v4, %v549_v20  ;;  %v4153_v51 = vadd.f32 %v3819_v5, %v549_v20  ;;  %v4164_v6 = vsel %vm4001_vm13, %v704_v7, -1e+15 }
 0x184   : > { %5563 = vst [vmem:[#allocation43_spill] sm:$0xff] %v4164_v6  ;;  %v1047_v46 = vmax.f32 %v4061_v43, %v4164_v6  ;;  %v4178_v42 = vsel %vm4027_vm14, %v705_v19, -1e+15  ;;  %v4181_v29 = vadd.f32 %v3815_v3, %v544_v47  ;;  %v4184_v7 = vadd.f32 %v3817_v4, %v544_v47 }
 0x185   : > { %5559 = vst [vmem:[#allocation39_spill] sm:$0xff] %v4140_v53  ;;  %5560 = vst [vmem:[#allocation40_spill] sm:$0xff] %v4150_v31  ;;  %v4160_v2 = vmul.f32 0.2, %v4140_v53  ;;  %v4169_v20 = vmul.f32 0.2, %v4150_v31  ;;  %v4187_v50 = vadd.f32 %v3819_v5, %v544_v47  ;;  %v5570_v6 = vunpack.c.1.s8 %v3854_v32 }
 0x186   : > { %5561 = vst [vmem:[#allocation41_spill] sm:$0xff] %v4153_v51  ;;  %v4172_v45 = vmul.f32 0.2, %v4153_v51  ;;  %v559_v49 = vpop.permute.xlu1 %558  ;;  %5566 = vst [vmem:[#allocation46_spill] sm:$0xff] %v4178_v42  ;;  %v1048_v41 = vmax.f32 %v1047_v46, %v4178_v42  ;;  %v4219_v32 = vmul.f32 0.2, %v4181_v29  ;;  %v5576_v46 = vunpack.c.0.s8 %v3870_v52  ;;  %v554_v31 = vpop.permute.xlu0 %553 }
 0x187   : > { %5562 = vst [vmem:[#allocation42_spill] sm:$0xff] %v4160_v2  ;;  %5564 = vst [vmem:[#allocation44_spill] sm:$0xff] %v4169_v20  ;;  %vm4197_vm6 = vcmp.ne.s32.totalorder %v5570_v6, 0  ;;  %v4214_v38 = vadd.f32 %v3817_v4, %v559_v49  ;;  %v4222_v30 = vmul.f32 0.2, %v4184_v7  ;;  %v4225_v34 = vadd.f32 %v3819_v5, %v559_v49 }
 0x188   : > { %5565 = vst [vmem:[#allocation45_spill] sm:$0xff] %v4172_v45  ;;  %v4211_v45 = vadd.f32 %v3815_v3, %v559_v49  ;;  %vm4229_vm8 = vcmp.ne.s32.totalorder %v5576_v46, 0  ;;  %v5579_v42 = vunpack.c.1.s8 %v3870_v52  ;;  %1049 = vmax.xlane.f32.xlu0 %v1048_v41  ;;  %v4240_v6 = vmul.f32 0.2, %v4187_v50 }
 0x189   : > { %v5582_v49 = vmax.f32 %v3970_v58, %v3988_v63  ;;  %v5584_v53 = vunpack.c.2.s8 %v3870_v52  ;;  %v4265_v63 = vmul.f32 0.2, %v4214_v38  ;;  %v4275_v52 = vmul.f32 0.2, %v4225_v34 }
 0x18a   : > { %vm4235_vm9 = vcmp.ne.s32.totalorder %v5579_v42, 0  ;;  %v4243_v20 = vmul.f32 0.2, %v4211_v45  ;;  %v708_v42 = vmax.f32 %v4041_v40, %v4070_v18  ;;  %v4272_v40 = vsel %vm4083_vm0, %v5588_v13, -1e+15  ;;  %v569_v58 = vpop.permute.xlu1 %568 }
 0x18b   : > { %v4250_v46 = vsel %vm4065_vm15, %v5582_v49, -1e+15  ;;  %vm4256_vm10 = vcmp.ne.s32.totalorder %v5584_v53, 0  ;;  %5587 = vst [vmem:[#allocation48_spill] sm:$0xff] %v4265_v63  ;;  %5589 = vst [vmem:[#allocation49_spill] sm:$0xff] %v4272_v40  ;;  %v4307_v10 = vadd.f32 %v3817_v4, %v554_v31  ;;  %v4310_v62 = vadd.f32 %v3819_v5, %v554_v31 }
 0x18c   : > { %5583 = vst [vmem:[#allocation47_spill] sm:$0xff] %v4250_v46  ;;  %v4281_v18 = vsel %vm4100_vm1, %v711_v28, -1e+15  ;;  %v1055_v49 = vmax.f32 %v4250_v46, %v4272_v40  ;;  %v4290_v1 = vsel %vm4117_vm2, %v5591_v55, -1e+15  ;;  %v4301_v28 = vadd.f32 %v3815_v3, %v554_v31  ;;  %v564_v40 = vpop.permute.xlu0 %563 }
 0x18d   : > { %5590 = vst [vmem:[#allocation50_spill] sm:$0xff] %v4281_v18  ;;  %5592 = vst [vmem:[#allocation51_spill] sm:$0xff] %v4290_v1  ;;  %v4294_v35 = vsel %vm4123_vm3, %v707_v12, -1e+15  ;;  %v4298_v22 = vsel %vm4129_vm4, %v708_v42, -1e+15  ;;  %v5595_v12 = vunpack.c.0.s8 %v3893_v57  ;;  %v5598_v16 = vunpack.c.1.s8 %v3893_v57 }
 0x18e   : > { %5593 = vst [vmem:[#allocation52_spill] sm:$0xff] %v4294_v35  ;;  %5594 = vst [vmem:[#allocation53_spill] sm:$0xff] %v4298_v22  ;;  %v1056_v13 = vmax.f32 %v1055_v49, %v4281_v18  ;;  %v1051_v39 = vmax.f32 %v4290_v1, %v4294_v35  ;;  %v4325_v49 = vmul.f32 0.2, %v4301_v28  ;;  %v4328_v55 = vadd.f32 %v3815_v3, %v569_v58 }
 0x18f   : > { %vm4314_vm11 = vcmp.ne.s32.totalorder %v5595_v12, 0  ;;  %vm4320_vm12 = vcmp.ne.s32.totalorder %v5598_v16, 0  ;;  %v4331_v31 = vadd.f32 %v3817_v4, %v569_v58  ;;  %v4334_v12 = vadd.f32 %v3819_v5, %v569_v58 }
 0x190   : > { %v5601_v53 = vunpack.c.2.s8 %v3893_v57  ;;  %1057 = vmax.xlane.f32.xlu0 %v1056_v13  ;;  %v1052_v16 = vmax.f32 %v1051_v39, %v4298_v22  ;;  %v4344_v18 = vmul.f32 0.2, %v4307_v10  ;;  %v4347_v35 = vmul.f32 0.2, %v4310_v62  ;;  %v5668_v13 = vld [vmem:[#allocation32_spill] sm:$0xff] }
 0x191   : > { %v714_v1 = vmax.f32 %v4020_v33, %v4045_v61  ;;  %v5604_v58 = vunpack.c.0.s8 %v3898_v59  ;;  %v5610_v39 = vunpack.c.2.s8 %v3898_v59  ;;  %v4372_v61 = vmul.f32 0.2, %v4328_v55 }
 0x192   : > { %vm4338_vm13 = vcmp.ne.s32.totalorder %v5601_v53, 0  ;;  %v5607_v53 = vunpack.c.1.s8 %v3898_v59  ;;  %1053 = vmax.xlane.f32.xlu1 %v1052_v16  ;;  %v5615_v46 = vmax.f32 %v4015_v36, %v4035_v24  ;;  %v717_v24 = vmax.f32 %v4096_v9, %v4147_v14  ;;  %v579_v36 = vpop.permute.xlu1 %578 }
 0x193   : > { %vm4353_vm14 = vcmp.ne.s32.totalorder %v5604_v58, 0  ;;  %vm4365_vm0 = vcmp.ne.s32.totalorder %v5610_v39, 0  ;;  %v4375_v58 = vmul.f32 0.2, %v4331_v31  ;;  %v5613_v39 = vmax.f32 %v4012_v37, %v4032_v26 }
 0x194   : > { %vm4359_vm15 = vcmp.ne.s32.totalorder %v5607_v53, 0  ;;  %v4378_v53 = vmul.f32 0.2, %v4334_v12  ;;  %v4394_v63 = vsel %vm4197_vm6, %v5615_v46, -1e+15  ;;  %v5618_v37 = vmax.f32 %v4090_v48, %v4134_v44 }
 0x195   : > { %v4387_v33 = vsel %vm4191_vm5, %v5613_v39, -1e+15  ;;  %5616 = vst [vmem:[#allocation55_spill] sm:$0xff] %v4394_v63  ;;  %v4398_v16 = vsel %vm4203_vm7, %v714_v1, -1e+15  ;;  %v5620_v19 = vmax.f32 %v4093_v15, %v4137_v27  ;;  %v4423_v1 = vadd.f32 %v3815_v3, %v564_v40 }
 0x196   : > { %5614 = vst [vmem:[#allocation54_spill] sm:$0xff] %v4387_v33  ;;  %5617 = vst [vmem:[#allocation56_spill] sm:$0xff] %v4398_v16  ;;  %v1059_v51 = vmax.f32 %v4387_v33, %v4394_v63  ;;  %v4413_v43 = vsel %vm4229_vm8, %v5618_v37, -1e+15  ;;  %v4426_v9 = vadd.f32 %v3817_v4, %v564_v40  ;;  %v4431_v48 = vsel %vm4256_vm10, %v717_v24, -1e+15 }
 0x197   : > { %5619 = vst [vmem:[#allocation57_spill] sm:$0xff] %v4413_v43  ;;  %v4420_v46 = vsel %vm4235_vm9, %v5620_v19, -1e+15  ;;  %5622 = vst [vmem:[#allocation59_spill] sm:$0xff] %v4431_v48  ;;  %v4436_v15 = vadd.f32 %v3819_v5, %v564_v40  ;;  %v5623_v27 = vunpack.c.0.s8 %v3903_v60  ;;  %v5626_v47 = vunpack.c.1.s8 %v3903_v60 }
 0x198   : > { %5621 = vst [vmem:[#allocation58_spill] sm:$0xff] %v4420_v46  ;;  %v1060_v14 = vmax.f32 %v1059_v51, %v4398_v16  ;;  %v1063_v44 = vmax.f32 %v4413_v43, %v4420_v46  ;;  %v4451_v41 = vmul.f32 0.2, %v4423_v1  ;;  %v4454_v51 = vmul.f32 0.2, %v4426_v9 }
 0x199   : > { %vm4440_vm1 = vcmp.ne.s32.totalorder %v5623_v27, 0  ;;  %vm4446_vm2 = vcmp.ne.s32.totalorder %v5626_v47, 0  ;;  %v4457_v40 = vadd.f32 %v3815_v3, %v579_v36  ;;  %v4460_v24 = vadd.f32 %v3817_v4, %v579_v36 }
 0x19a   : > { %v5631_v37 = vunpack.c.2.s8 %v3903_v60  ;;  %1061 = vmax.xlane.f32.xlu0 %v1060_v14  ;;  %v1064_v47 = vmax.f32 %v1063_v44, %v4431_v48  ;;  %v4472_v26 = vadd.f32 %v3819_v5, %v579_v36  ;;  %v720_v59 = vmax.f32 %v4079_v17, %v4113_v54 }
 0x19b   : > { %5629 = vst [vmem:[#allocation60_spill] sm:$0xff] %v4457_v40  ;;  %5630 = vst [vmem:[#allocation61_spill] sm:$0xff] %v4460_v24  ;;  %v5635_v46 = vunpack.c.0.s8 %v3915_v21  ;;  %v4489_v14 = vmul.f32 0.2, %v4436_v15  ;;  %v4496_v54 = vmul.f32 0.2, %v4457_v40  ;;  %v5642_v44 = vunpack.c.2.s8 %v3915_v21 }
 0x19c   : > { %vm4464_vm3 = vcmp.ne.s32.totalorder %v5631_v37, 0  ;;  %5634 = vst [vmem:[#allocation62_spill] sm:$0xff] %v4472_v26  ;;  %v5638_v37 = vunpack.c.1.s8 %v3915_v21  ;;  %1065 = vmax.xlane.f32.xlu1 %v1064_v47  ;;  %v4505_v27 = vmul.f32 0.2, %v4460_v24  ;;  %v5646_v36 = vmax.f32 %v4073_v8, %v4107_v11  ;;  %v5705_v24 = vld [vmem:[#allocation39_spill] sm:$0xff] }
 0x19d   : > { %vm4478_vm4 = vcmp.ne.s32.totalorder %v5635_v46, 0  ;;  %5641 = vst [vmem:[#allocation63_spill] sm:$0xff] %v4496_v54  ;;  %v574_v46 = vpop.permute.xlu0 %573  ;;  %vm4500_vm6 = vcmp.ne.s32.totalorder %v5642_v44, 0  ;;  %v5648_v48 = vmax.f32 %v4076_v0, %v4110_v56  ;;  %v723_v47 = vmax.f32 %v4187_v50, %v4240_v6  ;;  %v5650_v44 = vld [vmem:[#allocation31_spill] sm:$0xff]  ;;  %v589_v50 = vpop.permute.xlu1 %588 }
 0x19e   : > { %vm4484_vm5 = vcmp.ne.s32.totalorder %v5638_v37, 0  ;;  %5645 = vst [vmem:[#allocation64_spill] sm:$0xff] %v4505_v27  ;;  %v4512_v17 = vsel %vm4314_vm11, %v5646_v36, -1e+15  ;;  %v5651_v16 = vunpack.c.0.s8 %v5650_v44  ;;  %v4530_v8 = vmul.f32 0.2, %v4472_v26 }
 0x19f   : > { %5647 = vst [vmem:[#allocation65_spill] sm:$0xff] %v4512_v17  ;;  %v4519_v21 = vsel %vm4320_vm12, %v5648_v48, -1e+15  ;;  %v4536_v56 = vsel %vm4338_vm13, %v720_v59, -1e+15  ;;  %v5656_v6 = vunpack.c.1.s8 %v5650_v44  ;;  %v5659_v42 = vmax.f32 %v4181_v29, %v4219_v32 }
 0x1a0   : > { %5649 = vst [vmem:[#allocation66_spill] sm:$0xff] %v4519_v21  ;;  %vm4525_vm7 = vcmp.ne.s32.totalorder %v5651_v16, 0  ;;  %5654 = vst [vmem:[#allocation31_spill] sm:$0xff] %v4530_v8  ;;  %v1067_v0 = vmax.f32 %v4512_v17, %v4519_v21  ;;  %v5661_v25 = vmax.f32 %v4184_v7, %v4222_v30  ;;  %v4562_v48 = vsel %vm4365_vm0, %v723_v47, -1e+15  ;;  %v5682_v17 = vld [vmem:[#allocation45_spill] sm:$0xff] }
 0x1a1   : > { %5655 = vst [vmem:[#allocation67_spill] sm:$0xff] %v4536_v56  ;;  %vm4542_vm8 = vcmp.ne.s32.totalorder %v5656_v6, 0  ;;  %v4551_v16 = vsel %vm4353_vm14, %v5659_v42, -1e+15  ;;  %5663 = vst [vmem:[#allocation70_spill] sm:$0xff] %v4562_v48  ;;  %v4565_v36 = vadd.f32 %v3815_v3, %v574_v46  ;;  %v4571_v57 = vadd.f32 %v3817_v4, %v574_v46 }
 0x1a2   : > { %5660 = vst [vmem:[#allocation68_spill] sm:$0xff] %v4551_v16  ;;  %v4558_v59 = vsel %vm4359_vm15, %v5661_v25, -1e+15  ;;  %v1068_v29 = vmax.f32 %v1067_v0, %v4536_v56  ;;  %v4574_v7 = vadd.f32 %v3819_v5, %v574_v46  ;;  %v5665_v30 = vunpack.c.2.s8 %v5650_v44 }
 0x1a3   : > { %5662 = vst [vmem:[#allocation69_spill] sm:$0xff] %v4558_v59  ;;  %v1071_v32 = vmax.f32 %v4551_v16, %v4558_v59  ;;  %v5669_v47 = vunpack.c.0.s8 %v5668_v13  ;;  %v5672_v0 = vunpack.c.1.s8 %v5668_v13  ;;  %v4595_v46 = vmul.f32 0.2, %v4565_v36 }
 0x1a4   : > { %5664 = vst [vmem:[#allocation71_spill] sm:$0xff] %v4574_v7  ;;  %vm4578_vm9 = vcmp.ne.s32.totalorder %v5665_v30, 0  ;;  %v4598_v44 = vadd.f32 %v3815_v3, %v589_v50  ;;  %v4601_v25 = vadd.f32 %v3817_v4, %v589_v50  ;;  %v4604_v30 = vadd.f32 %v3819_v5, %v589_v50  ;;  %1069 = vmax.xlane.f32.xlu0 %v1068_v29 }
 0x1a5   : > { %vm4584_vm10 = vcmp.ne.s32.totalorder %v5669_v47, 0  ;;  %vm4590_vm11 = vcmp.ne.s32.totalorder %v5672_v0, 0  ;;  %v5675_v47 = vld [vmem:[#allocation33_spill] sm:$0xff]  ;;  %v1072_v21 = vmax.f32 %v1071_v32, %v4562_v48  ;;  %v4622_v50 = vmul.f32 0.2, %v4571_v57 }
 0x1a6   : > { %v5676_v11 = vunpack.c.0.s8 %v5675_v47  ;;  %v5679_v0 = vunpack.c.1.s8 %v5675_v47  ;;  %v5684_v26 = vunpack.c.2.s8 %v5668_v13  ;;  %v5685_v8 = vmov 0  ;;  %v584_v13 = vpop.permute.xlu0 %583 }
 0x1a7   : > { %v5689_v40 = vmov 0  ;;  %v4639_v29 = vmul.f32 0.2, %v4574_v7  ;;  %v739_v32 = vmax.f32 %v4565_v36, %v4595_v46  ;;  %v5697_v48 = vmov 0  ;;  %v5700_v36 = vld [vmem:[#allocation35_spill] sm:$0xff]  ;;  %1073 = vmax.xlane.f32.xlu1 %v1072_v21  ;;  %v5709_v7 = vld [vmem:[#allocation44_spill] sm:$0xff] }
 0x1a8   : > { %vm4608_vm12 = vcmp.ne.s32.totalorder %v5676_v11, 0  ;;  %vm4614_vm13 = vcmp.ne.s32.totalorder %v5679_v0, 0  ;;  %v5683_v11 = vld [vmem:[#allocation41_spill] sm:$0xff]  ;;  %vm4628_vm14 = vcmp.ne.s32.totalorder %v5684_v26, 0  ;;  %v5687_v0 = vld [vmem:[#allocation34_spill] sm:$0xff]  ;;  %v5701_v46 = vunpack.c.0.s8 %v5700_v36 }
 0x1a9   : > { %v726_v33 = vmax.f32 %v5683_v11, %v5682_v17  ;;  %v5686_v8 = vsel %vm4628_vm14, 4294967295, %v5685_v8  ;;  %v5688_v54 = vunpack.c.0.s8 %v5687_v0  ;;  %v4644_v17 = vmul.f32 0.2, %v4598_v44 }
 0x1aa   : > { %v4647_v26 = vmul.f32 0.2, %v4601_v25  ;;  %v5692_v11 = vunpack.c.2.s8 %v5675_v47  ;;  %v5696_v56 = vunpack.c.1.s8 %v5687_v0  ;;  %vm4663_vm14 = vcmp.ne.s32.totalorder %v5701_v46, 0 }
 0x1ab   : > { %vm4634_vm15 = vcmp.ne.s32.totalorder %v5688_v54, 0  ;;  %v5693_v54 = vmov 0  ;;  %v5702_v27 = vmov 0  ;;  %v740_v47 = vmax.f32 %v4571_v57, %v4622_v50  ;;  %v5717_v50 = vld [vmem:[#allocation36_spill] sm:$0xff] }
 0x1ac   : > { %v5690_v40 = vsel %vm4634_vm15, 4294967295, %v5689_v40  ;;  %vm4651_vm0 = vcmp.ne.s32.totalorder %v5692_v11, 0  ;;  %vm4657_vm15 = vcmp.ne.s32.totalorder %v5696_v56, 0  ;;  %v5703_v27 = vsel %vm4663_vm14, 4294967295, %v5702_v27 }
 0x1ad   : > { %5691 = vst [vmem:[#allocation32_spill] sm:$0xff] %v5690_v40  ;;  %v5694_v54 = vsel %vm4651_vm0, 4294967295, %v5693_v54  ;;  %v5698_v48 = vsel %vm4657_vm15, 4294967295, %v5697_v48  ;;  %5704 = vst [vmem:[#allocation41_spill] sm:$0xff] %v5703_v27  ;;  %v4670_v11 = vmul.f32 0.2, %v4604_v30  ;;  %v5711_v21 = vunpack.c.1.s8 %v5700_v36 }
 0x1ae   : > { %5695 = vst [vmem:[#allocation33_spill] sm:$0xff] %v5694_v54  ;;  %5699 = vst [vmem:[#allocation45_spill] sm:$0xff] %v5698_v48  ;;  %v5706_v54 = vld [vmem:[#allocation42_spill] sm:$0xff]  ;;  %v5708_v48 = vld [vmem:[#allocation40_spill] sm:$0xff]  ;;  %v4696_v2 = vsel %vm4464_vm3, %v726_v33, -1e+15  ;;  %v729_v39 = vmax.f32 %v4310_v62, %v4347_v35  ;;  %v5721_v33 = vmax.f32 %v4301_v28, %v4325_v49  ;;  %v5722_v35 = vmax.f32 %v4307_v10, %v4344_v18 }
 0x1af   : > { %v5707_v40 = vmax.f32 %v5705_v24, %v5706_v54  ;;  %v5710_v46 = vmax.f32 %v5708_v48, %v5709_v7  ;;  %vm4688_vm14 = vcmp.ne.s32.totalorder %v5711_v21, 0  ;;  %v748_v24 = vmax.f32 %v4598_v44, %v4644_v17  ;;  %v5726_v28 = vld [vmem:[#allocation37_spill] sm:$0xff] }
 0x1b0   : > { %v5714_v48 = vunpack.c.2.s8 %v5687_v0  ;;  %v5718_v54 = vunpack.c.0.s8 %v5717_v50  ;;  %v4719_v19 = vsel %vm4478_vm4, %v5721_v33, -1e+15  ;;  %v4726_v62 = vsel %vm4484_vm5, %v5722_v35, -1e+15 }
 0x1b1   : > { %v4677_v56 = vsel %vm4440_vm1, %v5707_v40, -1e+15  ;;  %v4684_v27 = vsel %vm4446_vm2, %v5710_v46, -1e+15  ;;  %v649_v0 = vadd.f32 %v3815_v3, %v584_v13  ;;  %v650_v17 = vadd.f32 %v3817_v4, %v584_v13 }
 0x1b2   : > { %v1075_v40 = vmax.f32 %v4677_v56, %v4684_v27  ;;  %vm4704_vm1 = vcmp.ne.s32.totalorder %v5714_v48, 0  ;;  %vm4710_vm2 = vcmp.ne.s32.totalorder %v5718_v54, 0  ;;  %v5723_v46 = vunpack.c.1.s8 %v5717_v50 }
 0x1b3   : > { %v5727_v49 = vunpack.c.0.s8 %v5726_v28  ;;  %v4745_v10 = vsel %vm4500_vm6, %v729_v39, -1e+15  ;;  %v1079_v3 = vmax.f32 %v4719_v19, %v4726_v62  ;;  %v651_v4 = vadd.f32 %v3819_v5, %v584_v13 }
 0x1b4   : > { %vm4732_vm3 = vcmp.ne.s32.totalorder %v5723_v46, 0  ;;  %v1076_v18 = vmax.f32 %v1075_v40, %v4696_v2  ;;  %v5730_v43 = vunpack.c.1.s8 %v5726_v28  ;;  %v5731_v48 = vmov 0  ;;  %v5748_v59 = vld [vmem:[#allocation32_spill] sm:$0xff] }
 0x1b5   : > { %vm4738_vm4 = vcmp.ne.s32.totalorder %v5727_v49, 0  ;;  %v697_v54 = vmul.f32 0.2, %v649_v0  ;;  %v698_v33 = vmul.f32 0.2, %v650_v17  ;;  %v732_v40 = vmax.f32 %v4225_v34, %v4275_v52 }
 0x1b6   : > { %vm4752_vm5 = vcmp.ne.s32.totalorder %v5730_v43, 0  ;;  %v5733_v37 = vmax.f32 %v4211_v45, %v4243_v20  ;;  %v5734_v5 = vunpack.c.2.s8 %v5700_v36  ;;  %v5737_v35 = vunpack.c.2.s8 %v5717_v50  ;;  %1077 = vmax.xlane.f32.xlu0 %v1076_v18  ;;  %v5740_v20 = vld [vmem:[#allocation48_spill] sm:$0xff]  ;;  %v5753_v18 = vld [vmem:[#allocation63_spill] sm:$0xff] }
 0x1b7   : > { %v5732_v48 = vsel %vm4752_vm5, 4294967295, %v5731_v48  ;;  %v749_v34 = vmax.f32 %v4601_v25, %v4647_v26  ;;  %v1080_v45 = vmax.f32 %v1079_v3, %v4745_v10  ;;  %v5741_v63 = vmax.f32 %v4214_v38, %v5740_v20  ;;  %v5760_v20 = vld [vmem:[#allocation64_spill] sm:$0xff] }
 0x1b8   : > { %v4763_v39 = vsel %vm4525_vm7, %v5733_v37, -1e+15  ;;  %vm4767_vm6 = vcmp.ne.s32.totalorder %v5734_v5, 0  ;;  %vm4773_vm5 = vcmp.ne.s32.totalorder %v5737_v35, 0  ;;  %v735_v36 = vmax.f32 %v4436_v15, %v4489_v14  ;;  %v5758_v5 = vld [vmem:[#allocation62_spill] sm:$0xff] }
 0x1b9   : > { %v4785_v52 = vsel %vm4542_vm8, %v5741_v63, -1e+15  ;;  %v699_v50 = vmul.f32 0.2, %v651_v4  ;;  %v745_v49 = vmax.f32 %v649_v0, %v697_v54  ;;  %v746_v43 = vmax.f32 %v650_v17, %v698_v33  ;;  %1081 = vmax.xlane.f32.xlu1 %v1080_v45  ;;  %v5752_v17 = vld [vmem:[#allocation60_spill] sm:$0xff]  ;;  %v5755_v54 = vld [vmem:[#allocation41_spill] sm:$0xff] }
 0x1ba   : > { %v1083_v37 = vmax.f32 %v4763_v39, %v4785_v52  ;;  %v4793_v25 = vsel %vm4578_vm9, %v732_v40, -1e+15  ;;  %v5742_v38 = vmax.f32 %v4423_v1, %v4451_v41  ;;  %v5743_v15 = vmax.f32 %v4426_v9, %v4454_v51  ;;  %v5757_v40 = vld [vmem:[#allocation31_spill] sm:$0xff]  ;;  %v5759_v45 = vld [vmem:[#allocation61_spill] sm:$0xff] }
 0x1bb   : > { %v738_v26 = vmax.f32 %v4334_v12, %v4378_v53  ;;  %v5744_v1 = vmax.f32 %v4328_v55, %v4372_v61  ;;  %v5745_v9 = vmax.f32 %v4331_v31, %v4375_v58  ;;  %vm5746_vm7 = vnez %v5686_v8  ;;  %v5747_v55 = vld [vmem:[#allocation71_spill] sm:$0xff]  ;;  %v5766_v8 = vld [vmem:[#allocation46_spill] sm:$0xff] }
 0x1bc   : > { %v4800_v23 = vsel %vm4584_vm10, %v5742_v38, -1e+15  ;;  %v4807_v14 = vsel %vm4590_vm11, %v5743_v15, -1e+15  ;;  %v1084_v22 = vmax.f32 %v1083_v37, %v4793_v25  ;;  %v4830_v12 = vsel %vm5746_vm7, %v735_v36, -1e+15 }
 0x1bd   : > { %v1087_v0 = vmax.f32 %v4800_v23, %v4807_v14  ;;  %v4819_v41 = vsel %vm4608_vm12, %v5744_v1, -1e+15  ;;  %v4826_v51 = vsel %vm4614_vm13, %v5745_v9, -1e+15  ;;  %v741_v61 = vmax.f32 %v5747_v55, %v4639_v29  ;;  %v2889_v1 = vld [vmem:[#allocation8 + $0x50] sm:$0xff]  }
 0x1be   : > { %v1091_v53 = vmax.f32 %v4819_v41, %v4826_v51  ;;  %vm5749_vm8 = vnez %v5748_v59  ;;  %1085 = vmax.xlane.f32.xlu0 %v1084_v22  ;;  %v4843_v16 = vsel %vm4651_vm0, %v738_v26, -1e+15  ;;  %v4847_v42 = vsel %vm4657_vm15, %v740_v47, -1e+15  ;;  %v2891_v9 = vld [vmem:[#allocation8 + $0x90] sm:$0xff]  }
 0x1bf   : > { %v4838_v6 = vsel %vm5749_vm8, %v739_v32, -1e+15  ;;  %v1088_v31 = vmax.f32 %v1087_v0, %v4830_v12  ;;  %v5754_v3 = vmax.f32 %v5752_v17, %v5753_v18  ;;  %vm5756_vm9 = vnez %v5755_v54  ;;  %v2888_v0 = vld [vmem:[#allocation8 + $0x88] sm:$0xff]  }
 0x1c0   : > { %v1092_v32 = vmax.f32 %v1091_v53, %v4843_v16  ;;  %v1095_v33 = vmax.f32 %v4838_v6, %v4847_v42  ;;  %v744_v35 = vmax.f32 %v5758_v5, %v5757_v40  ;;  %v5761_v63 = vmax.f32 %v5759_v45, %v5760_v20  ;;  %v2890_v53 = vld [vmem:[#allocation8 + $0x10] sm:$0xff]   ;;  %v5769_v20 = vld [vmem:[#allocation51_spill] sm:$0xff] }
 0x1c1   : > { %v4854_v29 = vsel %vm5756_vm9, %v5754_v3, -1e+15  ;;  %1089 = vmax.xlane.f32.xlu1 %v1088_v31  ;;  %v4870_v36 = vsel %vm4704_vm1, %v741_v61, -1e+15  ;;  %v747_v38 = vmax.f32 %v651_v4, %v699_v50  ;;  %v4876_v15 = vsel %vm4710_vm2, %v745_v49, -1e+15 }
 0x1c2   : > { %v4866_v47 = vsel %vm4688_vm14, %v5761_v63, -1e+15  ;;  %v1096_v26 = vmax.f32 %v1095_v33, %v4870_v36  ;;  %v4881_v57 = vsel %vm4732_vm3, %v746_v43, -1e+15  ;;  %v4885_v22 = vsel %vm4738_vm4, %v748_v24, -1e+15  ;;  %1093 = vmax.xlane.f32.xlu0 %v1092_v32 }
 0x1c3   : > { %v1099_v37 = vmax.f32 %v4854_v29, %v4866_v47  ;;  %v1103_v7 = vmax.f32 %v4876_v15, %v4881_v57  ;;  %vm5762_vm10 = vnez %v5732_v48  ;;  %v4895_v44 = vsel %vm4767_vm6, %v744_v35, -1e+15  ;;  %v2883_v49 = vld [vmem:[#allocation8 + $0x40] sm:$0xff]   ;;  %v2886_v43 = vld [vmem:[#allocation8 + $0x48] sm:$0xff]   ;;  %v5768_v5 = vld [vmem:[#allocation49_spill] sm:$0xff] }
 0x1c4   : > { %v4891_v4 = vsel %vm5762_vm10, %v749_v34, -1e+15  ;;  %v4899_v21 = vsel %vm4773_vm5, %v747_v38, -1e+15  ;;  %v750_v24 = vmax.f32 %v4604_v30, %v4670_v11  ;;  %v5763_v48 = vunpack.c.2.s8 %v5726_v28  ;;  %v2884_v30 = vld [vmem:[#allocation8] sm:$0xff]   ;;  %2595 = vmatprep.subr.bf16.mxu0 %v2883_v49  ;;  %v2887_v28 = vld [vmem:[#allocation8 + $0x8] sm:$0xff]  }
 0x1c5   : > { %1097 = vmax.xlane.f32.xlu1 %v1096_v26  ;;  %v1100_v60 = vmax.f32 %v1099_v37, %v4895_v44  ;;  %v1104_v50 = vmax.f32 %v1103_v7, %v4899_v21  ;;  %v1107_v13 = vmax.f32 %v4885_v22, %v4891_v4  ;;  %v2885_v11 = vld [vmem:[#allocation8 + $0x80] sm:$0xff]   ;;  %2596 = vmatpush3.bf16.msra.mxu0 %v2884_v30  ;;  %v5770_v37 = vld [vmem:[#allocation52_spill] sm:$0xff]  ;;  %v5771_v26 = vld [vmem:[#allocation53_spill] sm:$0xff] }
 0x1c6   : > { %vm998_vm11 = vcmp.ne.s32.totalorder %v5763_v48, 0  ;;  %2691 = vmatprep.subr.bf16.mxu1 %v2885_v11  ;;  %2597 = vmatprep.subr.bf16.mxu0 %v2886_v43  ;;  %v5764_v61 = vld [vmem:[#allocation38_spill] sm:$0xff]  ;;  %v5765_v31 = vld [vmem:[#allocation43_spill] sm:$0xff] }
 0x1c7   : > { %1101 = vmax.xlane.f32.xlu0 %v1100_v60  ;;  %v4909_v34 = vsel %vm998_vm11, %v750_v24, -1e+15  ;;  %2692 = vmatpush3.bf16.msra.mxu1 %v2885_v11  ;;  %v5767_v33 = vld [vmem:[#allocation47_spill] sm:$0xff]  ;;  %v5772_v60 = vld [vmem:[#allocation50_spill] sm:$0xff] }
 0x1c8   : > { %v1108_v46 = vmax.f32 %v1107_v13, %v4909_v34  ;;  %2693 = vmatprep.subr.bf16.mxu1 %v2888_v0  ;;  %v5773_v43 = vld [vmem:[#allocation54_spill] sm:$0xff] }
 0x1c9   : > { %1105 = vmax.xlane.f32.xlu1 %v1104_v50  ;;  %2598 = vmatpush3.bf16.msra.mxu0 %v2887_v28 }
 0x1ca   : > { %2599 = vmatprep.subr.bf16.mxu0 %v2889_v1 }
 0x1cb   : > { %1109 = vmax.xlane.f32.xlu0 %v1108_v46  ;;  %2694 = vmatpush3.bf16.msra.mxu1 %v2888_v0 }
 0x1cc   : > { %2695 = vmatprep.subr.bf16.mxu1 %v2891_v9 }
 0x1cd   : > { %2600 = vmatpush3.bf16.msra.mxu0 %v2890_v53 }
 0x1cf   : > { %2696 = vmatpush3.bf16.msra.mxu1 %v2891_v9  ;;  %v5774_v9 = vld [vmem:[#allocation55_spill] sm:$0xff] }
 0x215   : > { %v1050_v55 = vpop.xlane.xlu0 %1049 }
 0x216   : > { %v1111_v59 = vsub.f32 %v5764_v61, %v1050_v55  ;;  %v1112_v58 = vsub.f32 %v5765_v31, %v1050_v55  ;;  %v1113_v17 = vsub.f32 %v5766_v8, %v1050_v55  ;;  %v5775_v55 = vld [vmem:[#allocation56_spill] sm:$0xff]  ;;  %v5776_v31 = vld [vmem:[#allocation57_spill] sm:$0xff]  ;;  %v5777_v8 = vld [vmem:[#allocation58_spill] sm:$0xff] }
 0x218   : > { %v1159_v18 = vmul.f32 1.442695, %v1111_v59  ;;  %v1161_v3 = vmul.f32 1.442695, %v1112_v58  ;;  %v1163_v54 = vmul.f32 1.442695, %v1113_v17 }
 0x21a   : > { %2915 = vpow2.f32 %v1159_v18  ;;  %v5778_v18 = vld [vmem:[#allocation59_spill] sm:$0xff] }
 0x21b   : > { %2917 = vpow2.f32 %v1161_v3 }
 0x21c   : > { %2919 = vpow2.f32 %v1163_v54 }
 0x21d   : > { %v1058_v32 = vpop.xlane.xlu0 %1057 }
 0x21e   : > { %v1117_v40 = vsub.f32 %v5767_v33, %v1058_v32  ;;  %v1118_v35 = vsub.f32 %v5768_v5, %v1058_v32  ;;  %v1119_v50 = vsub.f32 %v5772_v60, %v1058_v32 }
 0x21f   : > { %v1054_v45 = vpop.xlane.xlu1 %1053 }
 0x220   : > { %v1114_v63 = vsub.f32 %v5769_v20, %v1054_v45  ;;  %v1115_v38 = vsub.f32 %v5770_v37, %v1054_v45  ;;  %v1116_v7 = vsub.f32 %v5771_v26, %v1054_v45  ;;  %v1171_v24 = vmul.f32 1.442695, %v1117_v40  ;;  %v5779_v26 = vld [vmem:[#allocation65_spill] sm:$0xff] }
 0x221   : > { %v1173_v48 = vmul.f32 1.442695, %v1118_v35  ;;  %v1175_v11 = vmul.f32 1.442695, %v1119_v50  ;;  %v5780_v50 = vld [vmem:[#allocation66_spill] sm:$0xff] }
 0x222   : > { %v1165_v13 = vmul.f32 1.442695, %v1114_v63  ;;  %v1167_v46 = vmul.f32 1.442695, %v1115_v38  ;;  %2921 = vpow2.f32 %v1171_v24  ;;  %v1169_v49 = vmul.f32 1.442695, %v1116_v7 }
 0x223   : > { %2923 = vpow2.f32 %v1173_v48 }
 0x224   : > { %2925 = vpow2.f32 %v1165_v13  ;;  %v4922_v28 = vpop.eup %2915  ;;  %v5781_v13 = vld [vmem:[#allocation67_spill] sm:$0xff] }
 0x225   : > { %2927 = vpow2.f32 %v1167_v46  ;;  %v4926_v59 = vpop.eup %2917 }
 0x226   : > { %2929 = vpow2.f32 %v1169_v49  ;;  %v1255_v32 = vadd.f32 %v4926_v59, %v4922_v28  ;;  %v4933_v33 = vpop.eup %2919 }
 0x227   : > { %v1062_v30 = vpop.xlane.xlu0 %1061  ;;  %2931 = vpow2.f32 %v1175_v11 }
 0x228   : > { %v1120_v0 = vsub.f32 %v5773_v43, %v1062_v30  ;;  %v1121_v53 = vsub.f32 %v5774_v9, %v1062_v30  ;;  %v1122_v61 = vsub.f32 %v5775_v55, %v1062_v30  ;;  %v1256_v20 = vadd.f32 %v4933_v33, %v1255_v32  ;;  %v5782_v30 = vld [vmem:[#allocation68_spill] sm:$0xff]  ;;  %v5783_v43 = vld [vmem:[#allocation69_spill] sm:$0xff] }
 0x229   : > { %v1066_v1 = vpop.xlane.xlu1 %1065 }
 0x22a   : > { %v1123_v58 = vsub.f32 %v5776_v31, %v1066_v1  ;;  %v1124_v17 = vsub.f32 %v5777_v8, %v1066_v1  ;;  %v1125_v3 = vsub.f32 %v5778_v18, %v1066_v1  ;;  %v1177_v54 = vmul.f32 1.442695, %v1120_v0  ;;  %1257 = vadd.xlane.f32.xlu1 %v1256_v20  ;;  %v5784_v1 = vld [vmem:[#allocation70_spill] sm:$0xff] }
 0x22b   : > { %v1179_v45 = vmul.f32 1.442695, %v1121_v53  ;;  %v1181_v63 = vmul.f32 1.442695, %v1122_v61 }
 0x22c   : > { %v1183_v40 = vmul.f32 1.442695, %v1123_v58  ;;  %v1185_v5 = vmul.f32 1.442695, %v1124_v17  ;;  %v1187_v35 = vmul.f32 1.442695, %v1125_v3  ;;  %2933 = vpow2.f32 %v1177_v54  ;;  %v4936_v38 = vpop.eup %2921 }
 0x22d   : > { %v4939_v24 = vpop.eup %2923 }
 0x22e   : > { %2935 = vpow2.f32 %v1183_v40  ;;  %v4943_v49 = vpop.eup %2925  ;;  %v1263_v3 = vadd.f32 %v4939_v24, %v4936_v38 }
 0x22f   : > { %2937 = vpow2.f32 %v1185_v5  ;;  %v4948_v53 = vpop.eup %2927 }
 0x230   : > { %2939 = vpow2.f32 %v1187_v35  ;;  %v1259_v8 = vadd.f32 %v4948_v53, %v4943_v49  ;;  %v4952_v17 = vpop.eup %2929 }
 0x231   : > { %v1070_v37 = vpop.xlane.xlu0 %1069  ;;  %2941 = vpow2.f32 %v1179_v45  ;;  %v4957_v5 = vpop.eup %2931 }
 0x232   : > { %v1126_v7 = vsub.f32 %v5779_v26, %v1070_v37  ;;  %v1127_v48 = vsub.f32 %v5780_v50, %v1070_v37  ;;  %v1128_v46 = vsub.f32 %v5781_v13, %v1070_v37  ;;  %2943 = vpow2.f32 %v1181_v63 }
 0x233   : > { %v1260_v40 = vadd.f32 %v4952_v17, %v1259_v8  ;;  %v1264_v26 = vadd.f32 %v4957_v5, %v1263_v3  ;;  %v2893_v3 = vld [vmem:[#allocation8 + $0x18] sm:$0xff]  }
 0x234   : > { %v1074_v60 = vpop.xlane.xlu1 %1073  ;;  %v1189_v55 = vmul.f32 1.442695, %v1126_v7  ;;  %v1191_v18 = vmul.f32 1.442695, %v1127_v48  ;;  %v1193_v54 = vmul.f32 1.442695, %v1128_v46 }
 0x235   : > { %v1129_v11 = vsub.f32 %v5782_v30, %v1074_v60  ;;  %v1130_v0 = vsub.f32 %v5783_v43, %v1074_v60  ;;  %v1131_v9 = vsub.f32 %v5784_v1, %v1074_v60  ;;  %1261 = vadd.xlane.f32.xlu0 %v1260_v40  ;;  %1265 = vadd.xlane.f32.xlu1 %v1264_v26 }
 0x236   : > { %2945 = vpow2.f32 %v1189_v55  ;;  %v4960_v45 = vpop.eup %2933 }
 0x237   : > { %v1195_v61 = vmul.f32 1.442695, %v1129_v11  ;;  %v1197_v31 = vmul.f32 1.442695, %v1130_v0  ;;  %v1199_v58 = vmul.f32 1.442695, %v1131_v9 }
 0x238   : > { %v4965_v7 = vpop.eup %2935 }
 0x239   : > { %2947 = vpow2.f32 %v1195_v61  ;;  %v4970_v48 = vpop.eup %2937 }
 0x23a   : > { %2949 = vpow2.f32 %v1197_v31  ;;  %v1271_v43 = vadd.f32 %v4970_v48, %v4965_v7 }
 0x23b   : > { %2951 = vpow2.f32 %v1199_v58 }
 0x23c   : > { %2953 = vpow2.f32 %v1191_v18  ;;  %v2892_v18 = vld [vmem:[#allocation8 + $0x58] sm:$0xff]  }
 0x23d   : > { %2955 = vpow2.f32 %v1193_v54  ;;  %v2894_v54 = vld [vmem:[#allocation8 + $0x98] sm:$0xff]   ;;  %2601 = vmatprep.subr.bf16.mxu0 %v2892_v18 }
 0x23e   : > { %2697 = vmatprep.subr.bf16.mxu1 %v2894_v54  ;;  %2602 = vmatpush3.bf16.msra.mxu0 %v2893_v3 }
 0x23f   : > { %2698 = vmatpush3.bf16.msra.mxu1 %v2894_v54 }
 0x243   : > { %v1078_v32 = vpop.xlane.xlu0 %1077 }
 0x244   : > { %v1132_v35 = vsub.f32 %v4677_v56, %v1078_v32  ;;  %v1133_v63 = vsub.f32 %v4684_v27, %v1078_v32  ;;  %v1134_v37 = vsub.f32 %v4696_v2, %v1078_v32  ;;  %v4972_v27 = vpop.eup %2939 }
 0x245   : > { %v4976_v0 = vpop.eup %2941  ;;  %v1272_v61 = vadd.f32 %v4972_v27, %v1271_v43 }
 0x246   : > { %v1082_v20 = vpop.xlane.xlu1 %1081  ;;  %v1201_v13 = vmul.f32 1.442695, %v1132_v35  ;;  %v1267_v26 = vadd.f32 %v4976_v0, %v4960_v45 }
 0x247   : > { %v1135_v60 = vsub.f32 %v4719_v19, %v1082_v20  ;;  %v1136_v50 = vsub.f32 %v4726_v62, %v1082_v20  ;;  %v1137_v56 = vsub.f32 %v4745_v10, %v1082_v20  ;;  %v1203_v19 = vmul.f32 1.442695, %v1133_v63  ;;  %v4978_v10 = vpop.eup %2943  ;;  %1273 = vadd.xlane.f32.xlu1 %v1272_v61 }
 0x248   : > { %2957 = vpow2.f32 %v1201_v13  ;;  %v1205_v62 = vmul.f32 1.442695, %v1134_v37  ;;  %v4986_v32 = vpop.eup %2945 }
 0x249   : > { %v1207_v2 = vmul.f32 1.442695, %v1135_v60  ;;  %v1209_v46 = vmul.f32 1.442695, %v1136_v50  ;;  %v1211_v30 = vmul.f32 1.442695, %v1137_v56 }
 0x24b   : > { %v1086_v11 = vpop.xlane.xlu0 %1085  ;;  %2959 = vpow2.f32 %v1207_v2 }
 0x24c   : > { %v1138_v9 = vsub.f32 %v4763_v39, %v1086_v11  ;;  %v1139_v55 = vsub.f32 %v4785_v52, %v1086_v11  ;;  %2961 = vpow2.f32 %v1209_v46  ;;  %v1140_v40 = vsub.f32 %v4793_v25, %v1086_v11  ;;  %v4989_v52 = vpop.eup %2947 }
 0x24d   : > { %2963 = vpow2.f32 %v1211_v30 }
 0x24e   : > { %v1090_v1 = vpop.xlane.xlu1 %1089  ;;  %2965 = vpow2.f32 %v1203_v19  ;;  %v1215_v63 = vmul.f32 1.442695, %v1139_v55  ;;  %v1217_v2 = vmul.f32 1.442695, %v1140_v40 }
 0x24f   : > { %v1141_v31 = vsub.f32 %v4800_v23, %v1090_v1  ;;  %v1142_v58 = vsub.f32 %v4807_v14, %v1090_v1  ;;  %v1143_v8 = vsub.f32 %v4830_v12, %v1090_v1  ;;  %v1094_v39 = vpop.xlane.xlu0 %1093  ;;  %v4991_v14 = vpop.eup %2949  ;;  %2967 = vpow2.f32 %v1205_v62 }
 0x250   : > { %v1213_v12 = vmul.f32 1.442695, %v1138_v9  ;;  %v4995_v25 = vpop.eup %2951  ;;  %v1144_v46 = vsub.f32 %v4819_v41, %v1094_v39  ;;  %v1145_v30 = vsub.f32 %v4826_v51, %v1094_v39 }
 0x251   : > { %v1219_v35 = vmul.f32 1.442695, %v1141_v31  ;;  %v1221_v20 = vmul.f32 1.442695, %v1142_v58  ;;  %v1223_v23 = vmul.f32 1.442695, %v1143_v8  ;;  %v5000_v13 = vpop.eup %2953 }
 0x252   : > { %v1098_v37 = vpop.xlane.xlu1 %1097  ;;  %v5006_v43 = vpop.eup %2955  ;;  %v1225_v61 = vmul.f32 1.442695, %v1144_v46  ;;  %v1227_v31 = vmul.f32 1.442695, %v1145_v30  ;;  %v1275_v54 = vadd.f32 %v5000_v13, %v4986_v32 }
 0x253   : > { %2969 = vpow2.f32 %v1219_v35  ;;  %v1147_v60 = vsub.f32 %v4838_v6, %v1098_v37  ;;  %v1148_v50 = vsub.f32 %v4847_v42, %v1098_v37  ;;  %v1149_v56 = vsub.f32 %v4870_v36, %v1098_v37  ;;  %v5010_v1 = vpop.eup %2957  ;;  %v2896_v35 = vld [vmem:[#allocation8 + $0x20] sm:$0xff]  }
 0x254   : > { %2971 = vpow2.f32 %v1221_v20  ;;  %v5004_v11 = vpop.xlane.xlu0 %1101  ;;  %v1146_v6 = vsub.f32 %v4843_v16, %v1094_v39  ;;  %v1268_v36 = vadd.f32 %v4978_v10, %v1267_v26  ;;  %v2895_v39 = vld [vmem:[#allocation8 + $0x60] sm:$0xff]   ;;  %v1276_v37 = vadd.f32 %v5006_v43, %v1275_v54 }
 0x255   : > { %2973 = vpow2.f32 %v1223_v23  ;;  %v1231_v19 = vmul.f32 1.442695, %v1147_v60  ;;  %v1233_v42 = vmul.f32 1.442695, %v1148_v50  ;;  %v1235_v9 = vmul.f32 1.442695, %v1149_v56  ;;  %v5014_v55 = vpop.eup %2959  ;;  %2603 = vmatprep.subr.bf16.mxu0 %v2895_v39 }
 0x256   : > { %2975 = vpow2.f32 %v1213_v12  ;;  %v1106_v62 = vpop.xlane.xlu1 %1105  ;;  %1269 = vadd.xlane.f32.xlu0 %v1268_v36  ;;  %v5016_v16 = vpop.eup %2961  ;;  %v1229_v58 = vmul.f32 1.442695, %v1146_v6  ;;  %v1150_v18 = vsub.f32 %v4854_v29, %v5004_v11  ;;  %v2897_v20 = vld [vmem:[#allocation8 + $0xa0] sm:$0xff]   ;;  %v1152_v12 = vsub.f32 %v4895_v44, %v5004_v11  ;;  %2604 = vmatpush3.bf16.msra.mxu0 %v2896_v35  ;;  %v2898_v39 = vld [vmem:[#allocation8 + $0x68] sm:$0xff]  }
 0x257   : > { %2977 = vpow2.f32 %v1215_v63  ;;  %v1153_v41 = vsub.f32 %v4876_v15, %v1106_v62  ;;  %v1154_v51 = vsub.f32 %v4881_v57, %v1106_v62  ;;  %v1155_v8 = vsub.f32 %v4899_v21, %v1106_v62  ;;  %v5021_v3 = vpop.eup %2963  ;;  %2699 = vmatprep.subr.bf16.mxu1 %v2897_v20  ;;  %v2899_v35 = vld [vmem:[#allocation8 + $0x28] sm:$0xff]   ;;  %2605 = vmatprep.subr.bf16.mxu0 %v2898_v39 }
 0x258   : > { %2979 = vpow2.f32 %v1217_v2  ;;  %v1151_v15 = vsub.f32 %v4866_v47, %v5004_v11  ;;  %v1279_v57 = vadd.f32 %v4991_v14, %v4989_v52  ;;  %v1110_v40 = vpop.xlane.xlu0 %1109  ;;  %v5029_v21 = vpop.eup %2965  ;;  %v1287_v26 = vadd.f32 %v5016_v16, %v5014_v55  ;;  %2700 = vmatpush3.bf16.msra.mxu1 %v2897_v20  ;;  %v2900_v20 = vld [vmem:[#allocation8 + $0xa8] sm:$0xff]  }
 0x259   : > { %2981 = vpow2.f32 %v1231_v19  ;;  %v1243_v29 = vmul.f32 1.442695, %v1153_v41  ;;  %v1245_v23 = vmul.f32 1.442695, %v1154_v51  ;;  %v5033_v63 = vpop.eup %2967  ;;  %v1247_v50 = vmul.f32 1.442695, %v1155_v8  ;;  %2701 = vmatprep.subr.bf16.mxu1 %v2900_v20 }
 0x25a   : > { %2983 = vpow2.f32 %v1233_v42  ;;  %v1280_v47 = vadd.f32 %v4995_v25, %v1279_v57  ;;  %v1237_v56 = vmul.f32 1.442695, %v1150_v18  ;;  %v1156_v2 = vsub.f32 %v4885_v22, %v1110_v40  ;;  %1277 = vadd.xlane.f32.xlu0 %v1276_v37  ;;  %2606 = vmatpush3.bf16.msra.mxu0 %v2899_v35 }
 0x25b   : > { %2985 = vpow2.f32 %v1235_v9  ;;  %v1157_v46 = vsub.f32 %v4891_v4, %v1110_v40  ;;  %v1288_v30 = vadd.f32 %v5021_v3, %v1287_v26  ;;  %v1283_v11 = vadd.f32 %v5029_v21, %v5010_v1 }
 0x25c   : > { %2987 = vpow2.f32 %v1225_v61  ;;  %1281 = vadd.xlane.f32.xlu1 %v1280_v47  ;;  %v1239_v6 = vmul.f32 1.442695, %v1151_v15  ;;  %v1241_v62 = vmul.f32 1.442695, %v1152_v12  ;;  %v1158_v36 = vsub.f32 %v4909_v34, %v1110_v40  ;;  %2702 = vmatpush3.bf16.msra.mxu1 %v2900_v20  ;;  %v2907_v20 = vld [vmem:[#allocation9] sm:$0xff]  }
 0x25d   : > { %v5039_v60 = vpop.eup %2969  ;;  %2989 = vpow2.f32 %v1227_v31  ;;  %v1284_v4 = vadd.f32 %v5033_v63, %v1283_v11  ;;  %v1249_v41 = vmul.f32 1.442695, %v1156_v2  ;;  %v1251_v61 = vmul.f32 1.442695, %v1157_v46 }
 0x25e   : > { %v5042_v44 = vpop.eup %2971  ;;  %2991 = vpow2.f32 %v1229_v58  ;;  %v1253_v18 = vmul.f32 1.442695, %v1158_v36 }
 0x25f   : > { %v5048_v19 = vpop.eup %2973  ;;  %2993 = vpow2.f32 %v1243_v29  ;;  %v1295_v22 = vadd.f32 %v5042_v44, %v5039_v60  ;;  %1285 = vadd.xlane.f32.xlu0 %v1284_v4 }
 0x260   : > { %v5052_v42 = vpop.eup %2975  ;;  %2995 = vpow2.f32 %v1245_v23  ;;  %1289 = vadd.xlane.f32.xlu1 %v1288_v30 }
 0x261   : > { %v5056_v9 = vpop.eup %2977  ;;  %2997 = vpow2.f32 %v1247_v50  ;;  %v1296_v31 = vadd.f32 %v5048_v19, %v1295_v22  ;;  %v2902_v22 = vld [vmem:[#allocation8 + $0x30] sm:$0xff]  }
 0x262   : > { %v5058_v51 = vpop.eup %2979  ;;  %2999 = vpow2.f32 %v1237_v56  ;;  %v1291_v58 = vadd.f32 %v5056_v9, %v5052_v42 }
 0x263   : > { %v5063_v8 = vpop.eup %2981  ;;  %3001 = vpow2.f32 %v1239_v6  ;;  %v2901_v6 = vld [vmem:[#allocation8 + $0x70] sm:$0xff]  }
 0x264   : > { %v5065_v34 = vpop.eup %2983  ;;  %3003 = vpow2.f32 %v1241_v62  ;;  %v1292_v15 = vadd.f32 %v5058_v51, %v1291_v58  ;;  %1297 = vadd.xlane.f32.xlu1 %v1296_v31  ;;  %v2903_v62 = vld [vmem:[#allocation8 + $0xb0] sm:$0xff]   ;;  %2607 = vmatprep.subr.bf16.mxu0 %v2901_v6 }
 0x265   : > { %v5068_v57 = vpop.eup %2985  ;;  %3005 = vpow2.f32 %v1249_v41  ;;  %v1303_v54 = vadd.f32 %v5065_v34, %v5063_v8  ;;  %2608 = vmatpush3.bf16.msra.mxu0 %v2902_v22  ;;  %2703 = vmatprep.subr.bf16.mxu1 %v2903_v62 }
 0x266   : > { %v5072_v40 = vpop.eup %2987  ;;  %3007 = vpow2.f32 %v1251_v61  ;;  %1293 = vadd.xlane.f32.xlu0 %v1292_v15  ;;  %2704 = vmatpush3.bf16.msra.mxu1 %v2903_v62  ;;  %v2905_v15 = vld [vmem:[#allocation8 + $0x38] sm:$0xff]  }
 0x267   : > { %v5074_v29 = vpop.eup %2989  ;;  %v1304_v23 = vadd.f32 %v5068_v57, %v1303_v54  ;;  %3009 = vpow2.f32 %v1253_v18  ;;  %v2904_v18 = vld [vmem:[#allocation8 + $0x78] sm:$0xff]  }
 0x268   : > { %v5077_v12 = vpop.eup %2991  ;;  %v1299_v47 = vadd.f32 %v5074_v29, %v5072_v40  ;;  %v2906_v54 = vld [vmem:[#allocation8 + $0xb8] sm:$0xff]   ;;  %2609 = vmatprep.subr.bf16.mxu0 %v2904_v18 }
 0x269   : > { %v5081_v37 = vpop.eup %2993  ;;  %1305 = vadd.xlane.f32.xlu1 %v1304_v23  ;;  %2705 = vmatprep.subr.bf16.mxu1 %v2906_v54 }
 0x26a   : > { %v5083_v26 = vpop.eup %2995  ;;  %v1300_v50 = vadd.f32 %v5077_v12, %v1299_v47  ;;  %2610 = vmatpush3.bf16.msra.mxu0 %v2905_v15  ;;  %2706 = vmatpush3.bf16.msra.mxu1 %v2906_v54 }
 0x26b   : > { %v5086_v56 = vpop.eup %2997  ;;  %v1311_v2 = vadd.f32 %v5083_v26, %v5081_v37  ;;  %2723 = vmatprep.subr.bf16.mxu1 %v2907_v20 }
 0x26c   : > { %v5090_v46 = vpop.eup %2999  ;;  %1301 = vadd.xlane.f32.xlu0 %v1300_v50 }
 0x26d   : > { %v5092_v30 = vpop.eup %3001  ;;  %v1312_v11 = vadd.f32 %v5086_v56, %v1311_v2 }
 0x26e   : > { %v5095_v36 = vpop.eup %3003  ;;  %v1307_v4 = vadd.f32 %v5092_v30, %v5090_v46 }
 0x26f   : > { %v5099_v41 = vpop.eup %3005  ;;  %1313 = vadd.xlane.f32.xlu1 %v1312_v11 }
 0x270   : > { %v5101_v61 = vpop.eup %3007  ;;  %v1308_v31 = vadd.f32 %v5095_v36, %v1307_v4 }
 0x271   : > { %v1315_v58 = vadd.f32 %v5101_v61, %v5099_v41  ;;  %v5106_v39 = vpop.eup %3009 }
 0x272   : > { %1309 = vadd.xlane.f32.xlu0 %v1308_v31 }
 0x273   : > { %v1316_v35 = vadd.f32 %v5106_v39, %v1315_v58 }
 0x276   : > { %1317 = vadd.xlane.f32.xlu0 %v1316_v35 }
 0x2b7   : > { %v1258_v23 = vpop.xlane.xlu1 %1257 }
 0x2b8   : > { %3011 = vrcp.f32 %v1258_v23 }
 0x2c2   : > { %v1262_v47 = vpop.xlane.xlu0 %1261  ;;  %v3012_v50 = vpop.eup %3011 }
 0x2c3   : > { %3013 = vrcp.f32 %v1262_v47  ;;  %v1266_v2 = vpop.xlane.xlu1 %1265  ;;  %v1336_v6 = vmul.f32 %v3012_v50, %v4926_v59  ;;  %v1337_v22 = vmul.f32 %v3012_v50, %v4933_v33  ;;  %v1335_v31 = vmul.f32 %v3012_v50, %v4922_v28 }
 0x2c4   : > { %3015 = vrcp.f32 %v1266_v2 }
 0x2cd   : > { %v3014_v11 = vpop.eup %3013 }
 0x2ce   : > { %v1339_v62 = vmul.f32 %v3014_v11, %v4948_v53  ;;  %v1340_v4 = vmul.f32 %v3014_v11, %v4952_v17  ;;  %v1338_v58 = vmul.f32 %v3014_v11, %v4943_v49  ;;  %v3016_v53 = vpop.eup %3015 }
 0x2cf   : > { %v1342_v49 = vmul.f32 %v3016_v53, %v4939_v24  ;;  %v1343_v50 = vmul.f32 %v3016_v53, %v4957_v5 }
 0x2d0   : > { %v1384_v18 = vpack.c.bf16 %v1339_v62, %v1336_v6  ;;  %v1385_v15 = vpack.c.bf16 %v1340_v4, %v1337_v22  ;;  %v1383_v54 = vpack.c.bf16 %v1338_v58, %v1335_v31  ;;  %v1341_v22 = vmul.f32 %v3016_v53, %v4936_v38  ;;  %v2909_v38 = vld [vmem:[#allocation9 + $0x10] sm:$0xff]  }
 0x2d2   : > { %1631 = vmatprep.mubr.bf16.mxu0 %v1384_v18  ;;  %2707 = vmatprep.mubr.bf16.mxu1 %v1385_v15  ;;  %v2908_v18 = vld [vmem:[#allocation9 + $0x8] sm:$0xff]  }
 0x2d3   : > { %1632 = vmatmul.mubr.bf16.vlgmr.msra.gmra.mrb[0].mxu0 %v1383_v54 }
 0x2d4   : > { %v1274_v35 = vpop.xlane.xlu1 %1273 }
 0x2e3   : > { %v1270_v23 = vpop.xlane.xlu0 %1269 }
 0x2e4   : > { %3017 = vrcp.f32 %v1270_v23 }
 0x2e5   : > { %3019 = vrcp.f32 %v1274_v35 }
 0x2e7   : > { %v1278_v33 = vpop.xlane.xlu0 %1277 }
 0x2e8   : > { %3021 = vrcp.f32 %v1278_v33 }
 0x2e9   : > { %v1282_v59 = vpop.xlane.xlu1 %1281 }
 0x2ea   : > { %3023 = vrcp.f32 %v1282_v59 }
 0x2ec   : > { %v1286_v28 = vpop.xlane.xlu0 %1285 }
 0x2ed   : > { %v1290_v17 = vpop.xlane.xlu1 %1289  ;;  %3025 = vrcp.f32 %v1286_v28 }
 0x2ee   : > { %v3018_v47 = vpop.eup %3017  ;;  %3027 = vrcp.f32 %v1290_v17 }
 0x2ef   : > { %v1345_v2 = vmul.f32 %v3018_v47, %v4976_v0  ;;  %v1346_v11 = vmul.f32 %v3018_v47, %v4978_v10  ;;  %v1344_v6 = vmul.f32 %v3018_v47, %v4960_v45  ;;  %v3020_v15 = vpop.eup %3019  ;;  %v2910_v47 = vld [vmem:[#allocation9 + $0x18] sm:$0xff]  }
 0x2f0   : > { %v1349_v5 = vmul.f32 %v3020_v15, %v4972_v27  ;;  %v1348_v45 = vmul.f32 %v3020_v15, %v4970_v48  ;;  %v1347_v17 = vmul.f32 %v3020_v15, %v4965_v7 }
 0x2f1   : > { %v1298_v62 = vpop.xlane.xlu1 %1297  ;;  %v1387_v31 = vpack.c.bf16 %v1345_v2, %v1342_v49  ;;  %v1388_v58 = vpack.c.bf16 %v1346_v11, %v1343_v50  ;;  %v1386_v54 = vpack.c.bf16 %v1344_v6, %v1341_v22 }
 0x2f2   : > { %v3022_v24 = vpop.eup %3021 }
 0x2f3   : > { %v1294_v4 = vpop.xlane.xlu0 %1293  ;;  %1639 = vmatprep.mubr.bf16.mxu0 %v1387_v31  ;;  %2708 = vmatmul.mubr.bf16.vlgmr.msra.gmra.mrb[0].mxu1 %v1388_v58  ;;  %v1352_v10 = vmul.f32 %v3022_v24, %v5006_v43  ;;  %v1351_v35 = vmul.f32 %v3022_v24, %v5000_v13  ;;  %v1350_v23 = vmul.f32 %v3022_v24, %v4986_v32 }
 0x2f4   : > { %3029 = vrcp.f32 %v1294_v4  ;;  %1640 = vmatmul.mubr.bf16.gmra.mrb[4].mxu0 %v1386_v54  ;;  %2724 = vmatpush3.bf16.msra.mxu1 %v2907_v20  ;;  %v3024_v0 = vpop.eup %3023 }
 0x2f5   : > { %2725 = vmatprep.subr.bf16.mxu1 %v2908_v18  ;;  %3031 = vrcp.f32 %v1298_v62  ;;  %v1391_v53 = vpack.c.bf16 %v1352_v10, %v1349_v5  ;;  %v1390_v20 = vpack.c.bf16 %v1351_v35, %v1348_v45  ;;  %v1355_v48 = vmul.f32 %v3024_v0, %v4995_v25 }
 0x2f6   : > { %v1306_v59 = vpop.xlane.xlu1 %1305  ;;  %v1354_v28 = vmul.f32 %v3024_v0, %v4991_v14  ;;  %v1389_v32 = vpack.c.bf16 %v1350_v23, %v1347_v17  ;;  %v1353_v4 = vmul.f32 %v3024_v0, %v4989_v52 }
 0x2f7   : > { %v3026_v27 = vpop.eup %3025  ;;  %2711 = vmatprep.mubr.bf16.mxu1 %v1391_v53  ;;  %1647 = vmatprep.mubr.bf16.mxu0 %v1390_v20 }
 0x2f8   : > { %2726 = vmatpush3.bf16.msra.mxu1 %v2908_v18  ;;  %v1358_v13 = vmul.f32 %v3026_v27, %v5033_v63  ;;  %v1357_v43 = vmul.f32 %v3026_v27, %v5029_v21  ;;  %v3028_v49 = vpop.eup %3027  ;;  %v1356_v63 = vmul.f32 %v3026_v27, %v5010_v1 }
 0x2f9   : > { %v1302_v33 = vpop.xlane.xlu0 %1301  ;;  %2727 = vmatprep.subr.bf16.mxu1 %v2909_v38  ;;  %v1361_v14 = vmul.f32 %v3028_v49, %v5021_v3  ;;  %v1360_v58 = vmul.f32 %v3028_v49, %v5016_v16  ;;  %v1359_v16 = vmul.f32 %v3028_v49, %v5014_v55 }
 0x2fa   : > { %3033 = vrcp.f32 %v1302_v33  ;;  %v1394_v50 = vpack.c.bf16 %v1358_v13, %v1355_v48  ;;  %v1393_v7 = vpack.c.bf16 %v1357_v43, %v1354_v28  ;;  %v1392_v3 = vpack.c.bf16 %v1356_v63, %v1353_v4  ;;  %v2911_v48 = vld [vmem:[#allocation9 + $0x20] sm:$0xff]  }
 0x2fb   : > { %3035 = vrcp.f32 %v1306_v59 }
 0x2fc   : > { %1648 = vmatmul.mubr.bf16.gmra.mrb[8].mxu0 %v1389_v32  ;;  %2728 = vmatpush3.bf16.msra.mxu1 %v2909_v38  ;;  %v1314_v11 = vpop.xlane.xlu1 %1313 }
 0x2fd   : > { %2729 = vmatprep.subr.bf16.mxu1 %v2910_v47  ;;  %2712 = vmatmul.mubr.bf16.gmra.mrb[4].mxu1 %v1394_v50 }
 0x2fe   : > { %v3030_v2 = vpop.eup %3029  ;;  %1655 = vmatprep.mubr.bf16.mxu0 %v1393_v7 }
 0x2ff   : > { %v1310_v25 = vpop.xlane.xlu0 %1309  ;;  %v1364_v6 = vmul.f32 %v3030_v2, %v5058_v51  ;;  %v1363_v21 = vmul.f32 %v3030_v2, %v5056_v9  ;;  %v3032_v22 = vpop.eup %3031  ;;  %v1362_v24 = vmul.f32 %v3030_v2, %v5052_v42 }
 0x300   : > { %3037 = vrcp.f32 %v1310_v25  ;;  %2730 = vmatpush3.bf16.msra.mxu1 %v2910_v47  ;;  %v1367_v51 = vmul.f32 %v3032_v22, %v5048_v19  ;;  %v1366_v19 = vmul.f32 %v3032_v22, %v5042_v44 }
 0x301   : > { %3039 = vrcp.f32 %v1314_v11  ;;  %v1397_v62 = vpack.c.bf16 %v1364_v6, %v1361_v14  ;;  %v1396_v1 = vpack.c.bf16 %v1363_v21, %v1360_v58  ;;  %v1395_v0 = vpack.c.bf16 %v1362_v24, %v1359_v16  ;;  %2731 = vmatprep.subr.bf16.mxu1 %v2911_v48 }
 0x303   : > { %v1318_v31 = vpop.xlane.xlu0 %1317  ;;  %2715 = vmatprep.mubr.bf16.mxu1 %v1397_v62 }
 0x304   : > { %v3034_v18 = vpop.eup %3033  ;;  %3041 = vrcp.f32 %v1318_v31  ;;  %1656 = vmatmul.mubr.bf16.gmra.mrb[12].mxu0 %v1392_v3  ;;  %2732 = vmatpush3.bf16.msra.mxu1 %v2911_v48 }
 0x305   : > { %v1370_v15 = vmul.f32 %v3034_v18, %v5077_v12  ;;  %1663 = vmatprep.mubr.bf16.mxu0 %v1396_v1  ;;  %v3036_v54 = vpop.eup %3035  ;;  %v1369_v52 = vmul.f32 %v3034_v18, %v5074_v29  ;;  %v1368_v55 = vmul.f32 %v3034_v18, %v5072_v40 }
 0x306   : > { %v1373_v45 = vmul.f32 %v3036_v54, %v5068_v57  ;;  %v1372_v44 = vmul.f32 %v3036_v54, %v5065_v34 }
 0x307   : > { %v1400_v9 = vpack.c.bf16 %v1370_v15, %v1367_v51  ;;  %v1399_v35 = vpack.c.bf16 %v1369_v52, %v1366_v19 }
 0x309   : > { %2716 = vmatmul.mubr.bf16.gmra.mrb[8].mxu1 %v1400_v9 }
 0x30a   : > { %v3038_v5 = vpop.eup %3037 }
 0x30b   : > { %v1376_v38 = vmul.f32 %v3038_v5, %v5095_v36  ;;  %v3040_v12 = vpop.eup %3039  ;;  %v1375_v57 = vmul.f32 %v3038_v5, %v5092_v30  ;;  %v1365_v36 = vmul.f32 %v3032_v22, %v5039_v60  ;;  %v1374_v20 = vmul.f32 %v3038_v5, %v5090_v46  ;;  %v2912_v46 = vld [vmem:[#allocation9 + $0x28] sm:$0xff]  }
 0x30c   : > { %1664 = vmatmul.mubr.bf16.gmra.mrb[16].mxu0 %v1395_v0  ;;  %v1379_v42 = vmul.f32 %v3040_v12, %v5086_v56  ;;  %v1378_v40 = vmul.f32 %v3040_v12, %v5083_v26  ;;  %v1377_v34 = vmul.f32 %v3040_v12, %v5081_v37  ;;  %2733 = vmatprep.subr.bf16.mxu1 %v2912_v46 }
 0x30d   : > { %v1403_v10 = vpack.c.bf16 %v1376_v38, %v1373_v45  ;;  %1671 = vmatprep.mubr.bf16.mxu0 %v1399_v35  ;;  %v1398_v33 = vpack.c.bf16 %v1368_v55, %v1365_v36  ;;  %v1402_v53 = vpack.c.bf16 %v1375_v57, %v1372_v44  ;;  %2734 = vmatpush3.bf16.msra.mxu1 %v2912_v46 }
 0x30e   : > { %v3042_v23 = vpop.eup %3041 }
 0x30f   : > { %2719 = vmatprep.mubr.bf16.mxu1 %v1403_v10  ;;  %v1382_v29 = vmul.f32 %v3042_v23, %v5106_v39  ;;  %v1381_v56 = vmul.f32 %v3042_v23, %v5101_v61  ;;  %v1371_v39 = vmul.f32 %v3036_v54, %v5063_v8  ;;  %v1380_v60 = vmul.f32 %v3042_v23, %v5099_v41  ;;  %v2913_v61 = vld [vmem:[#allocation9 + $0x30] sm:$0xff]   ;;  %v2914_v8 = vld [vmem:[#allocation9 + $0x38] sm:$0xff]  }
 0x310   : > { %2735 = vmatprep.subr.bf16.mxu1 %v2913_v61 }
 0x311   : > { %v1406_v59 = vpack.c.bf16 %v1382_v29, %v1379_v42  ;;  %v1401_v17 = vpack.c.bf16 %v1374_v20, %v1371_v39  ;;  %v1405_v27 = vpack.c.bf16 %v1381_v56, %v1378_v40  ;;  %v1404_v30 = vpack.c.bf16 %v1380_v60, %v1377_v34  ;;  %2736 = vmatpush3.bf16.msra.mxu1 %v2913_v61 }
 0x312   : > { %2737 = vmatprep.subr.bf16.mxu1 %v2914_v8 }
 0x313   : > { %2720 = vmatmul.mubr.bf16.gmra.mrb[12].mxu1 %v1406_v59 }
 0x314   : > { %1672 = vmatmul.mubr.bf16.gmra.mrb[20].mxu0 %v1398_v33 }
 0x315   : > { %1679 = vmatprep.mubr.bf16.mxu0 %v1402_v53  ;;  %2738 = vmatpush3.bf16.msra.mxu1 %v2914_v8 }
 0x31c   : > { %1680 = vmatmul.mubr.bf16.gmra.mrb[24].mxu0 %v1401_v17 }
 0x31d   : > { %1687 = vmatprep.mubr.bf16.mxu0 %v1405_v27 }
 0x324   : > { %1688 = vmatmul.mubr.bf16.gmra.mrb[28].mxu0 %v1404_v30 }
 0x3a6   : > { %v2611_v26 = vpop.f32.mrb[0].mxu0 }
 0x3a7   : > { %v2612_v28 = vpop.f32.mrb[1].mxu0 }
 0x3a8   : > { %v2613_v47 = vadd.f32 %v2612_v28, %v2611_v26  ;;  %v2614_v41 = vpop.f32.mrb[2].mxu0 }
 0x3a9   : > { %v2615_v13 = vpop.f32.mrb[3].mxu0 }
 0x3aa   : > { %v2616_v37 = vadd.f32 %v2615_v13, %v2614_v41 }
 0x3c6   : > { %v2709_v32 = vpop.f32.mrb[0].mxu1 }
 0x3c7   : > { %v1730_v43 = vpop.f32.mrb[1].mxu1  ;;  %v2617_v49 = vpop.f32.mrb[4].mxu0 }
 0x3c8   : > { %v1731_v50 = vadd.f32 %v2613_v47, %v1730_v43  ;;  %v2710_v7 = vpop.f32.mrb[2].mxu1  ;;  %v2618_v2 = vpop.f32.mrb[5].mxu0 }
 0x3c9   : > { %v1733_v11 = vpop.f32.mrb[3].mxu1  ;;  %v2619_v25 = vadd.f32 %v2618_v2, %v2617_v49  ;;  %v2620_v14 = vpop.f32.mrb[6].mxu0 }
 0x3ca   : > { %v1734_v6 = vadd.f32 %v2616_v37, %v1733_v11  ;;  %v2621_v63 = vpop.f32.mrb[7].mxu0 }
 0x3cb   : > { %v1739_v21 = vadd.f32 %v2709_v32, %v2619_v25  ;;  %v2622_v22 = vadd.f32 %v2621_v63, %v2620_v14 }
 0x3cc   : > { %v1793_v62 = vpack.c.bf16 %v1734_v6, %v1731_v50 }
 0x3cd   : > { %v1742_v4 = vadd.f32 %v2710_v7, %v2622_v22 }
 0x3ce   : > { %2739 = vmatprep.mubr.bf16.mxu1 %v1793_v62 }
 0x3cf   : > { %v1794_v31 = vpack.c.bf16 %v1742_v4, %v1739_v21  ;;  %v2623_v58 = vpop.f32.mrb[8].mxu0 }
 0x3d0   : > { %v2624_v18 = vpop.f32.mrb[9].mxu0  ;;  %v2713_v3 = vpop.f32.mrb[4].mxu1 }
 0x3d1   : > { %v2625_v51 = vadd.f32 %v2624_v18, %v2623_v58  ;;  %v2626_v15 = vpop.f32.mrb[10].mxu0  ;;  %2740 = vmatmul.mubr.bf16.vlgmr.msra.gmra.mrb[16].mxu1 %v1794_v31  ;;  %v1746_v1 = vpop.f32.mrb[5].mxu1 }
 0x3d2   : > { %v2627_v9 = vpop.f32.mrb[11].mxu0  ;;  %v2714_v54 = vpop.f32.mrb[6].mxu1 }
 0x3d3   : > { %v1747_v24 = vadd.f32 %v2625_v51, %v1746_v1  ;;  %v2628_v52 = vadd.f32 %v2627_v9, %v2626_v15  ;;  %v1749_v5 = vpop.f32.mrb[7].mxu1 }
 0x3d5   : > { %v1750_v16 = vadd.f32 %v2628_v52, %v1749_v5 }
 0x3d7   : > { %v2629_v45 = vpop.f32.mrb[12].mxu0  ;;  %v1795_v38 = vpack.c.bf16 %v1750_v16, %v1747_v24 }
 0x3d8   : > { %v2630_v19 = vpop.f32.mrb[13].mxu0 }
 0x3d9   : > { %v2631_v12 = vadd.f32 %v2630_v19, %v2629_v45  ;;  %v2632_v0 = vpop.f32.mrb[14].mxu0  ;;  %2743 = vmatprep.mubr.bf16.mxu1 %v1795_v38 }
 0x3da   : > { %v2633_v35 = vpop.f32.mrb[15].mxu0 }
 0x3db   : > { %v1755_v42 = vadd.f32 %v2713_v3, %v2631_v12  ;;  %v2634_v29 = vadd.f32 %v2633_v35, %v2632_v0  ;;  %v5157_v3 = vld [vmem:[#allocation11] ss:$0 sm:$0xff] }
 0x3dc   : > { %v2717_v10 = vpop.f32.mrb[8].mxu1 }
 0x3dd   : > { %v1762_v23 = vpop.f32.mrb[9].mxu1  ;;  %v1758_v57 = vadd.f32 %v2714_v54, %v2634_v29  ;;  %v5161_v54 = vld [vmem:[#allocation12] ss:$0 sm:$0xff] }
 0x3de   : > { %v2718_v55 = vpop.f32.mrb[10].mxu1 }
 0x3df   : > { %v1765_v59 = vpop.f32.mrb[11].mxu1  ;;  %v2635_v36 = vpop.f32.mrb[16].mxu0  ;;  %v1796_v44 = vpack.c.bf16 %v1758_v57, %v1755_v42 }
 0x3e0   : > { %v2636_v33 = vpop.f32.mrb[17].mxu0 }
 0x3e1   : > { %v2637_v53 = vadd.f32 %v2636_v33, %v2635_v36  ;;  %v2638_v20 = vpop.f32.mrb[18].mxu0  ;;  %2744 = vmatmul.mubr.bf16.gmra.mrb[20].mxu1 %v1796_v44 }
 0x3e2   : > { %v2639_v56 = vpop.f32.mrb[19].mxu0 }
 0x3e3   : > { %v1763_v39 = vadd.f32 %v2637_v53, %v1762_v23  ;;  %v2640_v40 = vadd.f32 %v2639_v56, %v2638_v20 }
 0x3e5   : > { %v1766_v60 = vadd.f32 %v2640_v40, %v1765_v59 }
 0x3e6   : > { %v2721_v17 = vpop.f32.mrb[12].mxu1 }
 0x3e7   : > { %v1778_v27 = vpop.f32.mrb[13].mxu1  ;;  %v2641_v48 = vpop.f32.mrb[20].mxu0  ;;  %v1797_v46 = vpack.c.bf16 %v1766_v60, %v1763_v39 }
 0x3e8   : > { %v2722_v34 = vpop.f32.mrb[14].mxu1  ;;  %v2642_v61 = vpop.f32.mrb[21].mxu0 }
 0x3e9   : > { %v1781_v30 = vpop.f32.mrb[15].mxu1  ;;  %v2643_v8 = vadd.f32 %v2642_v61, %v2641_v48  ;;  %v2644_v26 = vpop.f32.mrb[22].mxu0  ;;  %2747 = vmatprep.mubr.bf16.mxu1 %v1797_v46 }
 0x3ea   : > { %v2645_v28 = vpop.f32.mrb[23].mxu0 }
 0x3eb   : > { %v1771_v47 = vadd.f32 %v2717_v10, %v2643_v8  ;;  %v2646_v41 = vadd.f32 %v2645_v28, %v2644_v26 }
 0x3ed   : > { %v1774_v13 = vadd.f32 %v2718_v55, %v2646_v41 }
 0x3ef   : > { %v2647_v37 = vpop.f32.mrb[24].mxu0  ;;  %v1798_v32 = vpack.c.bf16 %v1774_v13, %v1771_v47 }
 0x3f0   : > { %v2648_v43 = vpop.f32.mrb[25].mxu0 }
 0x3f1   : > { %v2649_v49 = vadd.f32 %v2648_v43, %v2647_v37  ;;  %v2650_v50 = vpop.f32.mrb[26].mxu0  ;;  %2748 = vmatmul.mubr.bf16.gmra.mrb[24].mxu1 %v1798_v32 }
 0x3f2   : > { %v2651_v7 = vpop.f32.mrb[27].mxu0 }
 0x3f3   : > { %v1779_v2 = vadd.f32 %v2649_v49, %v1778_v27  ;;  %v2652_v11 = vadd.f32 %v2651_v7, %v2650_v50 }
 0x3f5   : > { %v1782_v25 = vadd.f32 %v2652_v11, %v1781_v30 }
 0x3f7   : > { %v2653_v14 = vpop.f32.mrb[28].mxu0  ;;  %v1799_v6 = vpack.c.bf16 %v1782_v25, %v1779_v2 }
 0x3f8   : > { %v2654_v63 = vpop.f32.mrb[29].mxu0 }
 0x3f9   : > { %v2655_v21 = vadd.f32 %v2654_v63, %v2653_v14  ;;  %v2656_v22 = vpop.f32.mrb[30].mxu0  ;;  %2751 = vmatprep.mubr.bf16.mxu1 %v1799_v6 }
 0x3fa   : > { %v2657_v62 = vpop.f32.mrb[31].mxu0 }
 0x3fb   : > { %v1787_v4 = vadd.f32 %v2721_v17, %v2655_v21  ;;  %v2658_v31 = vadd.f32 %v2657_v62, %v2656_v22 }
 0x3fd   : > { %v1790_v58 = vadd.f32 %v2722_v34, %v2658_v31 }
 0x3ff   : > { %v1800_v18 = vpack.c.bf16 %v1790_v58, %v1787_v4 }
 0x401   : > { %2752 = vmatmul.mubr.bf16.gmra.mrb[28].mxu1 %v1800_v18 }
 0x4a4   : > { %v2741_v51 = vpop.f32.mrb[16].mxu1 }
 0x4a5   : > { %v1899_v15 = vpop.f32.mrb[17].mxu1  ;;  %v2051_v1 = vmul.f32 %v2741_v51, %v5157_v3  ;;  %v2123_v45 = vmul.f32 %v2741_v51, %v5161_v54 }
 0x4a6   : > { %v2742_v9 = vpop.f32.mrb[18].mxu1  ;;  %v2049_v19 = vmul.f32 %v5157_v3, %v1899_v15  ;;  %v2121_v0 = vmul.f32 %v5161_v54, %v1899_v15 }
 0x4a7   : > { %v2556_v24 = vpack.c.bf16 %v2742_v9, %v2741_v51  ;;  %2069 = vadd.xlane.f32.xlu1 %v2051_v1  ;;  %v1902_v52 = vpop.f32.mrb[19].mxu1  ;;  %v2052_v5 = vmul.f32 %v2742_v9, %v5157_v3  ;;  %v2124_v38 = vmul.f32 %v2742_v9, %v5161_v54 }
 0x4a8   : > { %v2551_v16 = vpack.c.bf16 %v1902_v52, %v1899_v15  ;;  %v2050_v12 = vmul.f32 %v5157_v3, %v1902_v52  ;;  %v2122_v10 = vmul.f32 %v5161_v54, %v1902_v52 }
 0x4a9   : > { %2588 = vst [vmem:[%s5164_s17 + $0x8] sm:$0xff] %v2556_v24   ;;  %2071 = vadd.xlane.f32.xlu0 %v2052_v5 }
 0x4aa   : > { %2552 = vst [vmem:[%s5164_s17] sm:$0xff] %v2551_v16  }
 0x4ab   : > { %2141 = vadd.xlane.f32.xlu1 %v2123_v45 }
 0x4ad   : > { %2143 = vadd.xlane.f32.xlu0 %v2124_v38 }
 0x4af   : > { %2065 = vadd.xlane.f32.xlu1 %v2049_v19 }
 0x4b1   : > { %2067 = vadd.xlane.f32.xlu0 %v2050_v12 }
 0x4b3   : > { %2137 = vadd.xlane.f32.xlu1 %v2121_v0 }
 0x4b4   : > { %v2745_v35 = vpop.f32.mrb[20].mxu1 }
 0x4b5   : > { %2139 = vadd.xlane.f32.xlu0 %v2122_v10  ;;  %v1915_v23 = vpop.f32.mrb[21].mxu1  ;;  %v2055_v42 = vmul.f32 %v2745_v35, %v5157_v3  ;;  %v2127_v44 = vmul.f32 %v2745_v35, %v5161_v54 }
 0x4b6   : > { %v2746_v29 = vpop.f32.mrb[22].mxu1  ;;  %v2053_v53 = vmul.f32 %v5157_v3, %v1915_v23  ;;  %v2125_v56 = vmul.f32 %v5161_v54, %v1915_v23 }
 0x4b7   : > { %v2566_v55 = vpack.c.bf16 %v2746_v29, %v2745_v35  ;;  %2077 = vadd.xlane.f32.xlu1 %v2055_v42  ;;  %v1918_v59 = vpop.f32.mrb[23].mxu1  ;;  %v2056_v57 = vmul.f32 %v2746_v29, %v5157_v3  ;;  %v2128_v33 = vmul.f32 %v2746_v29, %v5161_v54 }
 0x4b8   : > { %v2561_v36 = vpack.c.bf16 %v1918_v59, %v1915_v23  ;;  %v2054_v20 = vmul.f32 %v5157_v3, %v1918_v59  ;;  %v2126_v39 = vmul.f32 %v5161_v54, %v1918_v59 }
 0x4b9   : > { %2590 = vst [vmem:[%s5164_s17 + $0x18] sm:$0xff] %v2566_v55   ;;  %2079 = vadd.xlane.f32.xlu0 %v2056_v57 }
 0x4ba   : > { %2589 = vst [vmem:[%s5164_s17 + $0x10] sm:$0xff] %v2561_v36  }
 0x4bb   : > { %2149 = vadd.xlane.f32.xlu1 %v2127_v44 }
 0x4bd   : > { %2151 = vadd.xlane.f32.xlu0 %v2128_v33 }
 0x4bf   : > { %2073 = vadd.xlane.f32.xlu1 %v2053_v53 }
 0x4c1   : > { %2075 = vadd.xlane.f32.xlu0 %v2054_v20 }
 0x4c3   : > { %2145 = vadd.xlane.f32.xlu1 %v2125_v56 }
 0x4c4   : > { %v2749_v40 = vpop.f32.mrb[24].mxu1 }
 0x4c5   : > { %2147 = vadd.xlane.f32.xlu0 %v2126_v39  ;;  %v1931_v17 = vpop.f32.mrb[25].mxu1  ;;  %v2059_v27 = vmul.f32 %v2749_v40, %v5157_v3  ;;  %v2131_v61 = vmul.f32 %v2749_v40, %v5161_v54 }
 0x4c6   : > { %v2750_v60 = vpop.f32.mrb[26].mxu1  ;;  %v2057_v26 = vmul.f32 %v5157_v3, %v1931_v17  ;;  %v2129_v47 = vmul.f32 %v5161_v54, %v1931_v17 }
 0x4c7   : > { %v2576_v34 = vpack.c.bf16 %v2750_v60, %v2749_v40  ;;  %2085 = vadd.xlane.f32.xlu1 %v2059_v27  ;;  %v1934_v30 = vpop.f32.mrb[27].mxu1  ;;  %v2060_v48 = vmul.f32 %v2750_v60, %v5157_v3  ;;  %v2132_v8 = vmul.f32 %v2750_v60, %v5161_v54 }
 0x4c8   : > { %v2571_v46 = vpack.c.bf16 %v1934_v30, %v1931_v17  ;;  %v2058_v28 = vmul.f32 %v5157_v3, %v1934_v30  ;;  %v2130_v41 = vmul.f32 %v5161_v54, %v1934_v30 }
 0x4c9   : > { %2592 = vst [vmem:[%s5164_s17 + $0x28] sm:$0xff] %v2576_v34   ;;  %2087 = vadd.xlane.f32.xlu0 %v2060_v48 }
 0x4ca   : > { %2591 = vst [vmem:[%s5164_s17 + $0x20] sm:$0xff] %v2571_v46  }
 0x4cb   : > { %2157 = vadd.xlane.f32.xlu1 %v2131_v61 }
 0x4cd   : > { %2159 = vadd.xlane.f32.xlu0 %v2132_v8 }
 0x4cf   : > { %2081 = vadd.xlane.f32.xlu1 %v2057_v26 }
 0x4d1   : > { %2083 = vadd.xlane.f32.xlu0 %v2058_v28 }
 0x4d3   : > { %2153 = vadd.xlane.f32.xlu1 %v2129_v47 }
 0x4d4   : > { %v2753_v13 = vpop.f32.mrb[28].mxu1 }
 0x4d5   : > { %2155 = vadd.xlane.f32.xlu0 %v2130_v41  ;;  %v1947_v37 = vpop.f32.mrb[29].mxu1  ;;  %v2063_v32 = vmul.f32 %v2753_v13, %v5157_v3  ;;  %v2135_v63 = vmul.f32 %v2753_v13, %v5161_v54 }
 0x4d6   : > { %v2754_v43 = vpop.f32.mrb[30].mxu1  ;;  %v2061_v11 = vmul.f32 %v5157_v3, %v1947_v37  ;;  %v2133_v14 = vmul.f32 %v5161_v54, %v1947_v37 }
 0x4d7   : > { %v2586_v49 = vpack.c.bf16 %v2754_v43, %v2753_v13  ;;  %2093 = vadd.xlane.f32.xlu1 %v2063_v32  ;;  %v1950_v50 = vpop.f32.mrb[31].mxu1  ;;  %v2064_v7 = vmul.f32 %v2754_v43, %v5157_v3  ;;  %v2136_v21 = vmul.f32 %v2754_v43, %v5161_v54 }
 0x4d8   : > { %v2581_v2 = vpack.c.bf16 %v1950_v50, %v1947_v37  ;;  %v2062_v25 = vmul.f32 %v5157_v3, %v1950_v50  ;;  %v2134_v6 = vmul.f32 %v5161_v54, %v1950_v50 }
 0x4d9   : > { %2594 = vst [vmem:[%s5164_s17 + $0x38] sm:$0xff] %v2586_v49   ;;  %2095 = vadd.xlane.f32.xlu0 %v2064_v7 }
 0x4da   : > { %2593 = vst [vmem:[%s5164_s17 + $0x30] sm:$0xff] %v2581_v2  }
 0x4db   : > { %2089 = vadd.xlane.f32.xlu1 %v2061_v11 }
 0x4dd   : > { %2091 = vadd.xlane.f32.xlu0 %v2062_v25 }
 0x4df   : > { %2161 = vadd.xlane.f32.xlu1 %v2133_v14 }
 0x4e1   : > { %2163 = vadd.xlane.f32.xlu0 %v2134_v6 }
 0x4e3   : > { %2165 = vadd.xlane.f32.xlu1 %v2135_v63 }
 0x4e5   : > { %2167 = vadd.xlane.f32.xlu0 %v2136_v21 }
 0x4e6   : > { %3256 = shalt.err (!%p3253_p0)
}
 0x4e7   : > { %s3257_s28 = scalar_lea.hbm %s5209_s27, 1024  ;;  %s3261_s13 = scalar_lea.hbm %s5408_s7, 3072 }
 0x4e8   : > { %p3258_p8 = scmp.ne.s32.totalorder %s5209_s27, %s3257_s28  ;;  %p3262_p12 = scmp.lt.u32.totalorder %s5209_s27, %s5408_s7 }
 0x4e9   : > { %p3263_p13 = scmp.lt.u32.totalorder %s3261_s13, %s3257_s28  ;;  %p3265_p6 = scmp.lt.u32.totalorder %s3257_s28, %s5209_s27 }
 0x4ea   : > { %p3259_p1 = pnand %p3258_p8, %p5785_p11 }
 0x4eb   : > { %p3264_p7 = por %p3263_p13, %p3262_p12 }
 0x4ec   : > { %p3260_p3 = pneg %p3259_p1 }
 0x4ed   : > { %p3266_p5 = por %p3265_p6, %p3264_p7 }
 0x4ef   : > { %p3267_p4 = pnand %p3266_p5, %p3260_p3 }
 0x4f1   : > { %3270 = shalt.err (!%p3267_p4)
}
 0x4f2   : > { %s3406_s24 = smov 64   ;;  %s3407_s18 = smov 4   ;;  %vm2097_vm12 = vcmask 7168  }
 0x4f3   : > { %2782 = dma.vmem_to_hbm [thread:$0]  (%p5785_p11), %s5211_s25, 1024, %s5209_s27, %s2186_s11, %s3406_s24, %s3406_s24, %s3407_s18  }
 0x4f4   : > { %s5238_s17 = scalar_lea.vmem [#allocation15], %s3736_s9  ;;  %s5245_s26 = scalar_lea.vmem [#allocation17], %s3736_s9 }
 0x4f5   : > { %s2546_s30 = sshll.u32 %s3483_s15, 11  ;;  %s2225_s9 = sshll.u32 %s5238_s17, 4  ;;  %s5304_s9 = int_to_ptr.vmem [resolvable:$true] %s2225_s9 }
 0x4f6   : > { %s5786_s29 = sld [smem:[#allocation75_spill]]  ;;  %s5312_s11 = scalar_lea.sflag [#allocation16], %s391_s4 }
 0x4f7   : > { %s3271_s20 = scalar_lea.vmem %s5304_s9, 2048  ;;  %s3408_s0 = smov [#allocation15]  }
 0x4f8   : > { %p3272_p2 = scmp.ne.s32.totalorder %s5304_s9, %s3271_s20  ;;  %s3275_s22 = sshll.u32 %s3408_s0, 4  ;;  %s3276_s22 = int_to_ptr.vmem [resolvable:$false] %s3275_s22 }
 0x4f9   : > { %s3277_s1 = scalar_lea.vmem %s3276_s22, 4096  ;;  %p3278_p0 = scmp.lt.s32.totalorder %s5304_s9, %s3276_s22 }
 0x4fa   : > { %p3273_p10 = pnand %p3272_p2, %p5785_p11  ;;  %p3279_p8 = scmp.lt.s32.totalorder %s3277_s1, %s3271_s20 }
 0x4fc   : > { %s5302_s27 = scalar_lea.hbm %s5786_s29, %s2546_s30  ;;  %p3274_p9 = pneg %p3273_p10 }
 0x4fd   : > { %p3280_p1 = por %p3279_p8, %p3278_p0 }
 0x4ff   : > { %p3281_p3 = pnand %p3280_p1, %p3274_p9 }
 0x534   : > { %v2070_v22 = vpop.xlane.xlu1 %2069 }
 0x535   : > { %2100 = vst.msk [vmem:[%s5238_s17 + $0x10] sm:$0xff] %vm2097_vm12, %v2070_v22 }
 0x536   : > { %v2072_v62 = vpop.xlane.xlu0 %2071 }
 0x537   : > { %2101 = vst.msk [vmem:[%s5238_s17 + $0x18] sm:$0xff] %vm2097_vm12, %v2072_v62 }
 0x538   : > { %v2142_v4 = vpop.xlane.xlu1 %2141 }
 0x539   : > { %2171 = vst.msk [vmem:[%s5245_s26 + $0x10] sm:$0xff] %vm2097_vm12, %v2142_v4 }
 0x53a   : > { %v2144_v31 = vpop.xlane.xlu0 %2143 }
 0x53b   : > { %2172 = vst.msk [vmem:[%s5245_s26 + $0x18] sm:$0xff] %vm2097_vm12, %v2144_v31 }
 0x53c   : > { %v2066_v58 = vpop.xlane.xlu1 %2065 }
 0x53d   : > { %2098 = vst.msk [vmem:[%s5238_s17] sm:$0xff] %vm2097_vm12, %v2066_v58 }
 0x53e   : > { %v2068_v18 = vpop.xlane.xlu0 %2067 }
 0x53f   : > { %2099 = vst.msk [vmem:[%s5238_s17 + $0x8] sm:$0xff] %vm2097_vm12, %v2068_v18 }
 0x540   : > { %v2138_v3 = vpop.xlane.xlu1 %2137 }
 0x541   : > { %2169 = vst.msk [vmem:[%s5245_s26] sm:$0xff] %vm2097_vm12, %v2138_v3 }
 0x542   : > { %v2140_v51 = vpop.xlane.xlu0 %2139 }
 0x543   : > { %2170 = vst.msk [vmem:[%s5245_s26 + $0x8] sm:$0xff] %vm2097_vm12, %v2140_v51 }
 0x544   : > { %v2078_v15 = vpop.xlane.xlu1 %2077 }
 0x545   : > { %2104 = vst.msk [vmem:[%s5238_s17 + $0x30] sm:$0xff] %vm2097_vm12, %v2078_v15 }
 0x546   : > { %v2080_v1 = vpop.xlane.xlu0 %2079 }
 0x547   : > { %2105 = vst.msk [vmem:[%s5238_s17 + $0x38] sm:$0xff] %vm2097_vm12, %v2080_v1 }
 0x548   : > { %v2150_v9 = vpop.xlane.xlu1 %2149 }
 0x549   : > { %2175 = vst.msk [vmem:[%s5245_s26 + $0x30] sm:$0xff] %vm2097_vm12, %v2150_v9 }
 0x54a   : > { %v2152_v54 = vpop.xlane.xlu0 %2151 }
 0x54b   : > { %2176 = vst.msk [vmem:[%s5245_s26 + $0x38] sm:$0xff] %vm2097_vm12, %v2152_v54 }
 0x54c   : > { %v2074_v24 = vpop.xlane.xlu1 %2073 }
 0x54d   : > { %2102 = vst.msk [vmem:[%s5238_s17 + $0x20] sm:$0xff] %vm2097_vm12, %v2074_v24 }
 0x54e   : > { %v2076_v52 = vpop.xlane.xlu0 %2075 }
 0x54f   : > { %2103 = vst.msk [vmem:[%s5238_s17 + $0x28] sm:$0xff] %vm2097_vm12, %v2076_v52 }
 0x550   : > { %v2146_v5 = vpop.xlane.xlu1 %2145 }
 0x551   : > { %2173 = vst.msk [vmem:[%s5245_s26 + $0x20] sm:$0xff] %vm2097_vm12, %v2146_v5 }
 0x552   : > { %v2148_v16 = vpop.xlane.xlu0 %2147 }
 0x553   : > { %2174 = vst.msk [vmem:[%s5245_s26 + $0x28] sm:$0xff] %vm2097_vm12, %v2148_v16 }
 0x554   : > { %v2086_v45 = vpop.xlane.xlu1 %2085 }
 0x555   : > { %2108 = vst.msk [vmem:[%s5238_s17 + $0x50] sm:$0xff] %vm2097_vm12, %v2086_v45 }
 0x556   : > { %v2088_v38 = vpop.xlane.xlu0 %2087 }
 0x557   : > { %2109 = vst.msk [vmem:[%s5238_s17 + $0x58] sm:$0xff] %vm2097_vm12, %v2088_v38 }
 0x558   : > { %v2158_v19 = vpop.xlane.xlu1 %2157 }
 0x559   : > { %2179 = vst.msk [vmem:[%s5245_s26 + $0x50] sm:$0xff] %vm2097_vm12, %v2158_v19 }
 0x55a   : > { %v2160_v12 = vpop.xlane.xlu0 %2159 }
 0x55b   : > { %2180 = vst.msk [vmem:[%s5245_s26 + $0x58] sm:$0xff] %vm2097_vm12, %v2160_v12 }
 0x55c   : > { %v2082_v0 = vpop.xlane.xlu1 %2081 }
 0x55d   : > { %2106 = vst.msk [vmem:[%s5238_s17 + $0x40] sm:$0xff] %vm2097_vm12, %v2082_v0 }
 0x55e   : > { %v2084_v10 = vpop.xlane.xlu0 %2083 }
 0x55f   : > { %2107 = vst.msk [vmem:[%s5238_s17 + $0x48] sm:$0xff] %vm2097_vm12, %v2084_v10 }
 0x560   : > { %v2154_v35 = vpop.xlane.xlu1 %2153 }
 0x561   : > { %2177 = vst.msk [vmem:[%s5245_s26 + $0x40] sm:$0xff] %vm2097_vm12, %v2154_v35 }
 0x562   : > { %v2156_v23 = vpop.xlane.xlu0 %2155 }
 0x563   : > { %2178 = vst.msk [vmem:[%s5245_s26 + $0x48] sm:$0xff] %vm2097_vm12, %v2156_v23 }
 0x564   : > { %v2094_v42 = vpop.xlane.xlu1 %2093 }
 0x565   : > { %2112 = vst.msk [vmem:[%s5238_s17 + $0x70] sm:$0xff] %vm2097_vm12, %v2094_v42 }
 0x566   : > { %v2096_v29 = vpop.xlane.xlu0 %2095 }
 0x567   : > { %2113 = vst.msk [vmem:[%s5238_s17 + $0x78] sm:$0xff] %vm2097_vm12, %v2096_v29 }
 0x568   : > { %v2090_v55 = vpop.xlane.xlu1 %2089 }
 0x569   : > { %2110 = vst.msk [vmem:[%s5238_s17 + $0x60] sm:$0xff] %vm2097_vm12, %v2090_v55 }
 0x56a   : > { %v2092_v59 = vpop.xlane.xlu0 %2091 }
 0x56b   : > { %2111 = vst.msk [vmem:[%s5238_s17 + $0x68] sm:$0xff] %vm2097_vm12, %v2092_v59 }
 0x56c   : > { %v2162_v57 = vpop.xlane.xlu1 %2161 }
 0x56d   : > { %3284 = shalt.err (!%p3281_p3)
}
 0x56e   : > { %s3285_s4 = scalar_lea.hbm %s5302_s27, 2048  ;;  %s3289_s21 = scalar_lea.hbm %s5786_s29, 6144 }
 0x56f   : > { %p3286_p12 = scmp.ne.s32.totalorder %s5302_s27, %s3285_s4  ;;  %p3290_p6 = scmp.lt.u32.totalorder %s5302_s27, %s5786_s29 }
 0x570   : > { %p3291_p5 = scmp.lt.u32.totalorder %s3289_s21, %s3285_s4  ;;  %p3293_p2 = scmp.lt.u32.totalorder %s3285_s4, %s5302_s27 }
 0x571   : > { %p3287_p13 = pnand %p3286_p12, %p5785_p11 }
 0x572   : > { %p3292_p4 = por %p3291_p5, %p3290_p6 }
 0x573   : > { %p3288_p7 = pneg %p3287_p13 }
 0x574   : > { %p3294_p10 = por %p3293_p2, %p3292_p4 }
 0x576   : > { %p3295_p9 = pnand %p3294_p10, %p3288_p7 }
 0x578   : > { %3298 = shalt.err (!%p3295_p9)
}
 0x579   : > { %s3409_s16 = smov 128   ;;  %s3410_s24 = smov 8   ;;  %2181 = vst.msk [vmem:[%s5245_s26 + $0x60] sm:$0xff] %vm2097_vm12, %v2162_v57  ;;  %v2164_v36 = vpop.xlane.xlu0 %2163  ;;  %v2166_v44 = vpop.xlane.xlu1 %2165 }
 0x57a   : > { %2783 = dma.vmem_to_hbm [thread:$0]  (%p5785_p11), %s5304_s9, 2048, %s5302_s27, %s5312_s11, %s3409_s16, %s3409_s16, %s3410_s24  }
 0x57b   : > { %s2241_s18 = sshll.u32 %s5245_s26, 4  ;;  %2182 = vst.msk [vmem:[%s5245_s26 + $0x68] sm:$0xff] %vm2097_vm12, %v2164_v36  ;;  %2183 = vst.msk [vmem:[%s5245_s26 + $0x70] sm:$0xff] %vm2097_vm12, %v2166_v44  ;;  %s5787_s23 = sld [smem:[#allocation76_spill]]  ;;  %s5353_s18 = int_to_ptr.vmem [resolvable:$true] %s2241_s18 }
 0x57c   : > { %s3299_s9 = scalar_lea.vmem %s5353_s18, 2048  ;;  %s3411_s27 = smov [#allocation17]  }
 0x57d   : > { %v2168_v33 = vpop.xlane.xlu0 %2167  ;;  %p3300_p0 = scmp.ne.s32.totalorder %s5353_s18, %s3299_s9  ;;  %s3303_s15 = sshll.u32 %s3411_s27, 4  ;;  %s3304_s15 = int_to_ptr.vmem [resolvable:$false] %s3303_s15 }
 0x57e   : > { %2184 = vst.msk [vmem:[%s5245_s26 + $0x78] sm:$0xff] %vm2097_vm12, %v2168_v33  ;;  %s3305_s0 = scalar_lea.vmem %s3304_s15, 4096  ;;  %p3306_p3 = scmp.lt.s32.totalorder %s5353_s18, %s3304_s15 }
 0x57f   : > { %p3301_p8 = pnand %p3300_p0, %p5785_p11  ;;  %p3307_p12 = scmp.lt.s32.totalorder %s3305_s0, %s3299_s9 }
 0x581   : > { %s5351_s20 = scalar_lea.hbm %s5787_s23, %s2546_s30  ;;  %p3302_p1 = pneg %p3301_p8 }
 0x582   : > { %p3308_p13 = por %p3307_p12, %p3306_p3 }
 0x584   : > { %p3309_p7 = pnand %p3308_p13, %p3302_p1 }
 0x586   : > { %3312 = shalt.err (!%p3309_p7)
}
 0x587   : > { %s3313_s26 = scalar_lea.hbm %s5351_s20, 2048  ;;  %s3317_s1 = scalar_lea.hbm %s5787_s23, 6144 }
 0x588   : > { %p3314_p6 = scmp.ne.s32.totalorder %s5351_s20, %s3313_s26  ;;  %p3318_p2 = scmp.lt.u32.totalorder %s5351_s20, %s5787_s23 }
 0x589   : > { %p3319_p10 = scmp.lt.u32.totalorder %s3317_s1, %s3313_s26  ;;  %p3321_p0 = scmp.lt.u32.totalorder %s3313_s26, %s5351_s20 }
 0x58a   : > { %p3315_p5 = pnand %p3314_p6, %p5785_p11 }
 0x58b   : > { %p3320_p9 = por %p3319_p10, %p3318_p2 }
 0x58c   : > { %p3316_p4 = pneg %p3315_p5 }
 0x58d   : > { %p3322_p8 = por %p3321_p0, %p3320_p9 }
 0x58f   : > { %p3323_p1 = pnand %p3322_p8, %p3316_p4 }
 0x591   : > { %3326 = shalt.err (!%p3323_p1)
}
 0x592   : > { %2784 = dma.vmem_to_hbm [thread:$0]  (%p5785_p11), %s5353_s18, 2048, %s5351_s20, %s5312_s11, %s3409_s16, %s3409_s16, %s3410_s24  }
 0x593 PF: > { %s5788_s8 = sld [smem:[#allocation26_spill]]  ;;  %s5789_s21 = sld [smem:[#allocation30_spill]] }
 0x594   : > { %p2832_p3 = scmp.ge.s32.totalorder %s3389_s12, 2 }
 0x599   : > { %s2256_s13 = sand.u32 1, %s5788_s8   ;;  %p5790_p12 = scmp.ne.s32.totalorder %s5789_s21, 0 }
 0x59a   : > { %s2257_s19 = scalar_lea.sflag [#allocation4], %s2256_s13 }
 0x59b   : > { %p2812_p13 = pnand %p2832_p3, %p5790_p12 }
 0x59d   : > { %3368 = dma.done.wait (!%p2812_p13), %s2257_s19, 1024  }
 0x59e   : > { %3370 = vsyncadd (!%p2812_p13), %s2257_s19, 4294966272  ;;  %s5791_s14 = sadd.s32 4294967294, %s3389_s12  }
 0x59f   : > { %s2265_s17 = sand.u32 1, %s5791_s14  }
 0x5a0   : > { %s2266_s25 = scalar_lea.sflag [#allocation16], %s2265_s17 }
 0x5a1   : > { %3372 = dma.done.wait (!%p2812_p13), %s2266_s25, 4096  }
 0x5a2   : > { %3374 = vsyncadd (!%p2812_p13), %s2266_s25, 4294963200  ;;  %s5792_s12 = sld [smem:[#allocation28_spill]]  ;;  %s5793_s11 = sld [smem:[#allocation27_spill]] }
 0x5a3   : > { %s5794_s16 = sld [smem:[#allocation29_spill]]  ;;  %s5795_s30 = smov %s3381_s10 }
 0x5a8   : > { %p29_p11 = scmp.ge.s32.totalorder %s5792_s12, 5   ;;  %s5796_s10 = smov %s5793_s11 }
 0x5a9   : > { %s5797_s11 = smov %s5794_s16 }
 0x5aa   :  { %31 = sbr.rel (!%p29_p11) target bundleno = 16 (0x10), region = 156 }
 0x5b1   :  { %2280 = vsyncpa [#allocation3], 1 }
 0x5b2   :  { %2282 = vsyncpa [#allocation3 + $0x1], 1 }
 0x5b3   :  { %2283 = vsyncpa [#allocation6], 1 }
 0x5b4   :  { %2284 = vsyncpa [#allocation10], 1 }
 0x5b5   :  { %2285 = vsyncpa [#allocation13], 1 }
 0x5b6   :  { %2286 = vsyncpa [#allocation4], 1 }
 0x5b7   :  { %2288 = vsyncpa [#allocation4 + $0x1], 1 }
 0x5b8   :  { %2289 = vsyncpa [#allocation16], 1 }
 0x5b9   :  { %2291 = vsyncpa [#allocation16 + $0x1], 1 }

</bundles_post_ra>
